<compile_context>
chip_gen: v5e
topology: v5e:2x2
jax: 0.10.0
libtpu: 0.0.40
codegen_flags: <defaults>
</compile_context>

<pallas_src>
import functools

import jax
import jax.numpy as jnp
from jax.experimental import pallas as pl
from jax.experimental.pallas import tpu as pltpu


# ------------------------------ fused kernel --------------------------------

def _vit_fused_kernel(patches_ref, base_ref, patch_w_ref,
                      qkv_w_ref, qkv_b_ref, proj_w_ref, vec_ref,
                      fc1_w_ref, fc1_b_ref, fc2_w_ref,
                      head_w_ref, head_b_ref, out_ref,
                      *, depth, num_heads, seq_valid, seq_pad,
                      images_per_step, embed):
    f32 = jnp.float32
    bf16 = jnp.bfloat16
    TB = images_per_step
    SP = seq_pad
    R = TB * SP                      # packed rows per grid step

    def layernorm(x, g, b):
        # eps matches nn.LayerNorm(eps=1e-06); statistics kept in f32.
        mu = jnp.mean(x, axis=-1, keepdims=True)
        xc = x - mu
        var = jnp.mean(xc * xc, axis=-1, keepdims=True)
        return xc * jax.lax.rsqrt(var + 1e-6) * g + b

    # Patch embedding: bf16 MXU matmul, f32 accumulation.  Patch-embed bias,
    # cls token and positional embedding are pre-folded into `base`.
    base = base_ref[...]
    if TB > 1:
        base = jnp.concatenate([base] * TB, axis=0)               # [R, E]
    h = jnp.dot(patches_ref[0], patch_w_ref[...],
                preferred_element_type=f32) + base                # [R, E] f32

    # Block-diagonal key-side softmax mask (padded tokens + other images in the
    # packed row slab), built ONCE per invocation (hoisted out of the loops).
    col_ids = jax.lax.broadcasted_iota(jnp.int32, (1, R), 1)
    bias_rows = []
    for i in range(TB):
        lo = i * SP
        ok = (col_ids >= lo) & (col_ids < lo + seq_valid)
        bias_rows.append(jnp.broadcast_to(
            jnp.where(ok, 0.0, -1e9).astype(f32), (SP, R)))
    key_bias = jnp.concatenate(bias_rows, axis=0)                 # [R, R]

    for d in range(depth):                    # depth=2, fully unrolled
        # ---------------- attention sub-block ----------------
        n1 = layernorm(h, vec_ref[d * 6 + 0], vec_ref[d * 6 + 1]).astype(bf16)
        proj = jnp.zeros((R, embed), f32)
        for hd in range(num_heads):           # heads split on the weight side
            qi = (d * 3 + 0) * num_heads + hd
            ki = (d * 3 + 1) * num_heads + hd
            vi = (d * 3 + 2) * num_heads + hd
            # 1/sqrt(head_dim) is pre-folded into the q weights/bias.
            q = (jnp.dot(n1, qkv_w_ref[qi], preferred_element_type=f32)
                 + qkv_b_ref[qi]).astype(bf16)                    # [R, Dh]
            k = (jnp.dot(n1, qkv_w_ref[ki], preferred_element_type=f32)
                 + qkv_b_ref[ki]).astype(bf16)
            v = (jnp.dot(n1, qkv_w_ref[vi], preferred_element_type=f32)
                 + qkv_b_ref[vi]).astype(bf16)
            s = jax.lax.dot_general(q, k, (((1,), (1,)), ((), ())),
                                    preferred_element_type=f32) + key_bias
            m = jnp.max(s, axis=-1, keepdims=True)
            p = jnp.exp(s - m)
            p = p * pl.reciprocal(jnp.sum(p, axis=-1, keepdims=True),
                                  approx=True)                    # EUP slot
            ho = jnp.dot(p.astype(bf16), v,
                         preferred_element_type=f32).astype(bf16)  # [R, Dh]
            # concat of heads folded into the projection (sublane-aligned
            # per-head weight slice, pre-split in prepare_params).
            proj = proj + jnp.dot(ho, proj_w_ref[d * num_heads + hd],
                                  preferred_element_type=f32)
        h = h + proj + vec_ref[d * 6 + 4]                         # + proj bias

        # ---------------- MLP sub-block ----------------
        n2 = layernorm(h, vec_ref[d * 6 + 2], vec_ref[d * 6 + 3]).astype(bf16)
        m1 = (jnp.dot(n2, fc1_w_ref[d], preferred_element_type=f32)
              + fc1_b_ref[d])
        # tanh-form GELU routes the transcendental to the EUP slot; ~1e-3
        # relative divergence from the exact-erf nn.GELU() in the reference.
        m1 = jax.nn.gelu(m1, approximate=True).astype(bf16)
        m2 = jnp.dot(m1, fc2_w_ref[d], preferred_element_type=f32)
        h = h + m2 + vec_ref[d * 6 + 5]                           # + fc2 bias

    # Classification head on the cls tokens (row i*SP of each packed image).
    # self.norm is unused in the reference forward(), so it is not applied.
    cls_rows = jnp.concatenate([h[i * SP:i * SP + 1, :] for i in range(TB)],
                               axis=0)                            # [TB, E]
    logits = (jnp.dot(cls_rows.astype(bf16), head_w_ref[...],
                      preferred_element_type=f32) + head_b_ref[...])
    out_ref[0] = logits.astype(out_ref.dtype)


# ------------------------------ configuration --------------------------------

class Config:
    image_size = 16
    patch_size = 4
    input_channels = 3
    num_classes = 10
    embedding_dims = 32
    depth = 2
    num_heads = 4
    mlp_ratio = 4.0
    include_bias = True

    @property
    def num_patches(self):
        return (self.image_size // self.patch_size) ** 2

    @property
    def head_dim(self):
        return self.embedding_dims // self.num_heads

    @property
    def hidden(self):
        return int(self.embedding_dims * self.mlp_ratio)

    @property
    def seq_len(self):
        return 1 + self.num_patches

    @property
    def seq_pad(self):                       # sublane-aligned token count
        return ((self.seq_len + 7) // 8) * 8

    @property
    def num_classes_pad(self):               # lane-dense classifier output
        return max(128, ((self.num_classes + 127) // 128) * 128)


# ------------------------------ parameters -----------------------------------

def init_params(key, cfg):
    """Raw f32 parameters (matmul-oriented [in, out] weight layout)."""
    E = cfg.embedding_dims
    C = cfg.input_channels
    P = cfg.patch_size
    H = cfg.hidden
    NC = cfg.num_classes
    depth = cfg.depth
    S = cfg.seq_len

    def nrm(k, shape):
        return (0.02 * jax.random.normal(k, shape)).astype(jnp.float32)

    ks = jax.random.split(key, 12)
    return {
        # PatchEmbedding: Conv2d(C, E, kernel=P, stride=P) == per-patch flatten
        # (c, ph, pw ordering) followed by a [C*P*P, E] matmul.
        'patch_w': nrm(ks[0], (C * P * P, E)),
        'patch_b': nrm(ks[1], (E,)),
        # nn.Parameter(torch.zeros(...)) in __init__
        'cls': jnp.zeros((1, 1, E), jnp.float32),
        'pos': jnp.zeros((1, S, E), jnp.float32),
        # per-block params, leading depth axis
        'ln1_g': jnp.ones((depth, E), jnp.float32),
        'ln1_b': jnp.zeros((depth, E), jnp.float32),
        'qkv_w': nrm(ks[2], (depth, E, 3 * E)),
        'qkv_b': nrm(ks[3], (depth, 3 * E)),
        'proj_w': nrm(ks[4], (depth, E, E)),
        'proj_b': nrm(ks[5], (depth, E)),
        'ln2_g': jnp.ones((depth, E), jnp.float32),
        'ln2_b': jnp.zeros((depth, E), jnp.float32),
        'fc1_w': nrm(ks[6], (depth, E, H)),
        'fc1_b': nrm(ks[7], (depth, H)),
        'fc2_w': nrm(ks[8], (depth, H, E)),
        'fc2_b': nrm(ks[9], (depth, E)),
        # classification head
        'head_w': nrm(ks[10], (E, NC)),
        'head_b': nrm(ks[11], (NC,)),
    }


def prepare_params(params, cfg):
    """One-time, parameter-only preprocessing (hoisted out of the forward)."""
    E = cfg.embedding_dims
    Dh = cfg.head_dim
    nh = cfg.num_heads
    depth = cfg.depth
    H = cfg.hidden
    SP = cfg.seq_pad
    nP = cfg.num_patches
    NC = cfg.num_classes
    NCP = cfg.num_classes_pad
    bf16 = jnp.bfloat16
    scale = Dh ** -0.5

    # cls token + positional embedding + patch-embed bias folded into one
    # additive base slab [SP, E]; rows >= seq_len stay zero.
    base = jnp.zeros((SP, E), jnp.float32)
    base = base.at[0].set(params['cls'][0, 0] + params['pos'][0, 0])
    base = base.at[1:1 + nP].set(params['pos'][0, 1:] + params['patch_b'][None, :])

    # qkv weights pre-split per head: [depth, E, 3E] -> [depth, 3, head, E, Dh],
    # 1/sqrt(Dh) folded into the q third, flattened into one bf16 slab.
    qkv_w = params['qkv_w'].reshape(depth, E, 3, nh, Dh).transpose(0, 2, 3, 1, 4)
    qkv_w = qkv_w.at[:, 0].multiply(scale)
    qkv_w = qkv_w.reshape(depth * 3 * nh, E, Dh).astype(bf16)

    qkv_b = params['qkv_b'].reshape(depth, 3, nh, Dh)
    qkv_b = qkv_b.at[:, 0].multiply(scale)
    qkv_b = qkv_b.reshape(depth * 3 * nh, 1, Dh).astype(jnp.float32)

    # Output projection pre-split per head on its (sublane) input axis.
    proj_w = params['proj_w'].reshape(depth * nh, Dh, E).astype(bf16)

    # All E-wide per-depth vectors packed into a single slab:
    #   order per block: [ln1_g, ln1_b, ln2_g, ln2_b, proj_b, fc2_b]
    vec = jnp.stack([params['ln1_g'], params['ln1_b'],
                     params['ln2_g'], params['ln2_b'],
                     params['proj_b'], params['fc2_b']],
                    axis=1).reshape(depth * 6, 1, E).astype(jnp.float32)

    # Classifier padded to a lane-dense 128-wide output.
    head_w = jnp.zeros((E, NCP), jnp.float32).at[:, :NC].set(params['head_w'])
    head_b = jnp.zeros((1, NCP), jnp.float32).at[0, :NC].set(params['head_b'])

    prepped = {
        'base': base,
        'patch_w': params['patch_w'].astype(bf16),
        'qkv_w': qkv_w,
        'qkv_b': qkv_b,
        'proj_w': proj_w,
        'vec': vec,
        'fc1_w': params['fc1_w'].astype(bf16),
        'fc1_b': params['fc1_b'].reshape(depth, 1, H).astype(jnp.float32),
        'fc2_w': params['fc2_w'].astype(bf16),
        'head_w': head_w.astype(bf16),
        'head_b': head_b,
    }
    return jax.tree_util.tree_map(jnp.asarray, prepped)


# ------------------------------ model wrapper --------------------------------

def _choose_images_per_step(batch, seq_pad):
    """Pack as many images as possible into the row (sublane) dimension of one
    grid step (target ~128 rows), keeping the step count a divisor of batch."""
    max_tb = max(1, 128 // seq_pad)
    tb = 1
    for t in range(1, min(batch, max_tb) + 1):
        if batch % t == 0:
            tb = t
    return tb


def _const_spec(shape):
    """Whole-array VMEM block with a constant block index (fetched once)."""
    zero_idx = (0,) * len(shape)
    return pl.BlockSpec(shape, lambda b: zero_idx)


def vit_forward(x, prepped, cfg):
    """x: [B, C, H, W] (NCHW, matching the PyTorch module). Returns [B, NC]."""
    B, C, Himg, Wimg = x.shape
    P = cfg.patch_size
    E = cfg.embedding_dims
    nH, nW = Himg // P, Wimg // P
    nP = nH * nW
    S = cfg.seq_len
    SP = cfg.seq_pad
    CPP = C * P * P
    NC = cfg.num_classes
    NCP = cfg.num_classes_pad

    TB = _choose_images_per_step(B, SP)
    steps = B // TB

    # im2col: NCHW -> per-patch (c, ph, pw) pixel vectors, laid out to match
    # the padded token grid (row i*SP = cls slot of image i, then nP patch
    # rows, then padding).  Pure layout plumbing, done once in XLA, in bf16.
    patches = x.reshape(B, C, nH, P, nW, P).transpose(0, 2, 4, 1, 3, 5)
    patches = patches.reshape(B, nP, CPP).astype(jnp.bfloat16)
    pat = jnp.zeros((B, SP, CPP), jnp.bfloat16).at[:, 1:1 + nP, :].set(patches)
    pat = pat.reshape(steps, TB * SP, CPP)

    kernel = functools.partial(
        _vit_fused_kernel,
        depth=cfg.depth, num_heads=cfg.num_heads,
        seq_valid=S, seq_pad=SP, images_per_step=TB, embed=E)

    weights = (prepped['base'], prepped['patch_w'], prepped['qkv_w'],
               prepped['qkv_b'], prepped['proj_w'], prepped['vec'],
               prepped['fc1_w'], prepped['fc1_b'], prepped['fc2_w'],
               prepped['head_w'], prepped['head_b'])

    out = pl.pallas_call(
        kernel,
        out_shape=jax.ShapeDtypeStruct((steps, TB, NCP), jnp.float32),
        grid=(steps,),
        in_specs=[pl.BlockSpec((1, TB * SP, CPP), lambda b: (b, 0, 0))]
                 + [_const_spec(w.shape) for w in weights],
        out_specs=pl.BlockSpec((1, TB, NCP), lambda b: (b, 0, 0)),
        compiler_params=pltpu.CompilerParams(
            # grid steps are independent batch groups -> megacore-shardable.
            dimension_semantics=("parallel",)),
    )(pat, *weights)

    return out.reshape(B, NCP)[:, :NC]


# ---------------------------------- main -------------------------------------

if __name__ == "__main__":
    cfg = Config()
    key = jax.random.PRNGKey(0)
    k_params, k_x = jax.random.split(key)

    params = init_params(k_params, cfg)
    prepped = prepare_params(params, cfg)     # one-time prep, outside jit

    x = jax.random.normal(
        k_x, (2, cfg.input_channels, cfg.image_size, cfg.image_size),
        jnp.float32)

    fwd = jax.jit(functools.partial(vit_forward, cfg=cfg))
    logits = fwd(x, prepped)
    jax.block_until_ready(logits)

    assert logits.shape == (2, cfg.num_classes)
    assert bool(jnp.all(jnp.isfinite(logits)))
    print("KERNEL_OK")
</pallas_src>

<mosaic_0001>
module attributes {stable_mosaic.version = 11 : i64} {
  func.func @_vit_fused_kernel(%arg0: i32, %arg1: memref<1x48x48xbf16, #tpu.memory_space<vmem>>, %arg2: memref<24x32xf32, #tpu.memory_space<vmem>>, %arg3: memref<48x32xbf16, #tpu.memory_space<vmem>>, %arg4: memref<24x32x8xbf16, #tpu.memory_space<vmem>>, %arg5: memref<24x1x8xf32, #tpu.memory_space<vmem>>, %arg6: memref<8x8x32xbf16, #tpu.memory_space<vmem>>, %arg7: memref<12x1x32xf32, #tpu.memory_space<vmem>>, %arg8: memref<2x32x128xbf16, #tpu.memory_space<vmem>>, %arg9: memref<2x1x128xf32, #tpu.memory_space<vmem>>, %arg10: memref<2x128x32xbf16, #tpu.memory_space<vmem>>, %arg11: memref<32x128xbf16, #tpu.memory_space<vmem>>, %arg12: memref<1x128xf32, #tpu.memory_space<vmem>>, %arg13: memref<1x2x128xf32, #tpu.memory_space<vmem>>) attributes {dimension_semantics = [#tpu.dimension_semantics<parallel>], iteration_bounds = array<i64: 1>, scalar_prefetch = 0 : i64, scratch_operands = 0 : i64, tpu.core_type = #tpu.core_type<tc>, window_params = [{transform_indices = @transform_0, window_bounds = array<i64: 1, 48, 48>}, {pipeline_mode = #tpu.pipeline_mode<synchronous>, transform_indices = @transform_1, window_bounds = array<i64: 24, 32>}, {pipeline_mode = #tpu.pipeline_mode<synchronous>, transform_indices = @transform_2, window_bounds = array<i64: 48, 32>}, {pipeline_mode = #tpu.pipeline_mode<synchronous>, transform_indices = @transform_3, window_bounds = array<i64: 24, 32, 8>}, {pipeline_mode = #tpu.pipeline_mode<synchronous>, transform_indices = @transform_4, window_bounds = array<i64: 24, 1, 8>}, {pipeline_mode = #tpu.pipeline_mode<synchronous>, transform_indices = @transform_5, window_bounds = array<i64: 8, 8, 32>}, {pipeline_mode = #tpu.pipeline_mode<synchronous>, transform_indices = @transform_6, window_bounds = array<i64: 12, 1, 32>}, {pipeline_mode = #tpu.pipeline_mode<synchronous>, transform_indices = @transform_7, window_bounds = array<i64: 2, 32, 128>}, {pipeline_mode = #tpu.pipeline_mode<synchronous>, transform_indices = @transform_8, window_bounds = array<i64: 2, 1, 128>}, {pipeline_mode = #tpu.pipeline_mode<synchronous>, transform_indices = @transform_9, window_bounds = array<i64: 2, 128, 32>}, {pipeline_mode = #tpu.pipeline_mode<synchronous>, transform_indices = @transform_10, window_bounds = array<i64: 32, 128>}, {pipeline_mode = #tpu.pipeline_mode<synchronous>, transform_indices = @transform_11, window_bounds = array<i64: 1, 128>}, {transform_indices = @transform_12, window_bounds = array<i64: 1, 2, 128>}]} {
    %c0 = arith.constant 0 : index
    %c0_0 = arith.constant 0 : index
    %0 = vector.load %arg2[%c0, %c0_0] : memref<24x32xf32, #tpu.memory_space<vmem>>, vector<24x32xf32>
    %1 = tpu.concatenate %0, %0 in 0 : vector<24x32xf32>, vector<24x32xf32> -> vector<48x32xf32>
    %c0_1 = arith.constant 0 : index
    %c0_2 = arith.constant 0 : index
    %c0_3 = arith.constant 0 : index
    %2 = vector.load %arg1[%c0_1, %c0_2, %c0_3] : memref<1x48x48xbf16, #tpu.memory_space<vmem>>, vector<1x48x48xbf16>
    %3 = vector.shape_cast %2 : vector<1x48x48xbf16> to vector<48x48xbf16>
    %c0_4 = arith.constant 0 : index
    %c0_5 = arith.constant 0 : index
    %4 = vector.load %arg3[%c0_4, %c0_5] : memref<48x32xbf16, #tpu.memory_space<vmem>>, vector<48x32xbf16>
    %cst = arith.constant dense<0.000000e+00> : vector<48x32xf32>
    %5 = tpu.matmul %3, %4, %cst {dimension_numbers = #tpu.dot_dimension_numbers<[1], [0], [0], [1], [0, 0, 1, 1], [], []>} : vector<48x48xbf16>, vector<48x32xbf16>, vector<48x32xf32> -> vector<48x32xf32>
    %6 = arith.addf %5, %1 : vector<48x32xf32>
    %7 = tpu.iota {dimensions = array<i32: 1>} : vector<1x48xi32>
    %c0_i32 = arith.constant 0 : i32
    %8 = vector.broadcast %c0_i32 : i32 to vector<1x48xi32>
    %9 = arith.cmpi sge, %7, %8 : vector<1x48xi32>
    %c17_i32 = arith.constant 17 : i32
    %10 = vector.broadcast %c17_i32 : i32 to vector<1x48xi32>
    %11 = arith.cmpi slt, %7, %10 : vector<1x48xi32>
    %12 = arith.andi %9, %11 : vector<1x48xi1>
    %cst_6 = arith.constant 0.000000e+00 : f32
    %cst_7 = arith.constant -1.000000e+09 : f32
    %13 = vector.broadcast %cst_6 : f32 to vector<1x48xf32>
    %14 = vector.broadcast %cst_7 : f32 to vector<1x48xf32>
    %15 = arith.select %12, %13, %14 : vector<1x48xi1>, vector<1x48xf32>
    %16 = vector.shape_cast %15 : vector<1x48xf32> to vector<1x48xf32>
    %17 = vector.broadcast %16 : vector<1x48xf32> to vector<24x48xf32>
    %c24_i32 = arith.constant 24 : i32
    %18 = vector.broadcast %c24_i32 : i32 to vector<1x48xi32>
    %19 = arith.cmpi sge, %7, %18 : vector<1x48xi32>
    %c41_i32 = arith.constant 41 : i32
    %20 = vector.broadcast %c41_i32 : i32 to vector<1x48xi32>
    %21 = arith.cmpi slt, %7, %20 : vector<1x48xi32>
    %22 = arith.andi %19, %21 : vector<1x48xi1>
    %cst_8 = arith.constant 0.000000e+00 : f32
    %cst_9 = arith.constant -1.000000e+09 : f32
    %23 = vector.broadcast %cst_8 : f32 to vector<1x48xf32>
    %24 = vector.broadcast %cst_9 : f32 to vector<1x48xf32>
    %25 = arith.select %22, %23, %24 : vector<1x48xi1>, vector<1x48xf32>
    %26 = vector.shape_cast %25 : vector<1x48xf32> to vector<1x48xf32>
    %27 = vector.broadcast %26 : vector<1x48xf32> to vector<24x48xf32>
    %28 = tpu.concatenate %17, %27 in 0 : vector<24x48xf32>, vector<24x48xf32> -> vector<48x48xf32>
    %c0_10 = arith.constant 0 : index
    %c0_11 = arith.constant 0 : index
    %c0_12 = arith.constant 0 : index
    %29 = vector.load %arg7[%c0_10, %c0_11, %c0_12] : memref<12x1x32xf32, #tpu.memory_space<vmem>>, vector<1x1x32xf32>
    %30 = vector.shape_cast %29 : vector<1x1x32xf32> to vector<1x32xf32>
    %c1 = arith.constant 1 : index
    %c0_13 = arith.constant 0 : index
    %c0_14 = arith.constant 0 : index
    %31 = vector.load %arg7[%c1, %c0_13, %c0_14] : memref<12x1x32xf32, #tpu.memory_space<vmem>>, vector<1x1x32xf32>
    %32 = vector.shape_cast %31 : vector<1x1x32xf32> to vector<1x32xf32>
    %cst_15 = arith.constant dense<0.000000e+00> : vector<48xf32>
    %33 = vector.multi_reduction <add>, %6, %cst_15 [1] : vector<48x32xf32> to vector<48xf32>
    %34 = vector.shape_cast %33 : vector<48xf32> to vector<48x1xf32>
    %cst_16 = arith.constant 3.200000e+01 : f32
    %35 = vector.broadcast %cst_16 : f32 to vector<48x1xf32>
    %36 = arith.divf %34, %35 : vector<48x1xf32>
    %37 = vector.broadcast %36 : vector<48x1xf32> to vector<48x32xf32>
    %38 = arith.subf %6, %37 : vector<48x32xf32>
    %39 = arith.mulf %38, %38 : vector<48x32xf32>
    %cst_17 = arith.constant dense<0.000000e+00> : vector<48xf32>
    %40 = vector.multi_reduction <add>, %39, %cst_17 [1] : vector<48x32xf32> to vector<48xf32>
    %41 = vector.shape_cast %40 : vector<48xf32> to vector<48x1xf32>
    %cst_18 = arith.constant 3.200000e+01 : f32
    %42 = vector.broadcast %cst_18 : f32 to vector<48x1xf32>
    %43 = arith.divf %41, %42 : vector<48x1xf32>
    %cst_19 = arith.constant 9.99999997E-7 : f32
    %44 = vector.broadcast %cst_19 : f32 to vector<48x1xf32>
    %45 = arith.addf %43, %44 : vector<48x1xf32>
    %46 = math.rsqrt %45 : vector<48x1xf32>
    %47 = vector.broadcast %46 : vector<48x1xf32> to vector<48x32xf32>
    %48 = arith.mulf %38, %47 : vector<48x32xf32>
    %49 = vector.broadcast %30 : vector<1x32xf32> to vector<48x32xf32>
    %50 = arith.mulf %48, %49 : vector<48x32xf32>
    %51 = vector.broadcast %32 : vector<1x32xf32> to vector<48x32xf32>
    %52 = arith.addf %50, %51 : vector<48x32xf32>
    %53 = arith.truncf %52 : vector<48x32xf32> to vector<48x32xbf16>
    %cst_20 = arith.constant 0.000000e+00 : f32
    %54 = vector.broadcast %cst_20 : f32 to vector<48x32xf32>
    %c0_21 = arith.constant 0 : index
    %c0_22 = arith.constant 0 : index
    %c0_23 = arith.constant 0 : index
    %55 = vector.load %arg4[%c0_21, %c0_22, %c0_23] : memref<24x32x8xbf16, #tpu.memory_space<vmem>>, vector<1x32x8xbf16>
    %56 = vector.shape_cast %55 : vector<1x32x8xbf16> to vector<32x8xbf16>
    %cst_24 = arith.constant dense<0.000000e+00> : vector<48x8xf32>
    %57 = tpu.matmul %53, %56, %cst_24 {dimension_numbers = #tpu.dot_dimension_numbers<[1], [0], [0], [1], [0, 0, 1, 1], [], []>} : vector<48x32xbf16>, vector<32x8xbf16>, vector<48x8xf32> -> vector<48x8xf32>
    %c0_25 = arith.constant 0 : index
    %c0_26 = arith.constant 0 : index
    %c0_27 = arith.constant 0 : index
    %58 = vector.load %arg5[%c0_25, %c0_26, %c0_27] : memref<24x1x8xf32, #tpu.memory_space<vmem>>, vector<1x1x8xf32>
    %59 = vector.shape_cast %58 : vector<1x1x8xf32> to vector<1x8xf32>
    %60 = vector.broadcast %59 : vector<1x8xf32> to vector<48x8xf32>
    %61 = arith.addf %57, %60 : vector<48x8xf32>
    %62 = arith.truncf %61 : vector<48x8xf32> to vector<48x8xbf16>
    %c4 = arith.constant 4 : index
    %c0_28 = arith.constant 0 : index
    %c0_29 = arith.constant 0 : index
    %63 = vector.load %arg4[%c4, %c0_28, %c0_29] : memref<24x32x8xbf16, #tpu.memory_space<vmem>>, vector<1x32x8xbf16>
    %64 = vector.shape_cast %63 : vector<1x32x8xbf16> to vector<32x8xbf16>
    %cst_30 = arith.constant dense<0.000000e+00> : vector<48x8xf32>
    %65 = tpu.matmul %53, %64, %cst_30 {dimension_numbers = #tpu.dot_dimension_numbers<[1], [0], [0], [1], [0, 0, 1, 1], [], []>} : vector<48x32xbf16>, vector<32x8xbf16>, vector<48x8xf32> -> vector<48x8xf32>
    %c4_31 = arith.constant 4 : index
    %c0_32 = arith.constant 0 : index
    %c0_33 = arith.constant 0 : index
    %66 = vector.load %arg5[%c4_31, %c0_32, %c0_33] : memref<24x1x8xf32, #tpu.memory_space<vmem>>, vector<1x1x8xf32>
    %67 = vector.shape_cast %66 : vector<1x1x8xf32> to vector<1x8xf32>
    %68 = vector.broadcast %67 : vector<1x8xf32> to vector<48x8xf32>
    %69 = arith.addf %65, %68 : vector<48x8xf32>
    %70 = arith.truncf %69 : vector<48x8xf32> to vector<48x8xbf16>
    %c8 = arith.constant 8 : index
    %c0_34 = arith.constant 0 : index
    %c0_35 = arith.constant 0 : index
    %71 = vector.load %arg4[%c8, %c0_34, %c0_35] : memref<24x32x8xbf16, #tpu.memory_space<vmem>>, vector<1x32x8xbf16>
    %72 = vector.shape_cast %71 : vector<1x32x8xbf16> to vector<32x8xbf16>
    %cst_36 = arith.constant dense<0.000000e+00> : vector<48x8xf32>
    %73 = tpu.matmul %53, %72, %cst_36 {dimension_numbers = #tpu.dot_dimension_numbers<[1], [0], [0], [1], [0, 0, 1, 1], [], []>} : vector<48x32xbf16>, vector<32x8xbf16>, vector<48x8xf32> -> vector<48x8xf32>
    %c8_37 = arith.constant 8 : index
    %c0_38 = arith.constant 0 : index
    %c0_39 = arith.constant 0 : index
    %74 = vector.load %arg5[%c8_37, %c0_38, %c0_39] : memref<24x1x8xf32, #tpu.memory_space<vmem>>, vector<1x1x8xf32>
    %75 = vector.shape_cast %74 : vector<1x1x8xf32> to vector<1x8xf32>
    %76 = vector.broadcast %75 : vector<1x8xf32> to vector<48x8xf32>
    %77 = arith.addf %73, %76 : vector<48x8xf32>
    %78 = arith.truncf %77 : vector<48x8xf32> to vector<48x8xbf16>
    %cst_40 = arith.constant dense<0.000000e+00> : vector<48x48xf32>
    %79 = tpu.matmul %62, %70, %cst_40 {dimension_numbers = #tpu.dot_dimension_numbers<[1], [1], [0], [0], [0, 0, 1, 0], [], []>} : vector<48x8xbf16>, vector<48x8xbf16>, vector<48x48xf32> -> vector<48x48xf32>
    %80 = arith.addf %79, %28 : vector<48x48xf32>
    %cst_41 = arith.constant dense<0xFF800000> : vector<48xf32>
    %81 = vector.multi_reduction <maximumf>, %80, %cst_41 [1] : vector<48x48xf32> to vector<48xf32>
    %82 = vector.shape_cast %81 : vector<48xf32> to vector<48x1xf32>
    %83 = vector.broadcast %82 : vector<48x1xf32> to vector<48x48xf32>
    %84 = arith.subf %80, %83 : vector<48x48xf32>
    %85 = math.exp %84 : vector<48x48xf32>
    %cst_42 = arith.constant dense<0.000000e+00> : vector<48xf32>
    %86 = vector.multi_reduction <add>, %85, %cst_42 [1] : vector<48x48xf32> to vector<48xf32>
    %87 = vector.shape_cast %86 : vector<48xf32> to vector<48x1xf32>
    %88 = tpu.reciprocal %87 {approx = true} : vector<48x1xf32> -> vector<48x1xf32>
    %89 = vector.broadcast %88 : vector<48x1xf32> to vector<48x48xf32>
    %90 = arith.mulf %85, %89 : vector<48x48xf32>
    %91 = arith.truncf %90 : vector<48x48xf32> to vector<48x48xbf16>
    %cst_43 = arith.constant dense<0.000000e+00> : vector<48x8xf32>
    %92 = tpu.matmul %91, %78, %cst_43 {dimension_numbers = #tpu.dot_dimension_numbers<[1], [0], [0], [1], [0, 0, 1, 1], [], []>} : vector<48x48xbf16>, vector<48x8xbf16>, vector<48x8xf32> -> vector<48x8xf32>
    %93 = arith.truncf %92 : vector<48x8xf32> to vector<48x8xbf16>
    %c0_44 = arith.constant 0 : index
    %c0_45 = arith.constant 0 : index
    %c0_46 = arith.constant 0 : index
    %94 = vector.load %arg6[%c0_44, %c0_45, %c0_46] : memref<8x8x32xbf16, #tpu.memory_space<vmem>>, vector<1x8x32xbf16>
    %95 = vector.shape_cast %94 : vector<1x8x32xbf16> to vector<8x32xbf16>
    %cst_47 = arith.constant dense<0.000000e+00> : vector<48x32xf32>
    %96 = tpu.matmul %93, %95, %cst_47 {dimension_numbers = #tpu.dot_dimension_numbers<[1], [0], [0], [1], [0, 0, 1, 1], [], []>} : vector<48x8xbf16>, vector<8x32xbf16>, vector<48x32xf32> -> vector<48x32xf32>
    %97 = arith.addf %54, %96 : vector<48x32xf32>
    %c1_48 = arith.constant 1 : index
    %c0_49 = arith.constant 0 : index
    %c0_50 = arith.constant 0 : index
    %98 = vector.load %arg4[%c1_48, %c0_49, %c0_50] : memref<24x32x8xbf16, #tpu.memory_space<vmem>>, vector<1x32x8xbf16>
    %99 = vector.shape_cast %98 : vector<1x32x8xbf16> to vector<32x8xbf16>
    %cst_51 = arith.constant dense<0.000000e+00> : vector<48x8xf32>
    %100 = tpu.matmul %53, %99, %cst_51 {dimension_numbers = #tpu.dot_dimension_numbers<[1], [0], [0], [1], [0, 0, 1, 1], [], []>} : vector<48x32xbf16>, vector<32x8xbf16>, vector<48x8xf32> -> vector<48x8xf32>
    %c1_52 = arith.constant 1 : index
    %c0_53 = arith.constant 0 : index
    %c0_54 = arith.constant 0 : index
    %101 = vector.load %arg5[%c1_52, %c0_53, %c0_54] : memref<24x1x8xf32, #tpu.memory_space<vmem>>, vector<1x1x8xf32>
    %102 = vector.shape_cast %101 : vector<1x1x8xf32> to vector<1x8xf32>
    %103 = vector.broadcast %102 : vector<1x8xf32> to vector<48x8xf32>
    %104 = arith.addf %100, %103 : vector<48x8xf32>
    %105 = arith.truncf %104 : vector<48x8xf32> to vector<48x8xbf16>
    %c5 = arith.constant 5 : index
    %c0_55 = arith.constant 0 : index
    %c0_56 = arith.constant 0 : index
    %106 = vector.load %arg4[%c5, %c0_55, %c0_56] : memref<24x32x8xbf16, #tpu.memory_space<vmem>>, vector<1x32x8xbf16>
    %107 = vector.shape_cast %106 : vector<1x32x8xbf16> to vector<32x8xbf16>
    %cst_57 = arith.constant dense<0.000000e+00> : vector<48x8xf32>
    %108 = tpu.matmul %53, %107, %cst_57 {dimension_numbers = #tpu.dot_dimension_numbers<[1], [0], [0], [1], [0, 0, 1, 1], [], []>} : vector<48x32xbf16>, vector<32x8xbf16>, vector<48x8xf32> -> vector<48x8xf32>
    %c5_58 = arith.constant 5 : index
    %c0_59 = arith.constant 0 : index
    %c0_60 = arith.constant 0 : index
    %109 = vector.load %arg5[%c5_58, %c0_59, %c0_60] : memref<24x1x8xf32, #tpu.memory_space<vmem>>, vector<1x1x8xf32>
    %110 = vector.shape_cast %109 : vector<1x1x8xf32> to vector<1x8xf32>
    %111 = vector.broadcast %110 : vector<1x8xf32> to vector<48x8xf32>
    %112 = arith.addf %108, %111 : vector<48x8xf32>
    %113 = arith.truncf %112 : vector<48x8xf32> to vector<48x8xbf16>
    %c9 = arith.constant 9 : index
    %c0_61 = arith.constant 0 : index
    %c0_62 = arith.constant 0 : index
    %114 = vector.load %arg4[%c9, %c0_61, %c0_62] : memref<24x32x8xbf16, #tpu.memory_space<vmem>>, vector<1x32x8xbf16>
    %115 = vector.shape_cast %114 : vector<1x32x8xbf16> to vector<32x8xbf16>
    %cst_63 = arith.constant dense<0.000000e+00> : vector<48x8xf32>
    %116 = tpu.matmul %53, %115, %cst_63 {dimension_numbers = #tpu.dot_dimension_numbers<[1], [0], [0], [1], [0, 0, 1, 1], [], []>} : vector<48x32xbf16>, vector<32x8xbf16>, vector<48x8xf32> -> vector<48x8xf32>
    %c9_64 = arith.constant 9 : index
    %c0_65 = arith.constant 0 : index
    %c0_66 = arith.constant 0 : index
    %117 = vector.load %arg5[%c9_64, %c0_65, %c0_66] : memref<24x1x8xf32, #tpu.memory_space<vmem>>, vector<1x1x8xf32>
    %118 = vector.shape_cast %117 : vector<1x1x8xf32> to vector<1x8xf32>
    %119 = vector.broadcast %118 : vector<1x8xf32> to vector<48x8xf32>
    %120 = arith.addf %116, %119 : vector<48x8xf32>
    %121 = arith.truncf %120 : vector<48x8xf32> to vector<48x8xbf16>
    %cst_67 = arith.constant dense<0.000000e+00> : vector<48x48xf32>
    %122 = tpu.matmul %105, %113, %cst_67 {dimension_numbers = #tpu.dot_dimension_numbers<[1], [1], [0], [0], [0, 0, 1, 0], [], []>} : vector<48x8xbf16>, vector<48x8xbf16>, vector<48x48xf32> -> vector<48x48xf32>
    %123 = arith.addf %122, %28 : vector<48x48xf32>
    %cst_68 = arith.constant dense<0xFF800000> : vector<48xf32>
    %124 = vector.multi_reduction <maximumf>, %123, %cst_68 [1] : vector<48x48xf32> to vector<48xf32>
    %125 = vector.shape_cast %124 : vector<48xf32> to vector<48x1xf32>
    %126 = vector.broadcast %125 : vector<48x1xf32> to vector<48x48xf32>
    %127 = arith.subf %123, %126 : vector<48x48xf32>
    %128 = math.exp %127 : vector<48x48xf32>
    %cst_69 = arith.constant dense<0.000000e+00> : vector<48xf32>
    %129 = vector.multi_reduction <add>, %128, %cst_69 [1] : vector<48x48xf32> to vector<48xf32>
    %130 = vector.shape_cast %129 : vector<48xf32> to vector<48x1xf32>
    %131 = tpu.reciprocal %130 {approx = true} : vector<48x1xf32> -> vector<48x1xf32>
    %132 = vector.broadcast %131 : vector<48x1xf32> to vector<48x48xf32>
    %133 = arith.mulf %128, %132 : vector<48x48xf32>
    %134 = arith.truncf %133 : vector<48x48xf32> to vector<48x48xbf16>
    %cst_70 = arith.constant dense<0.000000e+00> : vector<48x8xf32>
    %135 = tpu.matmul %134, %121, %cst_70 {dimension_numbers = #tpu.dot_dimension_numbers<[1], [0], [0], [1], [0, 0, 1, 1], [], []>} : vector<48x48xbf16>, vector<48x8xbf16>, vector<48x8xf32> -> vector<48x8xf32>
    %136 = arith.truncf %135 : vector<48x8xf32> to vector<48x8xbf16>
    %c1_71 = arith.constant 1 : index
    %c0_72 = arith.constant 0 : index
    %c0_73 = arith.constant 0 : index
    %137 = vector.load %arg6[%c1_71, %c0_72, %c0_73] : memref<8x8x32xbf16, #tpu.memory_space<vmem>>, vector<1x8x32xbf16>
    %138 = vector.shape_cast %137 : vector<1x8x32xbf16> to vector<8x32xbf16>
    %cst_74 = arith.constant dense<0.000000e+00> : vector<48x32xf32>
    %139 = tpu.matmul %136, %138, %cst_74 {dimension_numbers = #tpu.dot_dimension_numbers<[1], [0], [0], [1], [0, 0, 1, 1], [], []>} : vector<48x8xbf16>, vector<8x32xbf16>, vector<48x32xf32> -> vector<48x32xf32>
    %140 = arith.addf %97, %139 : vector<48x32xf32>
    %c2 = arith.constant 2 : index
    %c0_75 = arith.constant 0 : index
    %c0_76 = arith.constant 0 : index
    %141 = vector.load %arg4[%c2, %c0_75, %c0_76] : memref<24x32x8xbf16, #tpu.memory_space<vmem>>, vector<1x32x8xbf16>
    %142 = vector.shape_cast %141 : vector<1x32x8xbf16> to vector<32x8xbf16>
    %cst_77 = arith.constant dense<0.000000e+00> : vector<48x8xf32>
    %143 = tpu.matmul %53, %142, %cst_77 {dimension_numbers = #tpu.dot_dimension_numbers<[1], [0], [0], [1], [0, 0, 1, 1], [], []>} : vector<48x32xbf16>, vector<32x8xbf16>, vector<48x8xf32> -> vector<48x8xf32>
    %c2_78 = arith.constant 2 : index
    %c0_79 = arith.constant 0 : index
    %c0_80 = arith.constant 0 : index
    %144 = vector.load %arg5[%c2_78, %c0_79, %c0_80] : memref<24x1x8xf32, #tpu.memory_space<vmem>>, vector<1x1x8xf32>
    %145 = vector.shape_cast %144 : vector<1x1x8xf32> to vector<1x8xf32>
    %146 = vector.broadcast %145 : vector<1x8xf32> to vector<48x8xf32>
    %147 = arith.addf %143, %146 : vector<48x8xf32>
    %148 = arith.truncf %147 : vector<48x8xf32> to vector<48x8xbf16>
    %c6 = arith.constant 6 : index
    %c0_81 = arith.constant 0 : index
    %c0_82 = arith.constant 0 : index
    %149 = vector.load %arg4[%c6, %c0_81, %c0_82] : memref<24x32x8xbf16, #tpu.memory_space<vmem>>, vector<1x32x8xbf16>
    %150 = vector.shape_cast %149 : vector<1x32x8xbf16> to vector<32x8xbf16>
    %cst_83 = arith.constant dense<0.000000e+00> : vector<48x8xf32>
    %151 = tpu.matmul %53, %150, %cst_83 {dimension_numbers = #tpu.dot_dimension_numbers<[1], [0], [0], [1], [0, 0, 1, 1], [], []>} : vector<48x32xbf16>, vector<32x8xbf16>, vector<48x8xf32> -> vector<48x8xf32>
    %c6_84 = arith.constant 6 : index
    %c0_85 = arith.constant 0 : index
    %c0_86 = arith.constant 0 : index
    %152 = vector.load %arg5[%c6_84, %c0_85, %c0_86] : memref<24x1x8xf32, #tpu.memory_space<vmem>>, vector<1x1x8xf32>
    %153 = vector.shape_cast %152 : vector<1x1x8xf32> to vector<1x8xf32>
    %154 = vector.broadcast %153 : vector<1x8xf32> to vector<48x8xf32>
    %155 = arith.addf %151, %154 : vector<48x8xf32>
    %156 = arith.truncf %155 : vector<48x8xf32> to vector<48x8xbf16>
    %c10 = arith.constant 10 : index
    %c0_87 = arith.constant 0 : index
    %c0_88 = arith.constant 0 : index
    %157 = vector.load %arg4[%c10, %c0_87, %c0_88] : memref<24x32x8xbf16, #tpu.memory_space<vmem>>, vector<1x32x8xbf16>
    %158 = vector.shape_cast %157 : vector<1x32x8xbf16> to vector<32x8xbf16>
    %cst_89 = arith.constant dense<0.000000e+00> : vector<48x8xf32>
    %159 = tpu.matmul %53, %158, %cst_89 {dimension_numbers = #tpu.dot_dimension_numbers<[1], [0], [0], [1], [0, 0, 1, 1], [], []>} : vector<48x32xbf16>, vector<32x8xbf16>, vector<48x8xf32> -> vector<48x8xf32>
    %c10_90 = arith.constant 10 : index
    %c0_91 = arith.constant 0 : index
    %c0_92 = arith.constant 0 : index
    %160 = vector.load %arg5[%c10_90, %c0_91, %c0_92] : memref<24x1x8xf32, #tpu.memory_space<vmem>>, vector<1x1x8xf32>
    %161 = vector.shape_cast %160 : vector<1x1x8xf32> to vector<1x8xf32>
    %162 = vector.broadcast %161 : vector<1x8xf32> to vector<48x8xf32>
    %163 = arith.addf %159, %162 : vector<48x8xf32>
    %164 = arith.truncf %163 : vector<48x8xf32> to vector<48x8xbf16>
    %cst_93 = arith.constant dense<0.000000e+00> : vector<48x48xf32>
    %165 = tpu.matmul %148, %156, %cst_93 {dimension_numbers = #tpu.dot_dimension_numbers<[1], [1], [0], [0], [0, 0, 1, 0], [], []>} : vector<48x8xbf16>, vector<48x8xbf16>, vector<48x48xf32> -> vector<48x48xf32>
    %166 = arith.addf %165, %28 : vector<48x48xf32>
    %cst_94 = arith.constant dense<0xFF800000> : vector<48xf32>
    %167 = vector.multi_reduction <maximumf>, %166, %cst_94 [1] : vector<48x48xf32> to vector<48xf32>
    %168 = vector.shape_cast %167 : vector<48xf32> to vector<48x1xf32>
    %169 = vector.broadcast %168 : vector<48x1xf32> to vector<48x48xf32>
    %170 = arith.subf %166, %169 : vector<48x48xf32>
    %171 = math.exp %170 : vector<48x48xf32>
    %cst_95 = arith.constant dense<0.000000e+00> : vector<48xf32>
    %172 = vector.multi_reduction <add>, %171, %cst_95 [1] : vector<48x48xf32> to vector<48xf32>
    %173 = vector.shape_cast %172 : vector<48xf32> to vector<48x1xf32>
    %174 = tpu.reciprocal %173 {approx = true} : vector<48x1xf32> -> vector<48x1xf32>
    %175 = vector.broadcast %174 : vector<48x1xf32> to vector<48x48xf32>
    %176 = arith.mulf %171, %175 : vector<48x48xf32>
    %177 = arith.truncf %176 : vector<48x48xf32> to vector<48x48xbf16>
    %cst_96 = arith.constant dense<0.000000e+00> : vector<48x8xf32>
    %178 = tpu.matmul %177, %164, %cst_96 {dimension_numbers = #tpu.dot_dimension_numbers<[1], [0], [0], [1], [0, 0, 1, 1], [], []>} : vector<48x48xbf16>, vector<48x8xbf16>, vector<48x8xf32> -> vector<48x8xf32>
    %179 = arith.truncf %178 : vector<48x8xf32> to vector<48x8xbf16>
    %c2_97 = arith.constant 2 : index
    %c0_98 = arith.constant 0 : index
    %c0_99 = arith.constant 0 : index
    %180 = vector.load %arg6[%c2_97, %c0_98, %c0_99] : memref<8x8x32xbf16, #tpu.memory_space<vmem>>, vector<1x8x32xbf16>
    %181 = vector.shape_cast %180 : vector<1x8x32xbf16> to vector<8x32xbf16>
    %cst_100 = arith.constant dense<0.000000e+00> : vector<48x32xf32>
    %182 = tpu.matmul %179, %181, %cst_100 {dimension_numbers = #tpu.dot_dimension_numbers<[1], [0], [0], [1], [0, 0, 1, 1], [], []>} : vector<48x8xbf16>, vector<8x32xbf16>, vector<48x32xf32> -> vector<48x32xf32>
    %183 = arith.addf %140, %182 : vector<48x32xf32>
    %c3 = arith.constant 3 : index
    %c0_101 = arith.constant 0 : index
    %c0_102 = arith.constant 0 : index
    %184 = vector.load %arg4[%c3, %c0_101, %c0_102] : memref<24x32x8xbf16, #tpu.memory_space<vmem>>, vector<1x32x8xbf16>
    %185 = vector.shape_cast %184 : vector<1x32x8xbf16> to vector<32x8xbf16>
    %cst_103 = arith.constant dense<0.000000e+00> : vector<48x8xf32>
    %186 = tpu.matmul %53, %185, %cst_103 {dimension_numbers = #tpu.dot_dimension_numbers<[1], [0], [0], [1], [0, 0, 1, 1], [], []>} : vector<48x32xbf16>, vector<32x8xbf16>, vector<48x8xf32> -> vector<48x8xf32>
    %c3_104 = arith.constant 3 : index
    %c0_105 = arith.constant 0 : index
    %c0_106 = arith.constant 0 : index
    %187 = vector.load %arg5[%c3_104, %c0_105, %c0_106] : memref<24x1x8xf32, #tpu.memory_space<vmem>>, vector<1x1x8xf32>
    %188 = vector.shape_cast %187 : vector<1x1x8xf32> to vector<1x8xf32>
    %189 = vector.broadcast %188 : vector<1x8xf32> to vector<48x8xf32>
    %190 = arith.addf %186, %189 : vector<48x8xf32>
    %191 = arith.truncf %190 : vector<48x8xf32> to vector<48x8xbf16>
    %c7 = arith.constant 7 : index
    %c0_107 = arith.constant 0 : index
    %c0_108 = arith.constant 0 : index
    %192 = vector.load %arg4[%c7, %c0_107, %c0_108] : memref<24x32x8xbf16, #tpu.memory_space<vmem>>, vector<1x32x8xbf16>
    %193 = vector.shape_cast %192 : vector<1x32x8xbf16> to vector<32x8xbf16>
    %cst_109 = arith.constant dense<0.000000e+00> : vector<48x8xf32>
    %194 = tpu.matmul %53, %193, %cst_109 {dimension_numbers = #tpu.dot_dimension_numbers<[1], [0], [0], [1], [0, 0, 1, 1], [], []>} : vector<48x32xbf16>, vector<32x8xbf16>, vector<48x8xf32> -> vector<48x8xf32>
    %c7_110 = arith.constant 7 : index
    %c0_111 = arith.constant 0 : index
    %c0_112 = arith.constant 0 : index
    %195 = vector.load %arg5[%c7_110, %c0_111, %c0_112] : memref<24x1x8xf32, #tpu.memory_space<vmem>>, vector<1x1x8xf32>
    %196 = vector.shape_cast %195 : vector<1x1x8xf32> to vector<1x8xf32>
    %197 = vector.broadcast %196 : vector<1x8xf32> to vector<48x8xf32>
    %198 = arith.addf %194, %197 : vector<48x8xf32>
    %199 = arith.truncf %198 : vector<48x8xf32> to vector<48x8xbf16>
    %c11 = arith.constant 11 : index
    %c0_113 = arith.constant 0 : index
    %c0_114 = arith.constant 0 : index
    %200 = vector.load %arg4[%c11, %c0_113, %c0_114] : memref<24x32x8xbf16, #tpu.memory_space<vmem>>, vector<1x32x8xbf16>
    %201 = vector.shape_cast %200 : vector<1x32x8xbf16> to vector<32x8xbf16>
    %cst_115 = arith.constant dense<0.000000e+00> : vector<48x8xf32>
    %202 = tpu.matmul %53, %201, %cst_115 {dimension_numbers = #tpu.dot_dimension_numbers<[1], [0], [0], [1], [0, 0, 1, 1], [], []>} : vector<48x32xbf16>, vector<32x8xbf16>, vector<48x8xf32> -> vector<48x8xf32>
    %c11_116 = arith.constant 11 : index
    %c0_117 = arith.constant 0 : index
    %c0_118 = arith.constant 0 : index
    %203 = vector.load %arg5[%c11_116, %c0_117, %c0_118] : memref<24x1x8xf32, #tpu.memory_space<vmem>>, vector<1x1x8xf32>
    %204 = vector.shape_cast %203 : vector<1x1x8xf32> to vector<1x8xf32>
    %205 = vector.broadcast %204 : vector<1x8xf32> to vector<48x8xf32>
    %206 = arith.addf %202, %205 : vector<48x8xf32>
    %207 = arith.truncf %206 : vector<48x8xf32> to vector<48x8xbf16>
    %cst_119 = arith.constant dense<0.000000e+00> : vector<48x48xf32>
    %208 = tpu.matmul %191, %199, %cst_119 {dimension_numbers = #tpu.dot_dimension_numbers<[1], [1], [0], [0], [0, 0, 1, 0], [], []>} : vector<48x8xbf16>, vector<48x8xbf16>, vector<48x48xf32> -> vector<48x48xf32>
    %209 = arith.addf %208, %28 : vector<48x48xf32>
    %cst_120 = arith.constant dense<0xFF800000> : vector<48xf32>
    %210 = vector.multi_reduction <maximumf>, %209, %cst_120 [1] : vector<48x48xf32> to vector<48xf32>
    %211 = vector.shape_cast %210 : vector<48xf32> to vector<48x1xf32>
    %212 = vector.broadcast %211 : vector<48x1xf32> to vector<48x48xf32>
    %213 = arith.subf %209, %212 : vector<48x48xf32>
    %214 = math.exp %213 : vector<48x48xf32>
    %cst_121 = arith.constant dense<0.000000e+00> : vector<48xf32>
    %215 = vector.multi_reduction <add>, %214, %cst_121 [1] : vector<48x48xf32> to vector<48xf32>
    %216 = vector.shape_cast %215 : vector<48xf32> to vector<48x1xf32>
    %217 = tpu.reciprocal %216 {approx = true} : vector<48x1xf32> -> vector<48x1xf32>
    %218 = vector.broadcast %217 : vector<48x1xf32> to vector<48x48xf32>
    %219 = arith.mulf %214, %218 : vector<48x48xf32>
    %220 = arith.truncf %219 : vector<48x48xf32> to vector<48x48xbf16>
    %cst_122 = arith.constant dense<0.000000e+00> : vector<48x8xf32>
    %221 = tpu.matmul %220, %207, %cst_122 {dimension_numbers = #tpu.dot_dimension_numbers<[1], [0], [0], [1], [0, 0, 1, 1], [], []>} : vector<48x48xbf16>, vector<48x8xbf16>, vector<48x8xf32> -> vector<48x8xf32>
    %222 = arith.truncf %221 : vector<48x8xf32> to vector<48x8xbf16>
    %c3_123 = arith.constant 3 : index
    %c0_124 = arith.constant 0 : index
    %c0_125 = arith.constant 0 : index
    %223 = vector.load %arg6[%c3_123, %c0_124, %c0_125] : memref<8x8x32xbf16, #tpu.memory_space<vmem>>, vector<1x8x32xbf16>
    %224 = vector.shape_cast %223 : vector<1x8x32xbf16> to vector<8x32xbf16>
    %cst_126 = arith.constant dense<0.000000e+00> : vector<48x32xf32>
    %225 = tpu.matmul %222, %224, %cst_126 {dimension_numbers = #tpu.dot_dimension_numbers<[1], [0], [0], [1], [0, 0, 1, 1], [], []>} : vector<48x8xbf16>, vector<8x32xbf16>, vector<48x32xf32> -> vector<48x32xf32>
    %226 = arith.addf %183, %225 : vector<48x32xf32>
    %227 = arith.addf %6, %226 : vector<48x32xf32>
    %c4_127 = arith.constant 4 : index
    %c0_128 = arith.constant 0 : index
    %c0_129 = arith.constant 0 : index
    %228 = vector.load %arg7[%c4_127, %c0_128, %c0_129] : memref<12x1x32xf32, #tpu.memory_space<vmem>>, vector<1x1x32xf32>
    %229 = vector.shape_cast %228 : vector<1x1x32xf32> to vector<1x32xf32>
    %230 = vector.broadcast %229 : vector<1x32xf32> to vector<48x32xf32>
    %231 = arith.addf %227, %230 : vector<48x32xf32>
    %c2_130 = arith.constant 2 : index
    %c0_131 = arith.constant 0 : index
    %c0_132 = arith.constant 0 : index
    %232 = vector.load %arg7[%c2_130, %c0_131, %c0_132] : memref<12x1x32xf32, #tpu.memory_space<vmem>>, vector<1x1x32xf32>
    %233 = vector.shape_cast %232 : vector<1x1x32xf32> to vector<1x32xf32>
    %c3_133 = arith.constant 3 : index
    %c0_134 = arith.constant 0 : index
    %c0_135 = arith.constant 0 : index
    %234 = vector.load %arg7[%c3_133, %c0_134, %c0_135] : memref<12x1x32xf32, #tpu.memory_space<vmem>>, vector<1x1x32xf32>
    %235 = vector.shape_cast %234 : vector<1x1x32xf32> to vector<1x32xf32>
    %cst_136 = arith.constant dense<0.000000e+00> : vector<48xf32>
    %236 = vector.multi_reduction <add>, %231, %cst_136 [1] : vector<48x32xf32> to vector<48xf32>
    %237 = vector.shape_cast %236 : vector<48xf32> to vector<48x1xf32>
    %cst_137 = arith.constant 3.200000e+01 : f32
    %238 = vector.broadcast %cst_137 : f32 to vector<48x1xf32>
    %239 = arith.divf %237, %238 : vector<48x1xf32>
    %240 = vector.broadcast %239 : vector<48x1xf32> to vector<48x32xf32>
    %241 = arith.subf %231, %240 : vector<48x32xf32>
    %242 = arith.mulf %241, %241 : vector<48x32xf32>
    %cst_138 = arith.constant dense<0.000000e+00> : vector<48xf32>
    %243 = vector.multi_reduction <add>, %242, %cst_138 [1] : vector<48x32xf32> to vector<48xf32>
    %244 = vector.shape_cast %243 : vector<48xf32> to vector<48x1xf32>
    %cst_139 = arith.constant 3.200000e+01 : f32
    %245 = vector.broadcast %cst_139 : f32 to vector<48x1xf32>
    %246 = arith.divf %244, %245 : vector<48x1xf32>
    %cst_140 = arith.constant 9.99999997E-7 : f32
    %247 = vector.broadcast %cst_140 : f32 to vector<48x1xf32>
    %248 = arith.addf %246, %247 : vector<48x1xf32>
    %249 = math.rsqrt %248 : vector<48x1xf32>
    %250 = vector.broadcast %249 : vector<48x1xf32> to vector<48x32xf32>
    %251 = arith.mulf %241, %250 : vector<48x32xf32>
    %252 = vector.broadcast %233 : vector<1x32xf32> to vector<48x32xf32>
    %253 = arith.mulf %251, %252 : vector<48x32xf32>
    %254 = vector.broadcast %235 : vector<1x32xf32> to vector<48x32xf32>
    %255 = arith.addf %253, %254 : vector<48x32xf32>
    %256 = arith.truncf %255 : vector<48x32xf32> to vector<48x32xbf16>
    %c0_141 = arith.constant 0 : index
    %c0_142 = arith.constant 0 : index
    %c0_143 = arith.constant 0 : index
    %257 = vector.load %arg8[%c0_141, %c0_142, %c0_143] : memref<2x32x128xbf16, #tpu.memory_space<vmem>>, vector<1x32x128xbf16>
    %258 = vector.shape_cast %257 : vector<1x32x128xbf16> to vector<32x128xbf16>
    %cst_144 = arith.constant dense<0.000000e+00> : vector<48x128xf32>
    %259 = tpu.matmul %256, %258, %cst_144 {dimension_numbers = #tpu.dot_dimension_numbers<[1], [0], [0], [1], [0, 0, 1, 1], [], []>} : vector<48x32xbf16>, vector<32x128xbf16>, vector<48x128xf32> -> vector<48x128xf32>
    %c0_145 = arith.constant 0 : index
    %c0_146 = arith.constant 0 : index
    %c0_147 = arith.constant 0 : index
    %260 = vector.load %arg9[%c0_145, %c0_146, %c0_147] : memref<2x1x128xf32, #tpu.memory_space<vmem>>, vector<1x1x128xf32>
    %261 = vector.shape_cast %260 : vector<1x1x128xf32> to vector<1x128xf32>
    %262 = vector.broadcast %261 : vector<1x128xf32> to vector<48x128xf32>
    %263 = arith.addf %259, %262 : vector<48x128xf32>
    %264 = arith.mulf %263, %263 : vector<48x128xf32>
    %265 = arith.mulf %263, %264 : vector<48x128xf32>
    %cst_148 = arith.constant 4.471500e-02 : f32
    %266 = vector.broadcast %cst_148 : f32 to vector<48x128xf32>
    %267 = arith.mulf %266, %265 : vector<48x128xf32>
    %268 = arith.addf %263, %267 : vector<48x128xf32>
    %cst_149 = arith.constant 0.797884583 : f32
    %269 = vector.broadcast %cst_149 : f32 to vector<48x128xf32>
    %270 = arith.mulf %269, %268 : vector<48x128xf32>
    %271 = math.tanh %270 : vector<48x128xf32>
    %cst_150 = arith.constant 1.000000e+00 : f32
    %272 = vector.broadcast %cst_150 : f32 to vector<48x128xf32>
    %273 = arith.addf %272, %271 : vector<48x128xf32>
    %cst_151 = arith.constant 5.000000e-01 : f32
    %274 = vector.broadcast %cst_151 : f32 to vector<48x128xf32>
    %275 = arith.mulf %274, %273 : vector<48x128xf32>
    %276 = arith.mulf %263, %275 : vector<48x128xf32>
    %277 = arith.truncf %276 : vector<48x128xf32> to vector<48x128xbf16>
    %c0_152 = arith.constant 0 : index
    %c0_153 = arith.constant 0 : index
    %c0_154 = arith.constant 0 : index
    %278 = vector.load %arg10[%c0_152, %c0_153, %c0_154] : memref<2x128x32xbf16, #tpu.memory_space<vmem>>, vector<1x128x32xbf16>
    %279 = vector.shape_cast %278 : vector<1x128x32xbf16> to vector<128x32xbf16>
    %cst_155 = arith.constant dense<0.000000e+00> : vector<48x32xf32>
    %280 = tpu.matmul %277, %279, %cst_155 {dimension_numbers = #tpu.dot_dimension_numbers<[1], [0], [0], [1], [0, 0, 1, 1], [], []>} : vector<48x128xbf16>, vector<128x32xbf16>, vector<48x32xf32> -> vector<48x32xf32>
    %281 = arith.addf %231, %280 : vector<48x32xf32>
    %c5_156 = arith.constant 5 : index
    %c0_157 = arith.constant 0 : index
    %c0_158 = arith.constant 0 : index
    %282 = vector.load %arg7[%c5_156, %c0_157, %c0_158] : memref<12x1x32xf32, #tpu.memory_space<vmem>>, vector<1x1x32xf32>
    %283 = vector.shape_cast %282 : vector<1x1x32xf32> to vector<1x32xf32>
    %284 = vector.broadcast %283 : vector<1x32xf32> to vector<48x32xf32>
    %285 = arith.addf %281, %284 : vector<48x32xf32>
    %c6_159 = arith.constant 6 : index
    %c0_160 = arith.constant 0 : index
    %c0_161 = arith.constant 0 : index
    %286 = vector.load %arg7[%c6_159, %c0_160, %c0_161] : memref<12x1x32xf32, #tpu.memory_space<vmem>>, vector<1x1x32xf32>
    %287 = vector.shape_cast %286 : vector<1x1x32xf32> to vector<1x32xf32>
    %c7_162 = arith.constant 7 : index
    %c0_163 = arith.constant 0 : index
    %c0_164 = arith.constant 0 : index
    %288 = vector.load %arg7[%c7_162, %c0_163, %c0_164] : memref<12x1x32xf32, #tpu.memory_space<vmem>>, vector<1x1x32xf32>
    %289 = vector.shape_cast %288 : vector<1x1x32xf32> to vector<1x32xf32>
    %cst_165 = arith.constant dense<0.000000e+00> : vector<48xf32>
    %290 = vector.multi_reduction <add>, %285, %cst_165 [1] : vector<48x32xf32> to vector<48xf32>
    %291 = vector.shape_cast %290 : vector<48xf32> to vector<48x1xf32>
    %cst_166 = arith.constant 3.200000e+01 : f32
    %292 = vector.broadcast %cst_166 : f32 to vector<48x1xf32>
    %293 = arith.divf %291, %292 : vector<48x1xf32>
    %294 = vector.broadcast %293 : vector<48x1xf32> to vector<48x32xf32>
    %295 = arith.subf %285, %294 : vector<48x32xf32>
    %296 = arith.mulf %295, %295 : vector<48x32xf32>
    %cst_167 = arith.constant dense<0.000000e+00> : vector<48xf32>
    %297 = vector.multi_reduction <add>, %296, %cst_167 [1] : vector<48x32xf32> to vector<48xf32>
    %298 = vector.shape_cast %297 : vector<48xf32> to vector<48x1xf32>
    %cst_168 = arith.constant 3.200000e+01 : f32
    %299 = vector.broadcast %cst_168 : f32 to vector<48x1xf32>
    %300 = arith.divf %298, %299 : vector<48x1xf32>
    %cst_169 = arith.constant 9.99999997E-7 : f32
    %301 = vector.broadcast %cst_169 : f32 to vector<48x1xf32>
    %302 = arith.addf %300, %301 : vector<48x1xf32>
    %303 = math.rsqrt %302 : vector<48x1xf32>
    %304 = vector.broadcast %303 : vector<48x1xf32> to vector<48x32xf32>
    %305 = arith.mulf %295, %304 : vector<48x32xf32>
    %306 = vector.broadcast %287 : vector<1x32xf32> to vector<48x32xf32>
    %307 = arith.mulf %305, %306 : vector<48x32xf32>
    %308 = vector.broadcast %289 : vector<1x32xf32> to vector<48x32xf32>
    %309 = arith.addf %307, %308 : vector<48x32xf32>
    %310 = arith.truncf %309 : vector<48x32xf32> to vector<48x32xbf16>
    %cst_170 = arith.constant 0.000000e+00 : f32
    %311 = vector.broadcast %cst_170 : f32 to vector<48x32xf32>
    %c12 = arith.constant 12 : index
    %c0_171 = arith.constant 0 : index
    %c0_172 = arith.constant 0 : index
    %312 = vector.load %arg4[%c12, %c0_171, %c0_172] : memref<24x32x8xbf16, #tpu.memory_space<vmem>>, vector<1x32x8xbf16>
    %313 = vector.shape_cast %312 : vector<1x32x8xbf16> to vector<32x8xbf16>
    %cst_173 = arith.constant dense<0.000000e+00> : vector<48x8xf32>
    %314 = tpu.matmul %310, %313, %cst_173 {dimension_numbers = #tpu.dot_dimension_numbers<[1], [0], [0], [1], [0, 0, 1, 1], [], []>} : vector<48x32xbf16>, vector<32x8xbf16>, vector<48x8xf32> -> vector<48x8xf32>
    %c12_174 = arith.constant 12 : index
    %c0_175 = arith.constant 0 : index
    %c0_176 = arith.constant 0 : index
    %315 = vector.load %arg5[%c12_174, %c0_175, %c0_176] : memref<24x1x8xf32, #tpu.memory_space<vmem>>, vector<1x1x8xf32>
    %316 = vector.shape_cast %315 : vector<1x1x8xf32> to vector<1x8xf32>
    %317 = vector.broadcast %316 : vector<1x8xf32> to vector<48x8xf32>
    %318 = arith.addf %314, %317 : vector<48x8xf32>
    %319 = arith.truncf %318 : vector<48x8xf32> to vector<48x8xbf16>
    %c16 = arith.constant 16 : index
    %c0_177 = arith.constant 0 : index
    %c0_178 = arith.constant 0 : index
    %320 = vector.load %arg4[%c16, %c0_177, %c0_178] : memref<24x32x8xbf16, #tpu.memory_space<vmem>>, vector<1x32x8xbf16>
    %321 = vector.shape_cast %320 : vector<1x32x8xbf16> to vector<32x8xbf16>
    %cst_179 = arith.constant dense<0.000000e+00> : vector<48x8xf32>
    %322 = tpu.matmul %310, %321, %cst_179 {dimension_numbers = #tpu.dot_dimension_numbers<[1], [0], [0], [1], [0, 0, 1, 1], [], []>} : vector<48x32xbf16>, vector<32x8xbf16>, vector<48x8xf32> -> vector<48x8xf32>
    %c16_180 = arith.constant 16 : index
    %c0_181 = arith.constant 0 : index
    %c0_182 = arith.constant 0 : index
    %323 = vector.load %arg5[%c16_180, %c0_181, %c0_182] : memref<24x1x8xf32, #tpu.memory_space<vmem>>, vector<1x1x8xf32>
    %324 = vector.shape_cast %323 : vector<1x1x8xf32> to vector<1x8xf32>
    %325 = vector.broadcast %324 : vector<1x8xf32> to vector<48x8xf32>
    %326 = arith.addf %322, %325 : vector<48x8xf32>
    %327 = arith.truncf %326 : vector<48x8xf32> to vector<48x8xbf16>
    %c20 = arith.constant 20 : index
    %c0_183 = arith.constant 0 : index
    %c0_184 = arith.constant 0 : index
    %328 = vector.load %arg4[%c20, %c0_183, %c0_184] : memref<24x32x8xbf16, #tpu.memory_space<vmem>>, vector<1x32x8xbf16>
    %329 = vector.shape_cast %328 : vector<1x32x8xbf16> to vector<32x8xbf16>
    %cst_185 = arith.constant dense<0.000000e+00> : vector<48x8xf32>
    %330 = tpu.matmul %310, %329, %cst_185 {dimension_numbers = #tpu.dot_dimension_numbers<[1], [0], [0], [1], [0, 0, 1, 1], [], []>} : vector<48x32xbf16>, vector<32x8xbf16>, vector<48x8xf32> -> vector<48x8xf32>
    %c20_186 = arith.constant 20 : index
    %c0_187 = arith.constant 0 : index
    %c0_188 = arith.constant 0 : index
    %331 = vector.load %arg5[%c20_186, %c0_187, %c0_188] : memref<24x1x8xf32, #tpu.memory_space<vmem>>, vector<1x1x8xf32>
    %332 = vector.shape_cast %331 : vector<1x1x8xf32> to vector<1x8xf32>
    %333 = vector.broadcast %332 : vector<1x8xf32> to vector<48x8xf32>
    %334 = arith.addf %330, %333 : vector<48x8xf32>
    %335 = arith.truncf %334 : vector<48x8xf32> to vector<48x8xbf16>
    %cst_189 = arith.constant dense<0.000000e+00> : vector<48x48xf32>
    %336 = tpu.matmul %319, %327, %cst_189 {dimension_numbers = #tpu.dot_dimension_numbers<[1], [1], [0], [0], [0, 0, 1, 0], [], []>} : vector<48x8xbf16>, vector<48x8xbf16>, vector<48x48xf32> -> vector<48x48xf32>
    %337 = arith.addf %336, %28 : vector<48x48xf32>
    %cst_190 = arith.constant dense<0xFF800000> : vector<48xf32>
    %338 = vector.multi_reduction <maximumf>, %337, %cst_190 [1] : vector<48x48xf32> to vector<48xf32>
    %339 = vector.shape_cast %338 : vector<48xf32> to vector<48x1xf32>
    %340 = vector.broadcast %339 : vector<48x1xf32> to vector<48x48xf32>
    %341 = arith.subf %337, %340 : vector<48x48xf32>
    %342 = math.exp %341 : vector<48x48xf32>
    %cst_191 = arith.constant dense<0.000000e+00> : vector<48xf32>
    %343 = vector.multi_reduction <add>, %342, %cst_191 [1] : vector<48x48xf32> to vector<48xf32>
    %344 = vector.shape_cast %343 : vector<48xf32> to vector<48x1xf32>
    %345 = tpu.reciprocal %344 {approx = true} : vector<48x1xf32> -> vector<48x1xf32>
    %346 = vector.broadcast %345 : vector<48x1xf32> to vector<48x48xf32>
    %347 = arith.mulf %342, %346 : vector<48x48xf32>
    %348 = arith.truncf %347 : vector<48x48xf32> to vector<48x48xbf16>
    %cst_192 = arith.constant dense<0.000000e+00> : vector<48x8xf32>
    %349 = tpu.matmul %348, %335, %cst_192 {dimension_numbers = #tpu.dot_dimension_numbers<[1], [0], [0], [1], [0, 0, 1, 1], [], []>} : vector<48x48xbf16>, vector<48x8xbf16>, vector<48x8xf32> -> vector<48x8xf32>
    %350 = arith.truncf %349 : vector<48x8xf32> to vector<48x8xbf16>
    %c4_193 = arith.constant 4 : index
    %c0_194 = arith.constant 0 : index
    %c0_195 = arith.constant 0 : index
    %351 = vector.load %arg6[%c4_193, %c0_194, %c0_195] : memref<8x8x32xbf16, #tpu.memory_space<vmem>>, vector<1x8x32xbf16>
    %352 = vector.shape_cast %351 : vector<1x8x32xbf16> to vector<8x32xbf16>
    %cst_196 = arith.constant dense<0.000000e+00> : vector<48x32xf32>
    %353 = tpu.matmul %350, %352, %cst_196 {dimension_numbers = #tpu.dot_dimension_numbers<[1], [0], [0], [1], [0, 0, 1, 1], [], []>} : vector<48x8xbf16>, vector<8x32xbf16>, vector<48x32xf32> -> vector<48x32xf32>
    %354 = arith.addf %311, %353 : vector<48x32xf32>
    %c13 = arith.constant 13 : index
    %c0_197 = arith.constant 0 : index
    %c0_198 = arith.constant 0 : index
    %355 = vector.load %arg4[%c13, %c0_197, %c0_198] : memref<24x32x8xbf16, #tpu.memory_space<vmem>>, vector<1x32x8xbf16>
    %356 = vector.shape_cast %355 : vector<1x32x8xbf16> to vector<32x8xbf16>
    %cst_199 = arith.constant dense<0.000000e+00> : vector<48x8xf32>
    %357 = tpu.matmul %310, %356, %cst_199 {dimension_numbers = #tpu.dot_dimension_numbers<[1], [0], [0], [1], [0, 0, 1, 1], [], []>} : vector<48x32xbf16>, vector<32x8xbf16>, vector<48x8xf32> -> vector<48x8xf32>
    %c13_200 = arith.constant 13 : index
    %c0_201 = arith.constant 0 : index
    %c0_202 = arith.constant 0 : index
    %358 = vector.load %arg5[%c13_200, %c0_201, %c0_202] : memref<24x1x8xf32, #tpu.memory_space<vmem>>, vector<1x1x8xf32>
    %359 = vector.shape_cast %358 : vector<1x1x8xf32> to vector<1x8xf32>
    %360 = vector.broadcast %359 : vector<1x8xf32> to vector<48x8xf32>
    %361 = arith.addf %357, %360 : vector<48x8xf32>
    %362 = arith.truncf %361 : vector<48x8xf32> to vector<48x8xbf16>
    %c17 = arith.constant 17 : index
    %c0_203 = arith.constant 0 : index
    %c0_204 = arith.constant 0 : index
    %363 = vector.load %arg4[%c17, %c0_203, %c0_204] : memref<24x32x8xbf16, #tpu.memory_space<vmem>>, vector<1x32x8xbf16>
    %364 = vector.shape_cast %363 : vector<1x32x8xbf16> to vector<32x8xbf16>
    %cst_205 = arith.constant dense<0.000000e+00> : vector<48x8xf32>
    %365 = tpu.matmul %310, %364, %cst_205 {dimension_numbers = #tpu.dot_dimension_numbers<[1], [0], [0], [1], [0, 0, 1, 1], [], []>} : vector<48x32xbf16>, vector<32x8xbf16>, vector<48x8xf32> -> vector<48x8xf32>
    %c17_206 = arith.constant 17 : index
    %c0_207 = arith.constant 0 : index
    %c0_208 = arith.constant 0 : index
    %366 = vector.load %arg5[%c17_206, %c0_207, %c0_208] : memref<24x1x8xf32, #tpu.memory_space<vmem>>, vector<1x1x8xf32>
    %367 = vector.shape_cast %366 : vector<1x1x8xf32> to vector<1x8xf32>
    %368 = vector.broadcast %367 : vector<1x8xf32> to vector<48x8xf32>
    %369 = arith.addf %365, %368 : vector<48x8xf32>
    %370 = arith.truncf %369 : vector<48x8xf32> to vector<48x8xbf16>
    %c21 = arith.constant 21 : index
    %c0_209 = arith.constant 0 : index
    %c0_210 = arith.constant 0 : index
    %371 = vector.load %arg4[%c21, %c0_209, %c0_210] : memref<24x32x8xbf16, #tpu.memory_space<vmem>>, vector<1x32x8xbf16>
    %372 = vector.shape_cast %371 : vector<1x32x8xbf16> to vector<32x8xbf16>
    %cst_211 = arith.constant dense<0.000000e+00> : vector<48x8xf32>
    %373 = tpu.matmul %310, %372, %cst_211 {dimension_numbers = #tpu.dot_dimension_numbers<[1], [0], [0], [1], [0, 0, 1, 1], [], []>} : vector<48x32xbf16>, vector<32x8xbf16>, vector<48x8xf32> -> vector<48x8xf32>
    %c21_212 = arith.constant 21 : index
    %c0_213 = arith.constant 0 : index
    %c0_214 = arith.constant 0 : index
    %374 = vector.load %arg5[%c21_212, %c0_213, %c0_214] : memref<24x1x8xf32, #tpu.memory_space<vmem>>, vector<1x1x8xf32>
    %375 = vector.shape_cast %374 : vector<1x1x8xf32> to vector<1x8xf32>
    %376 = vector.broadcast %375 : vector<1x8xf32> to vector<48x8xf32>
    %377 = arith.addf %373, %376 : vector<48x8xf32>
    %378 = arith.truncf %377 : vector<48x8xf32> to vector<48x8xbf16>
    %cst_215 = arith.constant dense<0.000000e+00> : vector<48x48xf32>
    %379 = tpu.matmul %362, %370, %cst_215 {dimension_numbers = #tpu.dot_dimension_numbers<[1], [1], [0], [0], [0, 0, 1, 0], [], []>} : vector<48x8xbf16>, vector<48x8xbf16>, vector<48x48xf32> -> vector<48x48xf32>
    %380 = arith.addf %379, %28 : vector<48x48xf32>
    %cst_216 = arith.constant dense<0xFF800000> : vector<48xf32>
    %381 = vector.multi_reduction <maximumf>, %380, %cst_216 [1] : vector<48x48xf32> to vector<48xf32>
    %382 = vector.shape_cast %381 : vector<48xf32> to vector<48x1xf32>
    %383 = vector.broadcast %382 : vector<48x1xf32> to vector<48x48xf32>
    %384 = arith.subf %380, %383 : vector<48x48xf32>
    %385 = math.exp %384 : vector<48x48xf32>
    %cst_217 = arith.constant dense<0.000000e+00> : vector<48xf32>
    %386 = vector.multi_reduction <add>, %385, %cst_217 [1] : vector<48x48xf32> to vector<48xf32>
    %387 = vector.shape_cast %386 : vector<48xf32> to vector<48x1xf32>
    %388 = tpu.reciprocal %387 {approx = true} : vector<48x1xf32> -> vector<48x1xf32>
    %389 = vector.broadcast %388 : vector<48x1xf32> to vector<48x48xf32>
    %390 = arith.mulf %385, %389 : vector<48x48xf32>
    %391 = arith.truncf %390 : vector<48x48xf32> to vector<48x48xbf16>
    %cst_218 = arith.constant dense<0.000000e+00> : vector<48x8xf32>
    %392 = tpu.matmul %391, %378, %cst_218 {dimension_numbers = #tpu.dot_dimension_numbers<[1], [0], [0], [1], [0, 0, 1, 1], [], []>} : vector<48x48xbf16>, vector<48x8xbf16>, vector<48x8xf32> -> vector<48x8xf32>
    %393 = arith.truncf %392 : vector<48x8xf32> to vector<48x8xbf16>
    %c5_219 = arith.constant 5 : index
    %c0_220 = arith.constant 0 : index
    %c0_221 = arith.constant 0 : index
    %394 = vector.load %arg6[%c5_219, %c0_220, %c0_221] : memref<8x8x32xbf16, #tpu.memory_space<vmem>>, vector<1x8x32xbf16>
    %395 = vector.shape_cast %394 : vector<1x8x32xbf16> to vector<8x32xbf16>
    %cst_222 = arith.constant dense<0.000000e+00> : vector<48x32xf32>
    %396 = tpu.matmul %393, %395, %cst_222 {dimension_numbers = #tpu.dot_dimension_numbers<[1], [0], [0], [1], [0, 0, 1, 1], [], []>} : vector<48x8xbf16>, vector<8x32xbf16>, vector<48x32xf32> -> vector<48x32xf32>
    %397 = arith.addf %354, %396 : vector<48x32xf32>
    %c14 = arith.constant 14 : index
    %c0_223 = arith.constant 0 : index
    %c0_224 = arith.constant 0 : index
    %398 = vector.load %arg4[%c14, %c0_223, %c0_224] : memref<24x32x8xbf16, #tpu.memory_space<vmem>>, vector<1x32x8xbf16>
    %399 = vector.shape_cast %398 : vector<1x32x8xbf16> to vector<32x8xbf16>
    %cst_225 = arith.constant dense<0.000000e+00> : vector<48x8xf32>
    %400 = tpu.matmul %310, %399, %cst_225 {dimension_numbers = #tpu.dot_dimension_numbers<[1], [0], [0], [1], [0, 0, 1, 1], [], []>} : vector<48x32xbf16>, vector<32x8xbf16>, vector<48x8xf32> -> vector<48x8xf32>
    %c14_226 = arith.constant 14 : index
    %c0_227 = arith.constant 0 : index
    %c0_228 = arith.constant 0 : index
    %401 = vector.load %arg5[%c14_226, %c0_227, %c0_228] : memref<24x1x8xf32, #tpu.memory_space<vmem>>, vector<1x1x8xf32>
    %402 = vector.shape_cast %401 : vector<1x1x8xf32> to vector<1x8xf32>
    %403 = vector.broadcast %402 : vector<1x8xf32> to vector<48x8xf32>
    %404 = arith.addf %400, %403 : vector<48x8xf32>
    %405 = arith.truncf %404 : vector<48x8xf32> to vector<48x8xbf16>
    %c18 = arith.constant 18 : index
    %c0_229 = arith.constant 0 : index
    %c0_230 = arith.constant 0 : index
    %406 = vector.load %arg4[%c18, %c0_229, %c0_230] : memref<24x32x8xbf16, #tpu.memory_space<vmem>>, vector<1x32x8xbf16>
    %407 = vector.shape_cast %406 : vector<1x32x8xbf16> to vector<32x8xbf16>
    %cst_231 = arith.constant dense<0.000000e+00> : vector<48x8xf32>
    %408 = tpu.matmul %310, %407, %cst_231 {dimension_numbers = #tpu.dot_dimension_numbers<[1], [0], [0], [1], [0, 0, 1, 1], [], []>} : vector<48x32xbf16>, vector<32x8xbf16>, vector<48x8xf32> -> vector<48x8xf32>
    %c18_232 = arith.constant 18 : index
    %c0_233 = arith.constant 0 : index
    %c0_234 = arith.constant 0 : index
    %409 = vector.load %arg5[%c18_232, %c0_233, %c0_234] : memref<24x1x8xf32, #tpu.memory_space<vmem>>, vector<1x1x8xf32>
    %410 = vector.shape_cast %409 : vector<1x1x8xf32> to vector<1x8xf32>
    %411 = vector.broadcast %410 : vector<1x8xf32> to vector<48x8xf32>
    %412 = arith.addf %408, %411 : vector<48x8xf32>
    %413 = arith.truncf %412 : vector<48x8xf32> to vector<48x8xbf16>
    %c22 = arith.constant 22 : index
    %c0_235 = arith.constant 0 : index
    %c0_236 = arith.constant 0 : index
    %414 = vector.load %arg4[%c22, %c0_235, %c0_236] : memref<24x32x8xbf16, #tpu.memory_space<vmem>>, vector<1x32x8xbf16>
    %415 = vector.shape_cast %414 : vector<1x32x8xbf16> to vector<32x8xbf16>
    %cst_237 = arith.constant dense<0.000000e+00> : vector<48x8xf32>
    %416 = tpu.matmul %310, %415, %cst_237 {dimension_numbers = #tpu.dot_dimension_numbers<[1], [0], [0], [1], [0, 0, 1, 1], [], []>} : vector<48x32xbf16>, vector<32x8xbf16>, vector<48x8xf32> -> vector<48x8xf32>
    %c22_238 = arith.constant 22 : index
    %c0_239 = arith.constant 0 : index
    %c0_240 = arith.constant 0 : index
    %417 = vector.load %arg5[%c22_238, %c0_239, %c0_240] : memref<24x1x8xf32, #tpu.memory_space<vmem>>, vector<1x1x8xf32>
    %418 = vector.shape_cast %417 : vector<1x1x8xf32> to vector<1x8xf32>
    %419 = vector.broadcast %418 : vector<1x8xf32> to vector<48x8xf32>
    %420 = arith.addf %416, %419 : vector<48x8xf32>
    %421 = arith.truncf %420 : vector<48x8xf32> to vector<48x8xbf16>
    %cst_241 = arith.constant dense<0.000000e+00> : vector<48x48xf32>
    %422 = tpu.matmul %405, %413, %cst_241 {dimension_numbers = #tpu.dot_dimension_numbers<[1], [1], [0], [0], [0, 0, 1, 0], [], []>} : vector<48x8xbf16>, vector<48x8xbf16>, vector<48x48xf32> -> vector<48x48xf32>
    %423 = arith.addf %422, %28 : vector<48x48xf32>
    %cst_242 = arith.constant dense<0xFF800000> : vector<48xf32>
    %424 = vector.multi_reduction <maximumf>, %423, %cst_242 [1] : vector<48x48xf32> to vector<48xf32>
    %425 = vector.shape_cast %424 : vector<48xf32> to vector<48x1xf32>
    %426 = vector.broadcast %425 : vector<48x1xf32> to vector<48x48xf32>
    %427 = arith.subf %423, %426 : vector<48x48xf32>
    %428 = math.exp %427 : vector<48x48xf32>
    %cst_243 = arith.constant dense<0.000000e+00> : vector<48xf32>
    %429 = vector.multi_reduction <add>, %428, %cst_243 [1] : vector<48x48xf32> to vector<48xf32>
    %430 = vector.shape_cast %429 : vector<48xf32> to vector<48x1xf32>
    %431 = tpu.reciprocal %430 {approx = true} : vector<48x1xf32> -> vector<48x1xf32>
    %432 = vector.broadcast %431 : vector<48x1xf32> to vector<48x48xf32>
    %433 = arith.mulf %428, %432 : vector<48x48xf32>
    %434 = arith.truncf %433 : vector<48x48xf32> to vector<48x48xbf16>
    %cst_244 = arith.constant dense<0.000000e+00> : vector<48x8xf32>
    %435 = tpu.matmul %434, %421, %cst_244 {dimension_numbers = #tpu.dot_dimension_numbers<[1], [0], [0], [1], [0, 0, 1, 1], [], []>} : vector<48x48xbf16>, vector<48x8xbf16>, vector<48x8xf32> -> vector<48x8xf32>
    %436 = arith.truncf %435 : vector<48x8xf32> to vector<48x8xbf16>
    %c6_245 = arith.constant 6 : index
    %c0_246 = arith.constant 0 : index
    %c0_247 = arith.constant 0 : index
    %437 = vector.load %arg6[%c6_245, %c0_246, %c0_247] : memref<8x8x32xbf16, #tpu.memory_space<vmem>>, vector<1x8x32xbf16>
    %438 = vector.shape_cast %437 : vector<1x8x32xbf16> to vector<8x32xbf16>
    %cst_248 = arith.constant dense<0.000000e+00> : vector<48x32xf32>
    %439 = tpu.matmul %436, %438, %cst_248 {dimension_numbers = #tpu.dot_dimension_numbers<[1], [0], [0], [1], [0, 0, 1, 1], [], []>} : vector<48x8xbf16>, vector<8x32xbf16>, vector<48x32xf32> -> vector<48x32xf32>
    %440 = arith.addf %397, %439 : vector<48x32xf32>
    %c15 = arith.constant 15 : index
    %c0_249 = arith.constant 0 : index
    %c0_250 = arith.constant 0 : index
    %441 = vector.load %arg4[%c15, %c0_249, %c0_250] : memref<24x32x8xbf16, #tpu.memory_space<vmem>>, vector<1x32x8xbf16>
    %442 = vector.shape_cast %441 : vector<1x32x8xbf16> to vector<32x8xbf16>
    %cst_251 = arith.constant dense<0.000000e+00> : vector<48x8xf32>
    %443 = tpu.matmul %310, %442, %cst_251 {dimension_numbers = #tpu.dot_dimension_numbers<[1], [0], [0], [1], [0, 0, 1, 1], [], []>} : vector<48x32xbf16>, vector<32x8xbf16>, vector<48x8xf32> -> vector<48x8xf32>
    %c15_252 = arith.constant 15 : index
    %c0_253 = arith.constant 0 : index
    %c0_254 = arith.constant 0 : index
    %444 = vector.load %arg5[%c15_252, %c0_253, %c0_254] : memref<24x1x8xf32, #tpu.memory_space<vmem>>, vector<1x1x8xf32>
    %445 = vector.shape_cast %444 : vector<1x1x8xf32> to vector<1x8xf32>
    %446 = vector.broadcast %445 : vector<1x8xf32> to vector<48x8xf32>
    %447 = arith.addf %443, %446 : vector<48x8xf32>
    %448 = arith.truncf %447 : vector<48x8xf32> to vector<48x8xbf16>
    %c19 = arith.constant 19 : index
    %c0_255 = arith.constant 0 : index
    %c0_256 = arith.constant 0 : index
    %449 = vector.load %arg4[%c19, %c0_255, %c0_256] : memref<24x32x8xbf16, #tpu.memory_space<vmem>>, vector<1x32x8xbf16>
    %450 = vector.shape_cast %449 : vector<1x32x8xbf16> to vector<32x8xbf16>
    %cst_257 = arith.constant dense<0.000000e+00> : vector<48x8xf32>
    %451 = tpu.matmul %310, %450, %cst_257 {dimension_numbers = #tpu.dot_dimension_numbers<[1], [0], [0], [1], [0, 0, 1, 1], [], []>} : vector<48x32xbf16>, vector<32x8xbf16>, vector<48x8xf32> -> vector<48x8xf32>
    %c19_258 = arith.constant 19 : index
    %c0_259 = arith.constant 0 : index
    %c0_260 = arith.constant 0 : index
    %452 = vector.load %arg5[%c19_258, %c0_259, %c0_260] : memref<24x1x8xf32, #tpu.memory_space<vmem>>, vector<1x1x8xf32>
    %453 = vector.shape_cast %452 : vector<1x1x8xf32> to vector<1x8xf32>
    %454 = vector.broadcast %453 : vector<1x8xf32> to vector<48x8xf32>
    %455 = arith.addf %451, %454 : vector<48x8xf32>
    %456 = arith.truncf %455 : vector<48x8xf32> to vector<48x8xbf16>
    %c23 = arith.constant 23 : index
    %c0_261 = arith.constant 0 : index
    %c0_262 = arith.constant 0 : index
    %457 = vector.load %arg4[%c23, %c0_261, %c0_262] : memref<24x32x8xbf16, #tpu.memory_space<vmem>>, vector<1x32x8xbf16>
    %458 = vector.shape_cast %457 : vector<1x32x8xbf16> to vector<32x8xbf16>
    %cst_263 = arith.constant dense<0.000000e+00> : vector<48x8xf32>
    %459 = tpu.matmul %310, %458, %cst_263 {dimension_numbers = #tpu.dot_dimension_numbers<[1], [0], [0], [1], [0, 0, 1, 1], [], []>} : vector<48x32xbf16>, vector<32x8xbf16>, vector<48x8xf32> -> vector<48x8xf32>
    %c23_264 = arith.constant 23 : index
    %c0_265 = arith.constant 0 : index
    %c0_266 = arith.constant 0 : index
    %460 = vector.load %arg5[%c23_264, %c0_265, %c0_266] : memref<24x1x8xf32, #tpu.memory_space<vmem>>, vector<1x1x8xf32>
    %461 = vector.shape_cast %460 : vector<1x1x8xf32> to vector<1x8xf32>
    %462 = vector.broadcast %461 : vector<1x8xf32> to vector<48x8xf32>
    %463 = arith.addf %459, %462 : vector<48x8xf32>
    %464 = arith.truncf %463 : vector<48x8xf32> to vector<48x8xbf16>
    %cst_267 = arith.constant dense<0.000000e+00> : vector<48x48xf32>
    %465 = tpu.matmul %448, %456, %cst_267 {dimension_numbers = #tpu.dot_dimension_numbers<[1], [1], [0], [0], [0, 0, 1, 0], [], []>} : vector<48x8xbf16>, vector<48x8xbf16>, vector<48x48xf32> -> vector<48x48xf32>
    %466 = arith.addf %465, %28 : vector<48x48xf32>
    %cst_268 = arith.constant dense<0xFF800000> : vector<48xf32>
    %467 = vector.multi_reduction <maximumf>, %466, %cst_268 [1] : vector<48x48xf32> to vector<48xf32>
    %468 = vector.shape_cast %467 : vector<48xf32> to vector<48x1xf32>
    %469 = vector.broadcast %468 : vector<48x1xf32> to vector<48x48xf32>
    %470 = arith.subf %466, %469 : vector<48x48xf32>
    %471 = math.exp %470 : vector<48x48xf32>
    %cst_269 = arith.constant dense<0.000000e+00> : vector<48xf32>
    %472 = vector.multi_reduction <add>, %471, %cst_269 [1] : vector<48x48xf32> to vector<48xf32>
    %473 = vector.shape_cast %472 : vector<48xf32> to vector<48x1xf32>
    %474 = tpu.reciprocal %473 {approx = true} : vector<48x1xf32> -> vector<48x1xf32>
    %475 = vector.broadcast %474 : vector<48x1xf32> to vector<48x48xf32>
    %476 = arith.mulf %471, %475 : vector<48x48xf32>
    %477 = arith.truncf %476 : vector<48x48xf32> to vector<48x48xbf16>
    %cst_270 = arith.constant dense<0.000000e+00> : vector<48x8xf32>
    %478 = tpu.matmul %477, %464, %cst_270 {dimension_numbers = #tpu.dot_dimension_numbers<[1], [0], [0], [1], [0, 0, 1, 1], [], []>} : vector<48x48xbf16>, vector<48x8xbf16>, vector<48x8xf32> -> vector<48x8xf32>
    %479 = arith.truncf %478 : vector<48x8xf32> to vector<48x8xbf16>
    %c7_271 = arith.constant 7 : index
    %c0_272 = arith.constant 0 : index
    %c0_273 = arith.constant 0 : index
    %480 = vector.load %arg6[%c7_271, %c0_272, %c0_273] : memref<8x8x32xbf16, #tpu.memory_space<vmem>>, vector<1x8x32xbf16>
    %481 = vector.shape_cast %480 : vector<1x8x32xbf16> to vector<8x32xbf16>
    %cst_274 = arith.constant dense<0.000000e+00> : vector<48x32xf32>
    %482 = tpu.matmul %479, %481, %cst_274 {dimension_numbers = #tpu.dot_dimension_numbers<[1], [0], [0], [1], [0, 0, 1, 1], [], []>} : vector<48x8xbf16>, vector<8x32xbf16>, vector<48x32xf32> -> vector<48x32xf32>
    %483 = arith.addf %440, %482 : vector<48x32xf32>
    %484 = arith.addf %285, %483 : vector<48x32xf32>
    %c10_275 = arith.constant 10 : index
    %c0_276 = arith.constant 0 : index
    %c0_277 = arith.constant 0 : index
    %485 = vector.load %arg7[%c10_275, %c0_276, %c0_277] : memref<12x1x32xf32, #tpu.memory_space<vmem>>, vector<1x1x32xf32>
    %486 = vector.shape_cast %485 : vector<1x1x32xf32> to vector<1x32xf32>
    %487 = vector.broadcast %486 : vector<1x32xf32> to vector<48x32xf32>
    %488 = arith.addf %484, %487 : vector<48x32xf32>
    %c8_278 = arith.constant 8 : index
    %c0_279 = arith.constant 0 : index
    %c0_280 = arith.constant 0 : index
    %489 = vector.load %arg7[%c8_278, %c0_279, %c0_280] : memref<12x1x32xf32, #tpu.memory_space<vmem>>, vector<1x1x32xf32>
    %490 = vector.shape_cast %489 : vector<1x1x32xf32> to vector<1x32xf32>
    %c9_281 = arith.constant 9 : index
    %c0_282 = arith.constant 0 : index
    %c0_283 = arith.constant 0 : index
    %491 = vector.load %arg7[%c9_281, %c0_282, %c0_283] : memref<12x1x32xf32, #tpu.memory_space<vmem>>, vector<1x1x32xf32>
    %492 = vector.shape_cast %491 : vector<1x1x32xf32> to vector<1x32xf32>
    %cst_284 = arith.constant dense<0.000000e+00> : vector<48xf32>
    %493 = vector.multi_reduction <add>, %488, %cst_284 [1] : vector<48x32xf32> to vector<48xf32>
    %494 = vector.shape_cast %493 : vector<48xf32> to vector<48x1xf32>
    %cst_285 = arith.constant 3.200000e+01 : f32
    %495 = vector.broadcast %cst_285 : f32 to vector<48x1xf32>
    %496 = arith.divf %494, %495 : vector<48x1xf32>
    %497 = vector.broadcast %496 : vector<48x1xf32> to vector<48x32xf32>
    %498 = arith.subf %488, %497 : vector<48x32xf32>
    %499 = arith.mulf %498, %498 : vector<48x32xf32>
    %cst_286 = arith.constant dense<0.000000e+00> : vector<48xf32>
    %500 = vector.multi_reduction <add>, %499, %cst_286 [1] : vector<48x32xf32> to vector<48xf32>
    %501 = vector.shape_cast %500 : vector<48xf32> to vector<48x1xf32>
    %cst_287 = arith.constant 3.200000e+01 : f32
    %502 = vector.broadcast %cst_287 : f32 to vector<48x1xf32>
    %503 = arith.divf %501, %502 : vector<48x1xf32>
    %cst_288 = arith.constant 9.99999997E-7 : f32
    %504 = vector.broadcast %cst_288 : f32 to vector<48x1xf32>
    %505 = arith.addf %503, %504 : vector<48x1xf32>
    %506 = math.rsqrt %505 : vector<48x1xf32>
    %507 = vector.broadcast %506 : vector<48x1xf32> to vector<48x32xf32>
    %508 = arith.mulf %498, %507 : vector<48x32xf32>
    %509 = vector.broadcast %490 : vector<1x32xf32> to vector<48x32xf32>
    %510 = arith.mulf %508, %509 : vector<48x32xf32>
    %511 = vector.broadcast %492 : vector<1x32xf32> to vector<48x32xf32>
    %512 = arith.addf %510, %511 : vector<48x32xf32>
    %513 = arith.truncf %512 : vector<48x32xf32> to vector<48x32xbf16>
    %c1_289 = arith.constant 1 : index
    %c0_290 = arith.constant 0 : index
    %c0_291 = arith.constant 0 : index
    %514 = vector.load %arg8[%c1_289, %c0_290, %c0_291] : memref<2x32x128xbf16, #tpu.memory_space<vmem>>, vector<1x32x128xbf16>
    %515 = vector.shape_cast %514 : vector<1x32x128xbf16> to vector<32x128xbf16>
    %cst_292 = arith.constant dense<0.000000e+00> : vector<48x128xf32>
    %516 = tpu.matmul %513, %515, %cst_292 {dimension_numbers = #tpu.dot_dimension_numbers<[1], [0], [0], [1], [0, 0, 1, 1], [], []>} : vector<48x32xbf16>, vector<32x128xbf16>, vector<48x128xf32> -> vector<48x128xf32>
    %c1_293 = arith.constant 1 : index
    %c0_294 = arith.constant 0 : index
    %c0_295 = arith.constant 0 : index
    %517 = vector.load %arg9[%c1_293, %c0_294, %c0_295] : memref<2x1x128xf32, #tpu.memory_space<vmem>>, vector<1x1x128xf32>
    %518 = vector.shape_cast %517 : vector<1x1x128xf32> to vector<1x128xf32>
    %519 = vector.broadcast %518 : vector<1x128xf32> to vector<48x128xf32>
    %520 = arith.addf %516, %519 : vector<48x128xf32>
    %521 = arith.mulf %520, %520 : vector<48x128xf32>
    %522 = arith.mulf %520, %521 : vector<48x128xf32>
    %cst_296 = arith.constant 4.471500e-02 : f32
    %523 = vector.broadcast %cst_296 : f32 to vector<48x128xf32>
    %524 = arith.mulf %523, %522 : vector<48x128xf32>
    %525 = arith.addf %520, %524 : vector<48x128xf32>
    %cst_297 = arith.constant 0.797884583 : f32
    %526 = vector.broadcast %cst_297 : f32 to vector<48x128xf32>
    %527 = arith.mulf %526, %525 : vector<48x128xf32>
    %528 = math.tanh %527 : vector<48x128xf32>
    %cst_298 = arith.constant 1.000000e+00 : f32
    %529 = vector.broadcast %cst_298 : f32 to vector<48x128xf32>
    %530 = arith.addf %529, %528 : vector<48x128xf32>
    %cst_299 = arith.constant 5.000000e-01 : f32
    %531 = vector.broadcast %cst_299 : f32 to vector<48x128xf32>
    %532 = arith.mulf %531, %530 : vector<48x128xf32>
    %533 = arith.mulf %520, %532 : vector<48x128xf32>
    %534 = arith.truncf %533 : vector<48x128xf32> to vector<48x128xbf16>
    %c1_300 = arith.constant 1 : index
    %c0_301 = arith.constant 0 : index
    %c0_302 = arith.constant 0 : index
    %535 = vector.load %arg10[%c1_300, %c0_301, %c0_302] : memref<2x128x32xbf16, #tpu.memory_space<vmem>>, vector<1x128x32xbf16>
    %536 = vector.shape_cast %535 : vector<1x128x32xbf16> to vector<128x32xbf16>
    %cst_303 = arith.constant dense<0.000000e+00> : vector<48x32xf32>
    %537 = tpu.matmul %534, %536, %cst_303 {dimension_numbers = #tpu.dot_dimension_numbers<[1], [0], [0], [1], [0, 0, 1, 1], [], []>} : vector<48x128xbf16>, vector<128x32xbf16>, vector<48x32xf32> -> vector<48x32xf32>
    %538 = arith.addf %488, %537 : vector<48x32xf32>
    %c11_304 = arith.constant 11 : index
    %c0_305 = arith.constant 0 : index
    %c0_306 = arith.constant 0 : index
    %539 = vector.load %arg7[%c11_304, %c0_305, %c0_306] : memref<12x1x32xf32, #tpu.memory_space<vmem>>, vector<1x1x32xf32>
    %540 = vector.shape_cast %539 : vector<1x1x32xf32> to vector<1x32xf32>
    %541 = vector.broadcast %540 : vector<1x32xf32> to vector<48x32xf32>
    %542 = arith.addf %538, %541 : vector<48x32xf32>
    %543 = vector.extract_strided_slice %542 {offsets = [0, 0], sizes = [1, 32], strides = [1, 1]} : vector<48x32xf32> to vector<1x32xf32>
    %544 = vector.extract_strided_slice %542 {offsets = [24, 0], sizes = [1, 32], strides = [1, 1]} : vector<48x32xf32> to vector<1x32xf32>
    %545 = tpu.concatenate %543, %544 in 0 : vector<1x32xf32>, vector<1x32xf32> -> vector<2x32xf32>
    %546 = arith.truncf %545 : vector<2x32xf32> to vector<2x32xbf16>
    %c0_307 = arith.constant 0 : index
    %c0_308 = arith.constant 0 : index
    %547 = vector.load %arg11[%c0_307, %c0_308] : memref<32x128xbf16, #tpu.memory_space<vmem>>, vector<32x128xbf16>
    %cst_309 = arith.constant dense<0.000000e+00> : vector<2x128xf32>
    %548 = tpu.matmul %546, %547, %cst_309 {dimension_numbers = #tpu.dot_dimension_numbers<[1], [0], [0], [1], [0, 0, 1, 1], [], []>} : vector<2x32xbf16>, vector<32x128xbf16>, vector<2x128xf32> -> vector<2x128xf32>
    %c0_310 = arith.constant 0 : index
    %c0_311 = arith.constant 0 : index
    %549 = vector.load %arg12[%c0_310, %c0_311] : memref<1x128xf32, #tpu.memory_space<vmem>>, vector<1x128xf32>
    %550 = vector.broadcast %549 : vector<1x128xf32> to vector<2x128xf32>
    %551 = arith.addf %548, %550 : vector<2x128xf32>
    %c0_312 = arith.constant 0 : index
    %c0_313 = arith.constant 0 : index
    %c0_314 = arith.constant 0 : index
    %552 = vector.load %arg13[%c0_312, %c0_313, %c0_314] : memref<1x2x128xf32, #tpu.memory_space<vmem>>, vector<1x2x128xf32>
    %553 = vector.shape_cast %552 : vector<1x2x128xf32> to vector<2x128xf32>
    %554 = vector.shape_cast %551 : vector<2x128xf32> to vector<1x2x128xf32>
    tpu.vector_store %arg13[%c0_312, %c0_313, %c0_314], %554 {strides = array<i32>} : memref<1x2x128xf32, #tpu.memory_space<vmem>>, vector<1x2x128xf32>,
    return
  }
  func.func @transform_0(%arg0: i32) -> (i32, i32, i32) {
    %c0_i32 = arith.constant 0 : i32
    %c0_i32_0 = arith.constant 0 : i32
    %c0_i32_1 = arith.constant 0 : i32
    return %arg0, %c0_i32, %c0_i32_0 : i32, i32, i32
  }
  func.func @transform_1(%arg0: i32) -> (i32, i32) {
    %c0_i32 = arith.constant 0 : i32
    %c0_i32_0 = arith.constant 0 : i32
    %c0_i32_1 = arith.constant 0 : i32
    return %c0_i32, %c0_i32_0 : i32, i32
  }
  func.func @transform_2(%arg0: i32) -> (i32, i32) {
    %c0_i32 = arith.constant 0 : i32
    %c0_i32_0 = arith.constant 0 : i32
    %c0_i32_1 = arith.constant 0 : i32
    return %c0_i32, %c0_i32_0 : i32, i32
  }
  func.func @transform_3(%arg0: i32) -> (i32, i32, i32) {
    %c0_i32 = arith.constant 0 : i32
    %c0_i32_0 = arith.constant 0 : i32
    %c0_i32_1 = arith.constant 0 : i32
    %c0_i32_2 = arith.constant 0 : i32
    return %c0_i32, %c0_i32_0, %c0_i32_1 : i32, i32, i32
  }
  func.func @transform_4(%arg0: i32) -> (i32, i32, i32) {
    %c0_i32 = arith.constant 0 : i32
    %c0_i32_0 = arith.constant 0 : i32
    %c0_i32_1 = arith.constant 0 : i32
    %c0_i32_2 = arith.constant 0 : i32
    return %c0_i32, %c0_i32_0, %c0_i32_1 : i32, i32, i32
  }
  func.func @transform_5(%arg0: i32) -> (i32, i32, i32) {
    %c0_i32 = arith.constant 0 : i32
    %c0_i32_0 = arith.constant 0 : i32
    %c0_i32_1 = arith.constant 0 : i32
    %c0_i32_2 = arith.constant 0 : i32
    return %c0_i32, %c0_i32_0, %c0_i32_1 : i32, i32, i32
  }
  func.func @transform_6(%arg0: i32) -> (i32, i32, i32) {
    %c0_i32 = arith.constant 0 : i32
    %c0_i32_0 = arith.constant 0 : i32
    %c0_i32_1 = arith.constant 0 : i32
    %c0_i32_2 = arith.constant 0 : i32
    return %c0_i32, %c0_i32_0, %c0_i32_1 : i32, i32, i32
  }
  func.func @transform_7(%arg0: i32) -> (i32, i32, i32) {
    %c0_i32 = arith.constant 0 : i32
    %c0_i32_0 = arith.constant 0 : i32
    %c0_i32_1 = arith.constant 0 : i32
    %c0_i32_2 = arith.constant 0 : i32
    return %c0_i32, %c0_i32_0, %c0_i32_1 : i32, i32, i32
  }
  func.func @transform_8(%arg0: i32) -> (i32, i32, i32) {
    %c0_i32 = arith.constant 0 : i32
    %c0_i32_0 = arith.constant 0 : i32
    %c0_i32_1 = arith.constant 0 : i32
    %c0_i32_2 = arith.constant 0 : i32
    return %c0_i32, %c0_i32_0, %c0_i32_1 : i32, i32, i32
  }
  func.func @transform_9(%arg0: i32) -> (i32, i32, i32) {
    %c0_i32 = arith.constant 0 : i32
    %c0_i32_0 = arith.constant 0 : i32
    %c0_i32_1 = arith.constant 0 : i32
    %c0_i32_2 = arith.constant 0 : i32
    return %c0_i32, %c0_i32_0, %c0_i32_1 : i32, i32, i32
  }
  func.func @transform_10(%arg0: i32) -> (i32, i32) {
    %c0_i32 = arith.constant 0 : i32
    %c0_i32_0 = arith.constant 0 : i32
    %c0_i32_1 = arith.constant 0 : i32
    return %c0_i32, %c0_i32_0 : i32, i32
  }
  func.func @transform_11(%arg0: i32) -> (i32, i32) {
    %c0_i32 = arith.constant 0 : i32
    %c0_i32_0 = arith.constant 0 : i32
    %c0_i32_1 = arith.constant 0 : i32
    return %c0_i32, %c0_i32_0 : i32, i32
  }
  func.func @transform_12(%arg0: i32) -> (i32, i32, i32) {
    %c0_i32 = arith.constant 0 : i32
    %c0_i32_0 = arith.constant 0 : i32
    %c0_i32_1 = arith.constant 0 : i32
    return %arg0, %c0_i32, %c0_i32_0 : i32, i32, i32
  }
}

</mosaic_0001>

<bundles_post_ra>
// kernel: vit_forward.1
= control target key start
LH: loop header
LB: loop body
LE: loop exit
PB: predicated region body
PF: predicated region fallthrough
CT: control target
= control target key end

     0   :  { %vm91_vm0 = vcmask 392192   ;;  %s6398_s0 = inlined_call_operand.vmem [shape: bf16[1,48,48], index: 0, kind: input, shape index: {}]   ;;  %s6399_s1 = inlined_call_operand.vmem [shape: f32[24,32], index: 1, kind: input, shape index: {}]   ;;  %s6400_s2 = inlined_call_operand.vmem [shape: bf16[48,32], index: 2, kind: input, shape index: {}]   ;;  %s6401_s3 = inlined_call_operand.vmem [shape: bf16[24,32,8], index: 3, kind: input, shape index: {}]   ;;  %s6402_s4 = inlined_call_operand.vmem [shape: f32[24,1,8], index: 4, kind: input, shape index: {}]   ;;  %s6403_s5 = inlined_call_operand.vmem [shape: bf16[8,8,32], index: 5, kind: input, shape index: {}]   ;;  %s6404_s6 = inlined_call_operand.vmem [shape: f32[12,1,32], index: 6, kind: input, shape index: {}]   ;;  %s6405_s7 = inlined_call_operand.vmem [shape: bf16[2,32,128], index: 7, kind: input, shape index: {}]   ;;  %s6406_s8 = inlined_call_operand.vmem [shape: f32[2,1,128], index: 8, kind: input, shape index: {}]   ;;  %s6407_s9 = inlined_call_operand.vmem [shape: bf16[2,128,32], index: 9, kind: input, shape index: {}]   ;;  %s6408_s10 = inlined_call_operand.vmem [shape: bf16[32,128], index: 10, kind: input, shape index: {}]   ;;  %s6409_s11 = inlined_call_operand.vmem [shape: f32[1,128], index: 11, kind: input, shape index: {}]   ;;  %s6410_s12 = inlined_call_operand.hbm [shape: f32[1,2,128], index: 12, kind: output, shape index: {}]  }
   0x1   :  { %v4598_v0 = vld [vmem:[%s6400_s2 + $0x10] sm:$0xff]  ;;  %v4597_v1 = vld [vmem:[%s6400_s2 + $0x8] sm:$0xff]  ;;  %v4596_v2 = vld [vmem:[%s6400_s2] sm:$0xff] }
   0x2   :  { %106 = vmatpush.bf16.msra.mxu0 %v4598_v0  ;;  %v4593_v3 = vld [vmem:[%s6398_s0] sm:$0xff] }
   0x6   :  { %107 = vmatpush.bf16.msra.mxu0 %v4597_v1 }
   0xa   :  { %108 = vmatpush.bf16.msra.mxu0 %v4596_v2 }
   0xd   :  { %4005 = vmatmul.msk.bf16.vlgmr.msra.gmra.mxu0 %vm91_vm0, %v4593_v3 }
   0xe   :  { %17 = vsyncpa [#allocation3], 0  ;;  %v4594_v4 = vld [vmem:[%s6398_s0 + $0x8] sm:$0xff]  ;;  %v4595_v5 = vld [vmem:[%s6398_s0 + $0x10] sm:$0xff]  ;;  %vm138_vm1 = vcmask 261120   ;;  %v5006_v27 = vmov 32.0  }
   0xf   :  { %v43_v6 = vld [vmem:[%s6399_s1] sm:$0xff]  ;;  %v44_v10 = vld [vmem:[%s6399_s1 + $0x8] sm:$0xff]  ;;  %v45_v14 = vld [vmem:[%s6399_s1 + $0x10] sm:$0xff]  ;;  %4714 = vrcp.f32 %v5006_v27  ;;  %s5008_s13 = smov [#allocation2]   ;;  %s3972_s15 = sshll.u32 %s6410_s12, 4  ;;  %s3973_s15 = int_to_ptr.hbm [resolvable:$true] %s3972_s15 }
  0x10   :  { %v4600_v0 = vld [vmem:[%s6401_s3 + $0x8] sm:$0xff]  ;;  %v4608_v2 = vld [vmem:[%s6401_s3 + $0x58] sm:$0xff]  ;;  %s3970_s14 = sshll.u32 %s5008_s13, 4  ;;  %s3971_s14 = int_to_ptr.vmem [resolvable:$true] %s3970_s14 }
  0x11   :  { %v4602_v1 = vld [vmem:[%s6401_s3 + $0x48] sm:$0xff]  ;;  %334 = vmatpush.bf16.msra.mxu1 %v4600_v0  ;;  %679 = vmatpush.bf16.msrb.mxu0 %v4608_v2 }
  0x12   :  { %383 = vmatpush.bf16.msra.mxu2 %v4602_v1  ;;  %4669 = vmatpush.bf16.msra.mxu3 %v4600_v0 }
  0x15   :  { %v4715_v28 = vpop.eup %4714 }
  0x16   :  { %v158_v29 = vmul.f32 32.0, %v4715_v28  ;;  %vm162_vm2 = vweird.f32 %v4715_v28 }
  0x18   :  { %v159_v30 = vsub.f32 1.0, %v158_v29 }
  0x1a   :  { %v160_v31 = vmul.f32 %v4715_v28, %v159_v30 }
  0x1c   :  { %v161_v32 = vadd.f32 %v4715_v28, %v160_v31 }
  0x1d   :  { %4006 = vmatmul.msk.bf16.gmra.mxu0 %vm91_vm0, %v4594_v4 }
  0x1e   :  { %v5128_v33 = vsel %vm162_vm2, %v4715_v28, %v161_v32 }
  0x2d   :  { %4007 = vmatmul.msk.bf16.gmra.mxu0 %vm91_vm0, %v4595_v5  ;;  %v4599_v5 = vld [vmem:[%s6401_s3] sm:$0xff] }
  0x2e   :  { %335 = vmatpush.bf16.msra.mxu1 %v4599_v5  ;;  %4670 = vmatpush.bf16.msra.mxu3 %v4599_v5 }
  0x8a   :  { %v110_v7 = vpop.f32.mrf.mxu0 }
  0x8b   :  { %v5098_v8 = vadd.f32 %v110_v7, %v43_v6  ;;  %v4607_v7 = vld [vmem:[%s6401_s3 + $0x50] sm:$0xff] }
  0x8c   :  { %680 = vmatpush.bf16.msrb.mxu0 %v4607_v7 }
  0x8d   :  { %v139_v9 = vsel %vm138_vm1, %v5098_v8, 0.0 }
  0x8e   :  { %140 = vadd.xlane.f32.xlu0 %v139_v9 }
  0x92   :  { %v112_v11 = vpop.f32.mrf.mxu0 }
  0x93   :  { %v5105_v12 = vadd.f32 %v112_v11, %v44_v10 }
  0x95   :  { %v142_v13 = vsel %vm138_vm1, %v5105_v12, 0.0 }
  0x96   :  { %143 = vadd.xlane.f32.xlu0 %v142_v13 }
  0x9a   :  { %v115_v15 = vpop.f32.mrf.mxu0 }
  0x9b   :  { %v5112_v16 = vadd.f32 %v115_v15, %v45_v14 }
  0x9d   :  { %v145_v17 = vsel %vm138_vm1, %v5112_v16, 0.0 }
  0x9e   :  { %146 = vadd.xlane.f32.xlu1 %v145_v17 }
  0xa2   :  { %v117_v18 = vpop.f32.mrf.mxu0 }
  0xa3   :  { %v5116_v19 = vadd.f32 %v117_v18, %v43_v6  ;;  %v4601_v6 = vld [vmem:[%s6401_s3 + $0x40] sm:$0xff] }
  0xa4   :  { %384 = vmatpush.bf16.msra.mxu2 %v4601_v6  ;;  %v4603_v6 = vld [vmem:[%s6401_s3 + $0x80] sm:$0xff] }
  0xa5   :  { %v148_v20 = vsel %vm138_vm1, %v5116_v19, 0.0 }
  0xa6   :  { %149 = vadd.xlane.f32.xlu1 %v148_v20 }
  0xaa   :  { %v120_v21 = vpop.f32.mrf.mxu0 }
  0xab   :  { %v5120_v22 = vadd.f32 %v120_v21, %v44_v10 }
  0xad   :  { %v151_v23 = vsel %vm138_vm1, %v5120_v22, 0.0 }
  0xae   :  { %152 = vadd.xlane.f32.xlu2 %v151_v23 }
  0xb2   :  { %v122_v24 = vpop.f32.mrf.mxu0 }
  0xb3   :  { %v5124_v25 = vadd.f32 %v122_v24, %v45_v14 }
  0xb5   :  { %v154_v26 = vsel %vm138_vm1, %v5124_v25, 0.0 }
  0xb6   :  { %155 = vadd.xlane.f32.xlu2 %v154_v26 }
 0x101   :  { %v141_v34 = vpop.xlane.xlu0 %140 }
 0x102   :  { %v164_v35 = vmul.f32 %v5128_v33, %v141_v34 }
 0x104   :  { %v5132_v36 = vsub.f32 %v5098_v8, %v164_v35 }
 0x106   :  { %v176_v37 = vmul.f32 %v5132_v36, %v5132_v36 }
 0x108   :  { %v182_v38 = vsel %vm138_vm1, %v176_v37, 0.0 }
 0x109   :  { %183 = vadd.xlane.f32.xlu0 %v182_v38  ;;  %v144_v39 = vpop.xlane.xlu0 %143  ;;  %v5197_v38 = vld [vmem:[%s6404_s6] ss:$0 sm:$0xff] }
 0x10a   :  { %v165_v40 = vmul.f32 %v5128_v33, %v144_v39 }
 0x10c   :  { %v5139_v41 = vsub.f32 %v5105_v12, %v165_v40 }
 0x10e   :  { %v177_v42 = vmul.f32 %v5139_v41, %v5139_v41 }
 0x110   :  { %v185_v43 = vsel %vm138_vm1, %v177_v42, 0.0 }
 0x111   :  { %v147_v44 = vpop.xlane.xlu1 %146  ;;  %186 = vadd.xlane.f32.xlu1 %v185_v43 }
 0x112   :  { %v166_v45 = vmul.f32 %v5128_v33, %v147_v44 }
 0x114   :  { %v5146_v46 = vsub.f32 %v5112_v16, %v166_v45 }
 0x116   :  { %v178_v47 = vmul.f32 %v5146_v46, %v5146_v46 }
 0x118   :  { %v188_v48 = vsel %vm138_vm1, %v178_v47, 0.0  ;;  %v5203_v47 = vld [vmem:[%s6404_s6 + $0x1] ss:$0 sm:$0xff] }
 0x119   :  { %189 = vadd.xlane.f32.xlu2 %v188_v48  ;;  %v150_v49 = vpop.xlane.xlu1 %149 }
 0x11a   :  { %v167_v50 = vmul.f32 %v5128_v33, %v150_v49 }
 0x11c   :  { %v5153_v51 = vsub.f32 %v5116_v19, %v167_v50 }
 0x11e   :  { %v179_v52 = vmul.f32 %v5153_v51, %v5153_v51 }
 0x120   :  { %v191_v53 = vsel %vm138_vm1, %v179_v52, 0.0 }
 0x121   :  { %v153_v54 = vpop.xlane.xlu2 %152  ;;  %192 = vadd.xlane.f32.xlu0 %v191_v53 }
 0x122   :  { %v168_v55 = vmul.f32 %v5128_v33, %v153_v54 }
 0x124   :  { %v5160_v56 = vsub.f32 %v5120_v22, %v168_v55 }
 0x126   :  { %v180_v57 = vmul.f32 %v5160_v56, %v5160_v56 }
 0x128   :  { %v194_v58 = vsel %vm138_vm1, %v180_v57, 0.0 }
 0x129   :  { %v156_v59 = vpop.xlane.xlu2 %155  ;;  %195 = vadd.xlane.f32.xlu1 %v194_v58 }
 0x12a   :  { %v169_v60 = vmul.f32 %v5128_v33, %v156_v59 }
 0x12c   :  { %v5167_v61 = vsub.f32 %v5124_v25, %v169_v60 }
 0x12e   :  { %v181_v62 = vmul.f32 %v5167_v61, %v5167_v61 }
 0x130   :  { %v197_v63 = vsel %vm138_vm1, %v181_v62, 0.0 }
 0x131   :  { %198 = vadd.xlane.f32.xlu2 %v197_v63 }
 0x17c   :  { %v184_v3 = vpop.xlane.xlu0 %183 }
 0x17d   :  { %v200_v4 = vmul.f32 %v184_v3, %v5128_v33  ;;  %v4604_v3 = vld [vmem:[%s6401_s3 + $0x88] sm:$0xff] }
 0x17e   :  { %432 = vmatpush.bf16.msrb.mxu3 %v4604_v3 }
 0x17f   :  { %v206_v9 = vadd.f32 1e-06, %v200_v4 }
 0x181   :  { %4716 = vrsqrt.f32 %v206_v9  ;;  %vm218_vm4 = vweird.f32 %v206_v9 }
 0x182   :  { %433 = vmatpush.bf16.msrb.mxu3 %v4603_v6 }
 0x184   :  { %v187_v10 = vpop.xlane.xlu1 %186 }
 0x185   :  { %v201_v11 = vmul.f32 %v187_v10, %v5128_v33 }
 0x187   :  { %v4717_v13 = vpop.eup %4716  ;;  %v207_v14 = vadd.f32 1e-06, %v201_v11 }
 0x188   :  { %v213_v15 = vmul.f32 %v4717_v13, %v206_v9  ;;  %vm219_vm3 = vweird.f32 %v4717_v13 }
 0x189   :  { %4718 = vrsqrt.f32 %v207_v14  ;;  %vm220_vm5 = vmor %vm218_vm4, %vm219_vm3  ;;  %vm228_vm7 = vweird.f32 %v207_v14 }
 0x18a   :  { %v214_v17 = vmul.f32 %v4717_v13, %v213_v15 }
 0x18c   :  { %v215_v18 = vmul.f32 0.5, %v214_v17  ;;  %v190_v20 = vpop.xlane.xlu2 %189 }
 0x18d   :  { %v202_v21 = vmul.f32 %v190_v20, %v5128_v33 }
 0x18e   :  { %v216_v23 = vsub.f32 1.5, %v215_v18 }
 0x18f   :  { %v4719_v24 = vpop.eup %4718  ;;  %v208_v26 = vadd.f32 1e-06, %v202_v21 }
 0x190   :  { %v217_v27 = vmul.f32 %v4717_v13, %v216_v23  ;;  %v223_v28 = vmul.f32 %v4719_v24, %v207_v14  ;;  %vm229_vm6 = vweird.f32 %v4719_v24 }
 0x191   :  { %4720 = vrsqrt.f32 %v208_v26  ;;  %vm230_vm8 = vmor %vm228_vm7, %vm229_vm6  ;;  %vm238_vm10 = vweird.f32 %v208_v26  ;;  %vm453_vm7 = vcmask 64512  }
 0x192   :  { %v224_v29 = vmul.f32 %v4719_v24, %v223_v28  ;;  %v221_v30 = vsel %vm220_vm5, %v4717_v13, %v217_v27 }
 0x193   :  { %v272_v39 = vmul.f32 %v221_v30, %v5132_v36 }
 0x194   :  { %v225_v31 = vmul.f32 0.5, %v224_v29  ;;  %v193_v32 = vpop.xlane.xlu0 %192 }
 0x195   :  { %v203_v34 = vmul.f32 %v193_v32, %v5128_v33  ;;  %v281_v48 = vmul.f32 %v5197_v38, %v272_v39 }
 0x196   :  { %v226_v35 = vsub.f32 1.5, %v225_v31 }
 0x197   :  { %v4721_v37 = vpop.eup %4720  ;;  %v209_v40 = vadd.f32 1e-06, %v203_v34  ;;  %v290_v57 = vadd.f32 %v5203_v47, %v281_v48 }
 0x198   :  { %v227_v42 = vmul.f32 %v4719_v24, %v226_v35  ;;  %v233_v43 = vmul.f32 %v4721_v37, %v208_v26  ;;  %vm239_vm9 = vweird.f32 %v4721_v37 }
 0x199   :  { %4722 = vrsqrt.f32 %v209_v40  ;;  %vm240_vm11 = vmor %vm238_vm10, %vm239_vm9  ;;  %vm248_vm13 = vweird.f32 %v209_v40 }
 0x19a   :  { %v231_v44 = vsel %vm230_vm8, %v4719_v24, %v227_v42  ;;  %v234_v45 = vmul.f32 %v4721_v37, %v233_v43 }
 0x19b   :  { %v273_v49 = vmul.f32 %v231_v44, %v5139_v41 }
 0x19c   :  { %v235_v50 = vmul.f32 0.5, %v234_v45  ;;  %v196_v52 = vpop.xlane.xlu1 %195 }
 0x19d   :  { %v282_v36 = vmul.f32 %v5197_v38, %v273_v49  ;;  %v204_v53 = vmul.f32 %v196_v52, %v5128_v33 }
 0x19e   :  { %v236_v54 = vsub.f32 1.5, %v235_v50 }
 0x19f   :  { %v4723_v55 = vpop.eup %4722  ;;  %v291_v58 = vadd.f32 %v5203_v47, %v282_v36  ;;  %v210_v59 = vadd.f32 1e-06, %v204_v53  ;;  %v4679_v53 = vld [vmem:[%s6402_s4 + $0x4] ss:$0 sm:$0xff] }
 0x1a0   :  { %v237_v60 = vmul.f32 %v4721_v37, %v236_v54  ;;  %v243_v62 = vmul.f32 %v4723_v55, %v209_v40  ;;  %vm249_vm12 = vweird.f32 %v4723_v55 }
 0x1a1   :  { %v5211_v63 = vpack.c.bf16 %v291_v58, %v290_v57  ;;  %4724 = vrsqrt.f32 %v210_v59  ;;  %vm250_vm14 = vmor %vm248_vm13, %vm249_vm12  ;;  %vm258_vm2 = vweird.f32 %v210_v59  ;;  %vm907_vm12 = vcmask 1043456  }
 0x1a2   :  { %v244_v41 = vmul.f32 %v4723_v55, %v243_v62  ;;  %v241_v0 = vsel %vm240_vm11, %v4721_v37, %v237_v60 }
 0x1a3   :  { %4017 = vmatmul.msk.bf16.vlgmr.msra.gmra.mxu1 %vm138_vm1, %v5211_v63  ;;  %4033 = vmatmul.msk.bf16.vlgmr.msra.gmra.mxu2 %vm138_vm1, %v5211_v63  ;;  %v274_v9 = vmul.f32 %v241_v0, %v5146_v46 }
 0x1a4   :  { %v245_v1 = vmul.f32 0.5, %v244_v41  ;;  %4087 = vmatmul.msk.bf16.vlgmr.msrb.gmra.mxu0 %vm138_vm1, %v5211_v63  ;;  %v199_v2 = vpop.xlane.xlu2 %198 }
 0x1a5   :  { %v205_v4 = vmul.f32 %v199_v2, %v5128_v33  ;;  %v283_v17 = vmul.f32 %v5197_v38, %v274_v9 }
 0x1a6   :  { %v246_v5 = vsub.f32 1.5, %v245_v1 }
 0x1a7   :  { %v4725_v7 = vpop.eup %4724  ;;  %v211_v10 = vadd.f32 1e-06, %v205_v4  ;;  %v292_v46 = vadd.f32 %v5203_v47, %v283_v17 }
 0x1a8   :  { %v247_v11 = vmul.f32 %v4723_v55, %v246_v5  ;;  %v253_v13 = vmul.f32 %v4725_v7, %v210_v59  ;;  %vm259_vm15 = vweird.f32 %v4725_v7 }
 0x1a9   :  { %4726 = vrsqrt.f32 %v211_v10  ;;  %vm260_vm3 = vmor %vm258_vm2, %vm259_vm15  ;;  %vm268_vm5 = vweird.f32 %v211_v10 }
 0x1aa   :  { %v251_v14 = vsel %vm250_vm14, %v4723_v55, %v247_v11  ;;  %v254_v15 = vmul.f32 %v4725_v7, %v253_v13  ;;  %v4677_v13 = vld [vmem:[%s6402_s4] ss:$0 sm:$0xff] }
 0x1ab   :  { %v275_v18 = vmul.f32 %v251_v14, %v5153_v51 }
 0x1ac   :  { %v255_v20 = vmul.f32 0.5, %v254_v15 }
 0x1ad   :  { %v284_v21 = vmul.f32 %v5197_v38, %v275_v18 }
 0x1ae   :  { %v256_v23 = vsub.f32 1.5, %v255_v20 }
 0x1af   :  { %v4727_v24 = vpop.eup %4726  ;;  %v293_v26 = vadd.f32 %v5203_v47, %v284_v21 }
 0x1b0   :  { %v257_v27 = vmul.f32 %v4725_v7, %v256_v23  ;;  %v263_v28 = vmul.f32 %v4727_v24, %v211_v10  ;;  %vm269_vm4 = vweird.f32 %v4727_v24 }
 0x1b1   :  { %v5232_v29 = vpack.c.bf16 %v293_v26, %v292_v46  ;;  %vm270_vm6 = vmor %vm268_vm5, %vm269_vm4  ;;  %v4610_v46 = vld [vmem:[%s6401_s3 + $0x98] sm:$0xff] }
 0x1b2   :  { %v264_v30 = vmul.f32 %v4727_v24, %v263_v28  ;;  %v261_v51 = vsel %vm260_vm3, %v4725_v7, %v257_v27 }
 0x1b3   :  { %4018 = vmatmul.msk.bf16.gmra.mxu1 %vm138_vm1, %v5232_v29  ;;  %4034 = vmatmul.msk.bf16.gmra.mxu2 %vm138_vm1, %v5232_v29  ;;  %v276_v34 = vmul.f32 %v261_v51, %v5160_v56  ;;  %v4606_v56 = vld [vmem:[%s6401_s3 + $0x18] sm:$0xff] }
 0x1b4   :  { %v265_v31 = vmul.f32 0.5, %v264_v30  ;;  %4088 = vmatmul.msk.bf16.gmra.mxu0 %vm138_vm1, %v5232_v29 }
 0x1b5   :  { %v285_v39 = vmul.f32 %v5197_v38, %v276_v34  ;;  %v4680_v34 = vld [vmem:[%s6402_s4 + $0x8] ss:$0 sm:$0xff] }
 0x1b6   :  { %v266_v32 = vsub.f32 1.5, %v265_v31  ;;  %v4609_v31 = vld [vmem:[%s6401_s3 + $0x90] sm:$0xff] }
 0x1b7   :  { %v294_v43 = vadd.f32 %v5203_v47, %v285_v39 }
 0x1b8   :  { %v267_v35 = vmul.f32 %v4727_v24, %v266_v32 }
 0x1ba   :  { %v271_v37 = vsel %vm270_vm6, %v4727_v24, %v267_v35 }
 0x1bb   :  { %v277_v40 = vmul.f32 %v271_v37, %v5167_v61  ;;  %v4605_v61 = vld [vmem:[%s6401_s3 + $0x10] sm:$0xff] }
 0x1bd   :  { %v286_v42 = vmul.f32 %v5197_v38, %v277_v40 }
 0x1bf   :  { %v295_v44 = vadd.f32 %v5203_v47, %v286_v42  ;;  %v4678_v42 = vld [vmem:[%s6402_s4 + $0x5] ss:$0 sm:$0xff] }
 0x1c1   :  { %v5246_v45 = vpack.c.bf16 %v295_v44, %v294_v43 }
 0x1c3   :  { %4019 = vmatmul.msk.bf16.vlgmr.msra.gmra.mxu3 %vm138_vm1, %v5246_v45  ;;  %4035 = vmatmul.msk.bf16.gmra.mxu2 %vm138_vm1, %v5246_v45 }
 0x1c4   :  { %4089 = vmatmul.msk.bf16.gmra.mxu0 %vm138_vm1, %v5246_v45  ;;  %630 = vmatpush.bf16.msra.mxu3 %v4606_v56 }
 0x1c8   :  { %631 = vmatpush.bf16.msra.mxu3 %v4605_v61 }
 0x1d3   :  { %4049 = vmatmul.msk.bf16.vlgmr.msrb.gmra.mxu3 %vm138_vm1, %v5211_v63 }
 0x1e3   :  { %4050 = vmatmul.msk.bf16.gmra.mxu3 %vm138_vm1, %v5232_v29 }
 0x1f3   :  { %4051 = vmatmul.msk.bf16.gmra.mxu3 %vm138_vm1, %v5246_v45 }
 0x203   :  { %4071 = vmatmul.msk.bf16.vlgmr.msra.gmra.mxu3 %vm138_vm1, %v5211_v63 }
 0x213   :  { %4072 = vmatmul.msk.bf16.gmra.mxu3 %vm138_vm1, %v5232_v29 }
 0x220   :  { %v337_v41 = vpop.f32.mrf.mxu1 }
 0x221   :  { %v5274_v36 = vpop.f32.mrf.mxu0  ;;  %v338_v18 = vadd.f32 %v4677_v13, %v337_v41 }
 0x223   :  { %4073 = vmatmul.msk.bf16.gmra.mxu3 %vm138_vm1, %v5246_v45 }
 0x226   :  { %v386_v38 = vpop.f32.mrf.mxu2 }
 0x227   :  { %v387_v6 = vadd.f32 %v4679_v53, %v386_v38 }
 0x228   :  { %v339_v7 = vpop.f32.mrf.mxu1 }
 0x229   :  { %v684_v3 = vpop.f32.mrf.mxu0  ;;  %v340_v15 = vadd.f32 %v4677_v13, %v339_v7 }
 0x22b   :  { %v352_v21 = vpack.c.bf16 %v340_v15, %v338_v18 }
 0x22e   :  { %v388_v47 = vpop.f32.mrf.mxu2 }
 0x22f   :  { %v389_v4 = vadd.f32 %v4679_v53, %v388_v47 }
 0x230   :  { %v342_v20 = vpop.f32.mrf.mxu1 }
 0x231   :  { %v401_v10 = vpack.c.bf16 %v389_v4, %v387_v6  ;;  %v687_v11 = vpop.f32.mrf.mxu0  ;;  %v343_v51 = vadd.f32 %v4677_v13, %v342_v20  ;;  %v125_v4 = vlaneseq }
 0x233   :  { %v464_v14 = vsel %vm453_vm7, %v401_v10, 0 }
 0x236   :  { %v391_v48 = vpop.f32.mrf.mxu2 }
 0x237   :  { %v392_v0 = vadd.f32 %v4679_v53, %v391_v48 }
 0x238   :  { %v344_v26 = vpop.f32.mrf.mxu1 }
 0x239   :  { %v689_v23 = vpop.f32.mrf.mxu0  ;;  %v345_v27 = vadd.f32 %v4677_v13, %v344_v26 }
 0x23b   :  { %v353_v32 = vpack.c.bf16 %v345_v27, %v343_v51 }
 0x23e   :  { %v393_v49 = vpop.f32.mrf.mxu2 }
 0x23f   :  { %v394_v60 = vadd.f32 %v4679_v53, %v393_v49 }
 0x241   :  { %v402_v2 = vpack.c.bf16 %v394_v60, %v392_v0  ;;  %v692_v28 = vpop.f32.mrf.mxu0  ;;  %v685_v0 = vadd.f32 %v4678_v42, %v684_v3  ;;  %v126_v3 = vand.u32 127, %v125_v4 }
 0x242   :  { %v693_v38 = vadd.f32 %v4678_v42, %v692_v28 }
 0x243   :  { %v467_v5 = vsel %vm453_vm7, %v402_v2, 0  ;;  %vm128_vm8 = vcmp.lt.s32.totalorder %v126_v3, 17  ;;  %vm131_vm9 = vcmp.ge.s32.totalorder %v126_v3, 24  ;;  %vm132_vm10 = vcmp.lt.s32.totalorder %v126_v3, 41 }
 0x244   :  { %vm133_vm11 = vmand %vm131_vm9, %vm132_vm10 }
 0x246   :  { %v5272_v50 = vpop.f32.mrf.mxu3  ;;  %v396_v52 = vpop.f32.mrf.mxu2 }
 0x247   :  { %v397_v57 = vadd.f32 %v4679_v53, %v396_v52  ;;  %v348_v52 = vadd.f32 %v4677_v13, %v5272_v50  ;;  %v683_v50 = vadd.f32 %v4678_v42, %v5274_v36 }
 0x249   :  { %v694_v40 = vpop.f32.mrf.mxu0  ;;  %v697_v2 = vpack.c.bf16 %v685_v0, %v683_v50 }
 0x24a   :  { %v695_v56 = vadd.f32 %v4678_v42, %v694_v40 }
 0x24e   :  { %v349_v54 = vpop.f32.mrf.mxu3  ;;  %v398_v55 = vpop.f32.mrf.mxu2 }
 0x24f   :  { %v399_v58 = vadd.f32 %v4679_v53, %v398_v55  ;;  %v350_v47 = vadd.f32 %v4677_v13, %v349_v54  ;;  %v699_v53 = vpack.c.bf16 %v695_v56, %v693_v38 }
 0x251   :  { %v403_v59 = vpack.c.bf16 %v399_v58, %v397_v57  ;;  %v354_v57 = vpack.c.bf16 %v350_v47, %v348_v52  ;;  %v765_v60 = vsel %vm453_vm7, %v699_v53, 0 }
 0x253   :  { %v470_v62 = vsel %vm453_vm7, %v403_v59, 0  ;;  %v690_v59 = vadd.f32 %v4678_v42, %v689_v23 }
 0x254   :  { %477 = vmatpush.bf16.xpose.msrb.mxu1 %v470_v62  ;;  %v688_v62 = vadd.f32 %v4678_v42, %v687_v11 }
 0x256   :  { %v435_v1 = vpop.f32.mrf.mxu3  ;;  %v698_v41 = vpack.c.bf16 %v690_v59, %v688_v62 }
 0x257   :  { %v436_v55 = vadd.f32 %v4680_v34, %v435_v1  ;;  %v759_v1 = vsel %vm453_vm7, %v697_v2, 0 }
 0x258   :  { %v762_v54 = vsel %vm453_vm7, %v698_v41, 0 }
 0x25c   :  { %478 = vmatpush.bf16.xpose.msrb.mxu1 %v467_v5  ;;  %v5007_v5 = vmov -1e+09  }
 0x25d   :  { %v5311_v6 = vsel %vm128_vm8, 0.0, %v5007_v5  ;;  %v5319_v18 = vsel %vm133_vm11, 0.0, %v5007_v5 }
 0x25e   :  { %v437_v9 = vpop.f32.mrf.mxu3 }
 0x25f   :  { %v438_v48 = vadd.f32 %v4680_v34, %v437_v9 }
 0x261   :  { %v450_v58 = vpack.c.bf16 %v438_v48, %v436_v55 }
 0x264   :  { %479 = vmatpush.bf16.xpose.msrb.mxu1 %v464_v14 }
 0x266   :  { %v440_v17 = vpop.f32.mrf.mxu3 }
 0x267   :  { %v441_v61 = vadd.f32 %v4680_v34, %v440_v17 }
 0x26b   :  { %4052 = vmatmul.msk.bf16.vlgmr.msrb.gmra.mxu1 %vm453_vm7, %v352_v21 }
 0x26c   :  { %728 = vmatpush.bf16.msra.mxu1 %v4610_v46 }
 0x26e   :  { %v442_v24 = vpop.f32.mrf.mxu3 }
 0x26f   :  { %v443_v43 = vadd.f32 %v4680_v34, %v442_v24 }
 0x270   :  { %729 = vmatpush.bf16.msra.mxu1 %v4609_v31 }
 0x271   :  { %v451_v49 = vpack.c.bf16 %v443_v43, %v441_v61 }
 0x276   :  { %v445_v30 = vpop.f32.mrf.mxu3 }
 0x277   :  { %v446_v37 = vadd.f32 %v4680_v34, %v445_v30 }
 0x27b   :  { %4053 = vmatmul.msk.bf16.gmra.mxu1 %vm453_vm7, %v353_v32 }
 0x27e   :  { %v447_v35 = vpop.f32.mrf.mxu3 }
 0x27f   :  { %v448_v39 = vadd.f32 %v4680_v34, %v447_v35 }
 0x281   :  { %v452_v44 = vpack.c.bf16 %v448_v39, %v446_v37  ;;  %v4682_v37 = vld [vmem:[%s6402_s4 + $0x9] ss:$0 sm:$0xff] }
 0x283   :  { %579 = vmatpush.bf16.msrb.mxu2 %v452_v44 }
 0x287   :  { %580 = vmatpush.bf16.msrb.mxu2 %v451_v49 }
 0x28b   :  { %4054 = vmatmul.msk.bf16.gmra.mxu1 %vm453_vm7, %v354_v57  ;;  %581 = vmatpush.bf16.msrb.mxu2 %v450_v58 }
 0x28f   :  { %772 = vmatpush.bf16.xpose.msra.mxu2 %v765_v60 }
 0x297   :  { %773 = vmatpush.bf16.xpose.msra.mxu2 %v762_v54 }
 0x29b   :  { %4103 = vmatmul.msk.bf16.vlgmr.msra.gmra.mxu1 %vm138_vm1, %v5211_v63 }
 0x29f   :  { %774 = vmatpush.bf16.xpose.msra.mxu2 %v759_v1 }
 0x2ab   :  { %4104 = vmatmul.msk.bf16.gmra.mxu1 %vm138_vm1, %v5232_v29 }
 0x2bb   :  { %4105 = vmatmul.msk.bf16.gmra.mxu1 %vm138_vm1, %v5246_v45 }
 0x2e8   :  { %v481_v36 = vpop.f32.mrf.mxu1 }
 0x2e9   :  { %v482_v7 = vadd.f32 %v481_v36, %v5311_v6 }
 0x2eb   :  { %v496_v9 = vsel %vm91_vm0, %v482_v7, -inf }
 0x2ec   :  { %497 = vmax.xlane.f32.xlu0 %v496_v9 }
 0x2f0   :  { %v483_v10 = vpop.f32.mrf.mxu1 }
 0x2f1   :  { %v484_v11 = vadd.f32 %v483_v10, %v5311_v6 }
 0x2f3   :  { %v499_v13 = vsel %vm91_vm0, %v484_v11, -inf }
 0x2f4   :  { %500 = vmax.xlane.f32.xlu1 %v499_v13 }
 0x2f8   :  { %v486_v14 = vpop.f32.mrf.mxu1 }
 0x2f9   :  { %v487_v15 = vadd.f32 %v486_v14, %v5311_v6 }
 0x2fb   :  { %v502_v17 = vsel %vm91_vm0, %v487_v15, -inf }
 0x2fc   :  { %503 = vmax.xlane.f32.xlu2 %v502_v17 }
 0x300   :  { %v488_v20 = vpop.f32.mrf.mxu1 }
 0x301   :  { %v489_v21 = vadd.f32 %v488_v20, %v5319_v18 }
 0x303   :  { %v505_v23 = vsel %vm91_vm0, %v489_v21, -inf }
 0x304   :  { %506 = vmax.xlane.f32.xlu0 %v505_v23 }
 0x308   :  { %v491_v24 = vpop.f32.mrf.mxu1 }
 0x309   :  { %v492_v46 = vadd.f32 %v491_v24, %v5319_v18 }
 0x30b   :  { %v508_v26 = vsel %vm91_vm0, %v492_v46, -inf }
 0x30c   :  { %509 = vmax.xlane.f32.xlu1 %v508_v26 }
 0x310   :  { %v493_v27 = vpop.f32.mrf.mxu1 }
 0x311   :  { %v494_v28 = vadd.f32 %v493_v27, %v5319_v18 }
 0x313   :  { %v511_v30 = vsel %vm91_vm0, %v494_v28, -inf }
 0x314   :  { %512 = vmax.xlane.f32.xlu2 %v511_v30 }
 0x318   :  { %v731_v51 = vpop.f32.mrf.mxu1 }
 0x319   :  { %v732_v47 = vadd.f32 %v4682_v37, %v731_v51 }
 0x320   :  { %v733_v31 = vpop.f32.mrf.mxu1 }
 0x321   :  { %v734_v61 = vadd.f32 %v4682_v37, %v733_v31 }
 0x323   :  { %v746_v48 = vpack.c.bf16 %v734_v61, %v732_v47 }
 0x328   :  { %v736_v32 = vpop.f32.mrf.mxu1 }
 0x329   :  { %v737_v56 = vadd.f32 %v4682_v37, %v736_v32 }
 0x330   :  { %v738_v34 = vpop.f32.mrf.mxu1 }
 0x331   :  { %v739_v43 = vadd.f32 %v4682_v37, %v738_v34 }
 0x333   :  { %v747_v38 = vpack.c.bf16 %v739_v43, %v737_v56 }
 0x338   :  { %v741_v35 = vpop.f32.mrf.mxu1 }
 0x339   :  { %v742_v40 = vadd.f32 %v4682_v37, %v741_v35 }
 0x340   :  { %v743_v39 = vpop.f32.mrf.mxu1 }
 0x341   :  { %v744_v42 = vadd.f32 %v4682_v37, %v743_v39 }
 0x343   :  { %v748_v44 = vpack.c.bf16 %v744_v42, %v742_v40 }
 0x345   :  { %874 = vmatpush.bf16.msrb.mxu3 %v748_v44  ;;  %v633_v44 = vpop.f32.mrf.mxu3 }
 0x349   :  { %875 = vmatpush.bf16.msrb.mxu3 %v747_v38 }
 0x34d   :  { %876 = vmatpush.bf16.msrb.mxu3 %v746_v48 }
 0x35f   :  { %v498_v49 = vpop.xlane.xlu0 %497 }
 0x360   :  { %v514_v52 = vsub.f32 %v482_v7, %v498_v49  ;;  %v635_v49 = vpop.f32.mrf.mxu3 }
 0x362   :  { %v520_v53 = vmul.f32 1.442695, %v514_v52  ;;  %v4681_v52 = vld [vmem:[%s6402_s4 + $0x1] ss:$0 sm:$0xff] }
 0x364   :  { %4728 = vpow2.f32 %v520_v53 }
 0x367   :  { %v501_v55 = vpop.xlane.xlu1 %500 }
 0x368   :  { %v515_v57 = vsub.f32 %v484_v11, %v501_v55  ;;  %v638_v53 = vpop.f32.mrf.mxu3  ;;  %v636_v55 = vadd.f32 %v4681_v52, %v635_v49 }
 0x36a   :  { %v4729_v58 = vpop.eup %4728  ;;  %v522_v59 = vmul.f32 1.442695, %v515_v57  ;;  %v634_v57 = vadd.f32 %v4681_v52, %v633_v44 }
 0x36b   :  { %v532_v60 = vsel %vm91_vm0, %v4729_v58, 0.0 }
 0x36c   :  { %4730 = vpow2.f32 %v522_v59  ;;  %533 = vadd.xlane.f32.xlu0 %v532_v60  ;;  %v4612_v59 = vld [vmem:[%s6401_s3 + $0x28] sm:$0xff]  ;;  %v4611_v60 = vld [vmem:[%s6401_s3 + $0x20] sm:$0xff] }
 0x36f   :  { %v504_v62 = vpop.xlane.xlu2 %503 }
 0x370   :  { %v516_v41 = vsub.f32 %v487_v15, %v504_v62  ;;  %v640_v62 = vpop.f32.mrf.mxu3 }
 0x372   :  { %v4731_v0 = vpop.eup %4730  ;;  %v524_v54 = vmul.f32 1.442695, %v516_v41  ;;  %v641_v41 = vadd.f32 %v4681_v52, %v640_v62 }
 0x373   :  { %v535_v50 = vsel %vm91_vm0, %v4731_v0, 0.0 }
 0x374   :  { %4732 = vpow2.f32 %v524_v54  ;;  %536 = vadd.xlane.f32.xlu1 %v535_v50 }
 0x377   :  { %v507_v2 = vpop.xlane.xlu0 %506 }
 0x378   :  { %v517_v1 = vsub.f32 %v489_v21, %v507_v2  ;;  %v643_v54 = vpop.f32.mrf.mxu3 }
 0x37a   :  { %v4733_v4 = vpop.eup %4732  ;;  %v526_v3 = vmul.f32 1.442695, %v517_v1 }
 0x37b   :  { %v538_v5 = vsel %vm91_vm0, %v4733_v4, 0.0 }
 0x37c   :  { %4734 = vpow2.f32 %v526_v3  ;;  %539 = vadd.xlane.f32.xlu2 %v538_v5  ;;  %v601_v5 = vld [vmem:[%s6403_s5] sm:$0xf] }
 0x37f   :  { %v510_v36 = vpop.xlane.xlu1 %509 }
 0x380   :  { %v518_v7 = vsub.f32 %v492_v46, %v510_v36  ;;  %v645_v2 = vpop.f32.mrf.mxu3  ;;  %v5359_v36 = vsel %vm907_vm12, %v601_v5, 0 }
 0x381   :  { %v646_v1 = vadd.f32 %v4681_v52, %v645_v2  ;;  %4671 = vmatpush.bf16.msrb.mxu1 %v5359_v36 }
 0x382   :  { %v4735_v9 = vpop.eup %4734  ;;  %v528_v10 = vmul.f32 1.442695, %v518_v7 }
 0x383   :  { %v541_v11 = vsel %vm91_vm0, %v4735_v9, 0.0 }
 0x384   :  { %4736 = vpow2.f32 %v528_v10  ;;  %542 = vadd.xlane.f32.xlu0 %v541_v11 }
 0x387   :  { %v513_v13 = vpop.xlane.xlu2 %512 }
 0x388   :  { %v519_v14 = vsub.f32 %v494_v28, %v513_v13 }
 0x38a   :  { %v4737_v15 = vpop.eup %4736  ;;  %v530_v17 = vmul.f32 1.442695, %v519_v14 }
 0x38b   :  { %v544_v20 = vsel %vm91_vm0, %v4737_v15, 0.0 }
 0x38c   :  { %4738 = vpow2.f32 %v530_v17  ;;  %545 = vadd.xlane.f32.xlu1 %v544_v20 }
 0x392   :  { %v4739_v21 = vpop.eup %4738 }
 0x393   :  { %v547_v23 = vsel %vm91_vm0, %v4739_v21, 0.0 }
 0x394   :  { %548 = vadd.xlane.f32.xlu2 %v547_v23 }
 0x3df   :  { %v534_v24 = vpop.xlane.xlu0 %533 }
 0x3e0   :  { %4740 = vrcp.f32 %v534_v24 }
 0x3e6   :  { %v4741_v26 = vpop.eup %4740 }
 0x3e7   :  { %v537_v46 = vpop.xlane.xlu1 %536  ;;  %v556_v30 = vmul.f32 %v4741_v26, %v4729_v58  ;;  %v648_v58 = vpack.c.bf16 %v636_v55, %v634_v57 }
 0x3e8   :  { %4742 = vrcp.f32 %v537_v46 }
 0x3ee   :  { %v4743_v27 = vpop.eup %4742 }
 0x3ef   :  { %v557_v51 = vmul.f32 %v4743_v27, %v4731_v0  ;;  %v540_v28 = vpop.xlane.xlu2 %539  ;;  %v639_v0 = vadd.f32 %v4681_v52, %v638_v53 }
 0x3f0   :  { %4744 = vrcp.f32 %v540_v28 }
 0x3f1   :  { %v562_v31 = vpack.c.bf16 %v557_v51, %v556_v30  ;;  %v649_v50 = vpack.c.bf16 %v641_v41, %v639_v0 }
 0x3f3   :  { %4055 = vmatmul.msk.bf16.vlgmr.msrb.gmra.mxu2 %vm91_vm0, %v562_v31 }
 0x3f4   :  { %999 = vmatpush.bf16.msrb.mxu2 %v4612_v59 }
 0x3f6   :  { %v4745_v34 = vpop.eup %4744 }
 0x3f7   :  { %v543_v32 = vpop.xlane.xlu0 %542  ;;  %v558_v37 = vmul.f32 %v4745_v34, %v4733_v4  ;;  %v644_v4 = vadd.f32 %v4681_v52, %v643_v54 }
 0x3f8   :  { %4746 = vrcp.f32 %v543_v32  ;;  %1000 = vmatpush.bf16.msrb.mxu2 %v4611_v60 }
 0x3f9   :  { %v650_v3 = vpack.c.bf16 %v646_v1, %v644_v4 }
 0x3fe   :  { %v4747_v35 = vpop.eup %4746 }
 0x3ff   :  { %v559_v39 = vmul.f32 %v4747_v35, %v4735_v9  ;;  %v546_v42 = vpop.xlane.xlu1 %545 }
 0x400   :  { %4748 = vrcp.f32 %v546_v42 }
 0x401   :  { %v563_v40 = vpack.c.bf16 %v559_v39, %v558_v37 }
 0x403   :  { %4056 = vmatmul.msk.bf16.gmra.mxu2 %vm91_vm0, %v563_v40 }
 0x406   :  { %v4749_v56 = vpop.eup %4748 }
 0x407   :  { %v549_v43 = vpop.xlane.xlu2 %548  ;;  %v560_v38 = vmul.f32 %v4749_v56, %v4737_v15 }
 0x408   :  { %4750 = vrcp.f32 %v549_v43 }
 0x40e   :  { %v4751_v61 = vpop.eup %4750 }
 0x40f   :  { %v561_v47 = vmul.f32 %v4751_v61, %v4739_v21 }
 0x411   :  { %v564_v48 = vpack.c.bf16 %v561_v47, %v560_v38 }
 0x413   :  { %4057 = vmatmul.msk.bf16.gmra.mxu2 %vm91_vm0, %v564_v48 }
 0x423   :  { %4106 = vmatmul.msk.bf16.vlgmr.msra.gmra.mxu2 %vm453_vm7, %v648_v58 }
 0x433   :  { %4107 = vmatmul.msk.bf16.gmra.mxu2 %vm453_vm7, %v649_v50 }
 0x443   :  { %4108 = vmatmul.msk.bf16.gmra.mxu2 %vm453_vm7, %v650_v3 }
 0x453   :  { %4132 = vmatmul.msk.bf16.vlgmr.msrb.gmra.mxu2 %vm138_vm1, %v5211_v63 }
 0x463   :  { %4133 = vmatmul.msk.bf16.gmra.mxu2 %vm138_vm1, %v5232_v29 }
 0x473   :  { %4134 = vmatmul.msk.bf16.gmra.mxu2 %vm138_vm1, %v5246_v45 }
 0x476   :  { %v5364_v7 = vpop.f32.mrf.mxu2 }
 0x47e   :  { %v5366_v9 = vpop.f32.mrf.mxu2 }
 0x486   :  { %v588_v10 = vpop.f32.mrf.mxu2 }
 0x48e   :  { %v590_v11 = vpop.f32.mrf.mxu2 }
 0x48f   :  { %v599_v13 = vpack.c.bf16 %v590_v11, %v588_v10 }
 0x491   :  { %4117 = vmatmul.msk.bf16.vlgmr.msrb.gmra.mxu1 %vm453_vm7, %v599_v13 }
 0x496   :  { %v593_v14 = vpop.f32.mrf.mxu2 }
 0x49e   :  { %v595_v15 = vpop.f32.mrf.mxu2 }
 0x49f   :  { %v600_v17 = vpack.c.bf16 %v595_v15, %v593_v14 }
 0x4a1   :  { %4118 = vmatmul.msk.bf16.gmra.mxu1 %vm453_vm7, %v600_v17 }
 0x4a6   :  { %v776_v20 = vpop.f32.mrf.mxu2 }
 0x4a7   :  { %v777_v21 = vadd.f32 %v776_v20, %v5311_v6 }
 0x4a9   :  { %v791_v23 = vsel %vm91_vm0, %v777_v21, -inf }
 0x4aa   :  { %792 = vmax.xlane.f32.xlu0 %v791_v23 }
 0x4ae   :  { %v778_v24 = vpop.f32.mrf.mxu2 }
 0x4af   :  { %v779_v46 = vadd.f32 %v778_v24, %v5311_v6 }
 0x4b1   :  { %v794_v26 = vsel %vm91_vm0, %v779_v46, -inf }
 0x4b2   :  { %795 = vmax.xlane.f32.xlu1 %v794_v26 }
 0x4b6   :  { %v781_v27 = vpop.f32.mrf.mxu2 }
 0x4b7   :  { %v782_v30 = vadd.f32 %v781_v27, %v5311_v6 }
 0x4b9   :  { %v797_v51 = vsel %vm91_vm0, %v782_v30, -inf }
 0x4ba   :  { %798 = vmax.xlane.f32.xlu2 %v797_v51  ;;  %v4613_v51 = vld [vmem:[%s6401_s3 + $0x60] sm:$0xff] }
 0x4be   :  { %v783_v31 = vpop.f32.mrf.mxu2 }
 0x4bf   :  { %v784_v28 = vadd.f32 %v783_v31, %v5319_v18 }
 0x4c1   :  { %v800_v32 = vsel %vm91_vm0, %v784_v28, -inf }
 0x4c2   :  { %801 = vmax.xlane.f32.xlu0 %v800_v32 }
 0x4c6   :  { %v786_v34 = vpop.f32.mrf.mxu2 }
 0x4c7   :  { %v787_v35 = vadd.f32 %v786_v34, %v5319_v18 }
 0x4c9   :  { %v803_v37 = vsel %vm91_vm0, %v787_v35, -inf }
 0x4ca   :  { %804 = vmax.xlane.f32.xlu1 %v803_v37 }
 0x4ce   :  { %v788_v39 = vpop.f32.mrf.mxu2 }
 0x4cf   :  { %v789_v40 = vadd.f32 %v788_v39, %v5319_v18 }
 0x4d1   :  { %v806_v42 = vsel %vm91_vm0, %v789_v40, -inf }
 0x4d2   :  { %807 = vmax.xlane.f32.xlu2 %v806_v42 }
 0x51d   :  { %v793_v43 = vpop.xlane.xlu0 %792 }
 0x51e   :  { %v809_v44 = vsub.f32 %v777_v21, %v793_v43  ;;  %v4614_v21 = vld [vmem:[%s6401_s3 + $0x68] sm:$0xff] }
 0x51f   :  { %1048 = vmatpush.bf16.msra.mxu3 %v4614_v21 }
 0x520   :  { %v815_v56 = vmul.f32 1.442695, %v809_v44 }
 0x522   :  { %4752 = vpow2.f32 %v815_v56 }
 0x523   :  { %1049 = vmatpush.bf16.msra.mxu3 %v4613_v51 }
 0x525   :  { %v796_v61 = vpop.xlane.xlu1 %795 }
 0x526   :  { %v810_v38 = vsub.f32 %v779_v46, %v796_v61 }
 0x528   :  { %v4753_v47 = vpop.eup %4752  ;;  %v817_v48 = vmul.f32 1.442695, %v810_v38  ;;  %v4112_v38 = vld [vmem:[%s6403_s5 + $0x4] sm:$0xf] }
 0x529   :  { %v827_v49 = vsel %vm91_vm0, %v4753_v47, 0.0 }
 0x52a   :  { %4754 = vpow2.f32 %v817_v48  ;;  %828 = vadd.xlane.f32.xlu0 %v827_v49 }
 0x52d   :  { %v799_v52 = vpop.xlane.xlu2 %798 }
 0x52e   :  { %v811_v53 = vsub.f32 %v782_v30, %v799_v52 }
 0x530   :  { %v4755_v55 = vpop.eup %4754  ;;  %v819_v57 = vmul.f32 1.442695, %v811_v53 }
 0x531   :  { %v830_v58 = vsel %vm91_vm0, %v4755_v55, 0.0 }
 0x532   :  { %4756 = vpow2.f32 %v819_v57  ;;  %831 = vadd.xlane.f32.xlu1 %v830_v58 }
 0x535   :  { %v802_v59 = vpop.xlane.xlu0 %801 }
 0x536   :  { %v812_v60 = vsub.f32 %v784_v28, %v802_v59  ;;  %v4616_v59 = vld [vmem:[%s6401_s3 + $0xa8] sm:$0xff] }
 0x538   :  { %v4757_v62 = vpop.eup %4756  ;;  %v821_v41 = vmul.f32 1.442695, %v812_v60 }
 0x539   :  { %v833_v0 = vsel %vm91_vm0, %v4757_v62, 0.0 }
 0x53a   :  { %4758 = vpow2.f32 %v821_v41  ;;  %834 = vadd.xlane.f32.xlu2 %v833_v0 }
 0x53d   :  { %v805_v54 = vpop.xlane.xlu1 %804 }
 0x53e   :  { %v813_v50 = vsub.f32 %v787_v35, %v805_v54  ;;  %v598_v54 = vpack.c.bf16 %v5366_v9, %v5364_v7  ;;  %v4684_v7 = vld [vmem:[%s6402_s4 + $0x6] ss:$0 sm:$0xff] }
 0x540   :  { %v4759_v2 = vpop.eup %4758  ;;  %v823_v1 = vmul.f32 1.442695, %v813_v50 }
 0x541   :  { %v836_v4 = vsel %vm91_vm0, %v4759_v2, 0.0 }
 0x542   :  { %4760 = vpow2.f32 %v823_v1  ;;  %837 = vadd.xlane.f32.xlu0 %v836_v4  ;;  %v4618_v1 = vld [vmem:[%s6401_s3 + $0x38] sm:$0xff] }
 0x545   :  { %v808_v3 = vpop.xlane.xlu2 %807 }
 0x546   :  { %v814_v5 = vsub.f32 %v789_v40, %v808_v3  ;;  %v4617_v3 = vld [vmem:[%s6401_s3 + $0x30] sm:$0xff] }
 0x548   :  { %v4761_v10 = vpop.eup %4760  ;;  %v825_v11 = vmul.f32 1.442695, %v814_v5 }
 0x549   :  { %v839_v13 = vsel %vm91_vm0, %v4761_v10, 0.0 }
 0x54a   :  { %4762 = vpow2.f32 %v825_v11  ;;  %840 = vadd.xlane.f32.xlu1 %v839_v13  ;;  %v1002_v11 = vpop.f32.mrf.mxu2 }
 0x550   :  { %v4763_v14 = vpop.eup %4762 }
 0x551   :  { %v842_v15 = vsel %vm91_vm0, %v4763_v14, 0.0 }
 0x552   :  { %843 = vadd.xlane.f32.xlu2 %v842_v15  ;;  %v1004_v21 = vpop.f32.mrf.mxu2 }
 0x55a   :  { %v1007_v51 = vpop.f32.mrf.mxu2 }
 0x59d   :  { %v829_v17 = vpop.xlane.xlu0 %828 }
 0x59e   :  { %4764 = vrcp.f32 %v829_v17 }
 0x5a4   :  { %v4765_v23 = vpop.eup %4764 }
 0x5a5   :  { %v832_v20 = vpop.xlane.xlu1 %831  ;;  %v851_v46 = vmul.f32 %v4765_v23, %v4753_v47  ;;  %v909_v47 = vsel %vm907_vm12, %v4112_v38, 0 }
 0x5a6   :  { %4766 = vrcp.f32 %v832_v20  ;;  %918 = vmatpush.bf16.msra.mxu0 %v909_v47 }
 0x5aa   :  { %954 = vmatpush.bf16.msrb.mxu0 %v5359_v36  ;;  %v4615_v36 = vld [vmem:[%s6401_s3 + $0xa0] sm:$0xff] }
 0x5ac   :  { %v4767_v24 = vpop.eup %4766 }
 0x5ad   :  { %v852_v26 = vmul.f32 %v4767_v24, %v4755_v55  ;;  %v835_v30 = vpop.xlane.xlu2 %834 }
 0x5ae   :  { %4768 = vrcp.f32 %v835_v30 }
 0x5af   :  { %v857_v27 = vpack.c.bf16 %v852_v26, %v851_v46 }
 0x5b1   :  { %4109 = vmatmul.msk.bf16.vlgmr.msrb.gmra.mxu3 %vm91_vm0, %v857_v27  ;;  %v4683_v27 = vld [vmem:[%s6402_s4 + $0x2] ss:$0 sm:$0xff] }
 0x5b4   :  { %v4769_v28 = vpop.eup %4768 }
 0x5b5   :  { %v838_v31 = vpop.xlane.xlu0 %837  ;;  %v853_v34 = vmul.f32 %v4769_v28, %v4757_v62  ;;  %v1003_v28 = vadd.f32 %v4683_v27, %v1002_v11 }
 0x5b6   :  { %4770 = vrcp.f32 %v838_v31  ;;  %v1005_v31 = vadd.f32 %v4683_v27, %v1004_v21 }
 0x5bc   :  { %v4771_v32 = vpop.eup %4770 }
 0x5bd   :  { %v854_v35 = vmul.f32 %v4771_v32, %v4759_v2  ;;  %v841_v39 = vpop.xlane.xlu1 %840  ;;  %v1017_v32 = vpack.c.bf16 %v1005_v31, %v1003_v28 }
 0x5be   :  { %4772 = vrcp.f32 %v841_v39  ;;  %v1008_v39 = vadd.f32 %v4683_v27, %v1007_v51 }
 0x5bf   :  { %v858_v37 = vpack.c.bf16 %v854_v35, %v853_v34  ;;  %v1009_v34 = vpop.f32.mrf.mxu2  ;;  %v4620_v35 = vld [vmem:[%s6401_s3 + $0x78] sm:$0xff] }
 0x5c1   :  { %4110 = vmatmul.msk.bf16.gmra.mxu3 %vm91_vm0, %v858_v37  ;;  %v1010_v37 = vadd.f32 %v4683_v27, %v1009_v34 }
 0x5c4   :  { %v4773_v42 = vpop.eup %4772 }
 0x5c5   :  { %v844_v40 = vpop.xlane.xlu2 %843  ;;  %v855_v44 = vmul.f32 %v4773_v42, %v4761_v10 }
 0x5c6   :  { %4774 = vrcp.f32 %v844_v40  ;;  %v4619_v40 = vld [vmem:[%s6401_s3 + $0x70] sm:$0xff] }
 0x5c7   :  { %v1012_v42 = vpop.f32.mrf.mxu2 }
 0x5c8   :  { %v1013_v47 = vadd.f32 %v4683_v27, %v1012_v42 }
 0x5cc   :  { %v4775_v43 = vpop.eup %4774 }
 0x5cd   :  { %v856_v56 = vmul.f32 %v4775_v43, %v4763_v14  ;;  %v1018_v43 = vpack.c.bf16 %v1010_v37, %v1008_v39 }
 0x5cf   :  { %v859_v61 = vpack.c.bf16 %v856_v56, %v855_v44  ;;  %v1014_v56 = vpop.f32.mrf.mxu2 }
 0x5d1   :  { %4111 = vmatmul.msk.bf16.gmra.mxu3 %vm91_vm0, %v859_v61  ;;  %v1015_v61 = vadd.f32 %v4683_v27, %v1014_v56  ;;  %v4173_v56 = vld [vmem:[%s6403_s5 + $0x8] sm:$0xf] }
 0x5e1   :  { %4148 = vmatmul.msk.bf16.vlgmr.msra.gmra.mxu3 %vm138_vm1, %v5211_v63 }
 0x5f1   :  { %4149 = vmatmul.msk.bf16.gmra.mxu3 %vm138_vm1, %v5232_v29 }
 0x601   :  { %4150 = vmatmul.msk.bf16.gmra.mxu3 %vm138_vm1, %v5246_v45 }
 0x634   :  { %v878_v48 = vpop.f32.mrf.mxu3 }
 0x63c   :  { %v880_v49 = vpop.f32.mrf.mxu3 }
 0x63d   :  { %v893_v52 = vpack.c.bf16 %v880_v49, %v878_v48  ;;  %v1019_v48 = vpack.c.bf16 %v1015_v61, %v1013_v47  ;;  %v1277_v61 = vsel %vm907_vm12, %v4173_v56, 0 }
 0x63e   :  { %1286 = vmatpush.bf16.msrb.mxu3 %v1277_v61 }
 0x63f   :  { %4113 = vmatmul.msk.bf16.vlgmr.msra.gmra.mxu0 %vm453_vm7, %v893_v52 }
 0x640   :  { %1097 = vmatpush.bf16.msra.mxu0 %v4616_v59 }
 0x644   :  { %v883_v53 = vpop.f32.mrf.mxu3  ;;  %1098 = vmatpush.bf16.msra.mxu0 %v4615_v36 }
 0x64c   :  { %v885_v55 = vpop.f32.mrf.mxu3 }
 0x64d   :  { %v894_v57 = vpack.c.bf16 %v885_v55, %v883_v53 }
 0x64f   :  { %4114 = vmatmul.msk.bf16.gmra.mxu0 %vm453_vm7, %v894_v57 }
 0x654   :  { %v888_v58 = vpop.f32.mrf.mxu3 }
 0x65c   :  { %v890_v60 = vpop.f32.mrf.mxu3 }
 0x65d   :  { %v895_v62 = vpack.c.bf16 %v890_v60, %v888_v58  ;;  %v5476_v60 = vpop.f32.mrf.mxu1 }
 0x65f   :  { %4115 = vmatmul.msk.bf16.gmra.mxu0 %vm453_vm7, %v895_v62 }
 0x664   :  { %v1051_v41 = vpop.f32.mrf.mxu3 }
 0x665   :  { %v1052_v46 = vadd.f32 %v4684_v7, %v1051_v41  ;;  %v5478_v41 = vpop.f32.mrf.mxu1 }
 0x66c   :  { %v1053_v0 = vpop.f32.mrf.mxu3 }
 0x66d   :  { %v1054_v23 = vadd.f32 %v4684_v7, %v1053_v0 }
 0x66f   :  { %4116 = vmatmul.msk.bf16.vlgmr.msrb.gmra.mxu0 %vm453_vm7, %v598_v54  ;;  %v1066_v26 = vpack.c.bf16 %v1054_v23, %v1052_v46  ;;  %v5480_v54 = vpop.f32.mrf.mxu1 }
 0x670   :  { %1337 = vmatpush.bf16.msrb.mxu0 %v4618_v1 }
 0x671   :  { %v1128_v30 = vsel %vm453_vm7, %v1066_v26, 0 }
 0x674   :  { %v1056_v50 = vpop.f32.mrf.mxu3  ;;  %1338 = vmatpush.bf16.msrb.mxu0 %v4617_v3 }
 0x675   :  { %v1057_v17 = vadd.f32 %v4684_v7, %v1056_v50 }
 0x677   :  { %v5482_v1 = vpop.f32.mrf.mxu1 }
 0x67c   :  { %v1058_v2 = vpop.f32.mrf.mxu3 }
 0x67d   :  { %v1059_v14 = vadd.f32 %v4684_v7, %v1058_v2 }
 0x67f   :  { %4164 = vmatmul.msk.bf16.vlgmr.msra.gmra.mxu0 %vm138_vm1, %v5211_v63  ;;  %v1067_v20 = vpack.c.bf16 %v1059_v14, %v1057_v17 }
 0x681   :  { %v1131_v24 = vsel %vm453_vm7, %v1067_v20, 0 }
 0x684   :  { %v1061_v4 = vpop.f32.mrf.mxu3 }
 0x685   :  { %v1062_v5 = vadd.f32 %v4684_v7, %v1061_v4  ;;  %v4685_v4 = vld [vmem:[%s6402_s4 + $0xa] ss:$0 sm:$0xff] }
 0x68c   :  { %v1063_v9 = vpop.f32.mrf.mxu3 }
 0x68d   :  { %v1064_v10 = vadd.f32 %v4684_v7, %v1063_v9 }
 0x68f   :  { %v1068_v13 = vpack.c.bf16 %v1064_v10, %v1062_v5  ;;  %4165 = vmatmul.msk.bf16.gmra.mxu0 %vm138_vm1, %v5232_v29 }
 0x691   :  { %v1134_v15 = vsel %vm453_vm7, %v1068_v13, 0 }
 0x692   :  { %1141 = vmatpush.bf16.xpose.msra.mxu1 %v1134_v15 }
 0x69a   :  { %1142 = vmatpush.bf16.xpose.msra.mxu1 %v1131_v24 }
 0x69f   :  { %4166 = vmatmul.msk.bf16.gmra.mxu0 %vm138_vm1, %v5246_v45 }
 0x6a2   :  { %1143 = vmatpush.bf16.xpose.msra.mxu1 %v1128_v30 }
 0x6a9   :  { %4167 = vmatmul.msk.bf16.vlgmr.msra.gmra.mxu1 %vm453_vm7, %v1017_v32 }
 0x6aa   :  { %1386 = vmatpush.bf16.msrb.mxu1 %v4620_v35 }
 0x6ae   :  { %1387 = vmatpush.bf16.msrb.mxu1 %v4619_v40 }
 0x6af   :  { %4190 = vmatmul.msk.bf16.vlgmr.msrb.gmra.mxu0 %vm138_vm1, %v5211_v63 }
 0x6b9   :  { %4168 = vmatmul.msk.bf16.gmra.mxu1 %vm453_vm7, %v1018_v43 }
 0x6bc   :  { %v920_v44 = vpop.f32.mrf.mxu0 }
 0x6bf   :  { %4191 = vmatmul.msk.bf16.gmra.mxu0 %vm138_vm1, %v5232_v29 }
 0x6c4   :  { %v5453_v38 = vpop.f32.mrf.mxu0 }
 0x6c9   :  { %4169 = vmatmul.msk.bf16.gmra.mxu1 %vm453_vm7, %v1019_v48 }
 0x6cc   :  { %v5456_v49 = vpop.f32.mrf.mxu0 }
 0x6cf   :  { %4192 = vmatmul.msk.bf16.gmra.mxu0 %vm138_vm1, %v5246_v45 }
 0x6d4   :  { %v5460_v52 = vpop.f32.mrf.mxu0 }
 0x6d9   :  { %4206 = vmatmul.msk.bf16.vlgmr.msrb.gmra.mxu1 %vm138_vm1, %v5211_v63 }
 0x6dc   :  { %v5464_v53 = vpop.f32.mrf.mxu0 }
 0x6e4   :  { %v5466_v55 = vpop.f32.mrf.mxu0 }
 0x6e9   :  { %4207 = vmatmul.msk.bf16.gmra.mxu1 %vm138_vm1, %v5232_v29 }
 0x6ec   :  { %v956_v57 = vpop.f32.mrf.mxu0 }
 0x6ed   :  { %v5470_v58 = vadd.f32 %v956_v57, %v920_v44 }
 0x6f4   :  { %v5472_v59 = vpop.f32.mrf.mxu0 }
 0x6f9   :  { %4208 = vmatmul.msk.bf16.gmra.mxu1 %vm138_vm1, %v5246_v45 }
 0x6fc   :  { %v1100_v36 = vpop.f32.mrf.mxu0 }
 0x6fd   :  { %v1101_v21 = vadd.f32 %v4685_v4, %v1100_v36  ;;  %v4687_v36 = vld [vmem:[%s6402_s4 + $0x7] ss:$0 sm:$0xff] }
 0x704   :  { %v1102_v62 = vpop.f32.mrf.mxu0 }
 0x705   :  { %v1103_v17 = vadd.f32 %v4685_v4, %v1102_v62 }
 0x707   :  { %v1115_v24 = vpack.c.bf16 %v1103_v17, %v1101_v21 }
 0x70c   :  { %v1105_v0 = vpop.f32.mrf.mxu0 }
 0x70d   :  { %v1106_v14 = vadd.f32 %v4685_v4, %v1105_v0 }
 0x714   :  { %v1107_v50 = vpop.f32.mrf.mxu0 }
 0x715   :  { %v1108_v10 = vadd.f32 %v4685_v4, %v1107_v50 }
 0x717   :  { %v1116_v20 = vpack.c.bf16 %v1108_v10, %v1106_v14 }
 0x71c   :  { %v1110_v2 = vpop.f32.mrf.mxu0 }
 0x71d   :  { %v1111_v7 = vadd.f32 %v4685_v4, %v1110_v2 }
 0x724   :  { %v1112_v3 = vpop.f32.mrf.mxu0 }
 0x725   :  { %v1113_v9 = vadd.f32 %v4685_v4, %v1112_v3 }
 0x726   :  { %v1145_v5 = vpop.f32.mrf.mxu1 }
 0x727   :  { %v1117_v11 = vpack.c.bf16 %v1113_v9, %v1111_v7  ;;  %v1146_v13 = vadd.f32 %v1145_v5, %v5311_v6 }
 0x729   :  { %1243 = vmatpush.bf16.msra.mxu2 %v1117_v11  ;;  %v1160_v15 = vsel %vm91_vm0, %v1146_v13, -inf }
 0x72a   :  { %1161 = vmax.xlane.f32.xlu0 %v1160_v15 }
 0x72d   :  { %1244 = vmatpush.bf16.msra.mxu2 %v1116_v20 }
 0x72e   :  { %v1147_v23 = vpop.f32.mrf.mxu1 }
 0x72f   :  { %v1148_v46 = vadd.f32 %v1147_v23, %v5311_v6 }
 0x731   :  { %1245 = vmatpush.bf16.msra.mxu2 %v1115_v24  ;;  %v1163_v26 = vsel %vm91_vm0, %v1148_v46, -inf }
 0x732   :  { %1164 = vmax.xlane.f32.xlu1 %v1163_v26 }
 0x736   :  { %v1150_v27 = vpop.f32.mrf.mxu1 }
 0x737   :  { %v1151_v30 = vadd.f32 %v1150_v27, %v5311_v6 }
 0x739   :  { %v1166_v51 = vsel %vm91_vm0, %v1151_v30, -inf }
 0x73a   :  { %1167 = vmax.xlane.f32.xlu2 %v1166_v51 }
 0x73e   :  { %v1152_v31 = vpop.f32.mrf.mxu1 }
 0x73f   :  { %v1153_v28 = vadd.f32 %v1152_v31, %v5319_v18 }
 0x741   :  { %v1169_v32 = vsel %vm91_vm0, %v1153_v28, -inf }
 0x742   :  { %1170 = vmax.xlane.f32.xlu0 %v1169_v32 }
 0x746   :  { %v1155_v34 = vpop.f32.mrf.mxu1 }
 0x747   :  { %v1156_v35 = vadd.f32 %v1155_v34, %v5319_v18 }
 0x749   :  { %v1172_v37 = vsel %vm91_vm0, %v1156_v35, -inf }
 0x74a   :  { %1173 = vmax.xlane.f32.xlu1 %v1172_v37 }
 0x74e   :  { %v1157_v39 = vpop.f32.mrf.mxu1 }
 0x74f   :  { %v5498_v40 = vadd.f32 %v1157_v39, %v5319_v18 }
 0x751   :  { %v1175_v42 = vsel %vm91_vm0, %v5498_v40, -inf }
 0x752   :  { %1176 = vmax.xlane.f32.xlu2 %v1175_v42 }
 0x756   :  { %v1389_v43 = vpop.f32.mrf.mxu1 }
 0x757   :  { %v1390_v11 = vadd.f32 %v4687_v36, %v1389_v43 }
 0x75e   :  { %v1391_v44 = vpop.f32.mrf.mxu1 }
 0x75f   :  { %v1392_v5 = vadd.f32 %v4687_v36, %v1391_v44 }
 0x761   :  { %v1404_v14 = vpack.c.bf16 %v1392_v5, %v1390_v11  ;;  %v4622_v11 = vld [vmem:[%s6401_s3 + $0xb8] sm:$0xff] }
 0x762   :  { %1435 = vmatpush.bf16.msrb.mxu2 %v4622_v11  ;;  %v4688_v11 = vld [vmem:[%s6402_s4 + $0xb] ss:$0 sm:$0xff] }
 0x763   :  { %v1466_v15 = vsel %vm453_vm7, %v1404_v14, 0  ;;  %v4621_v14 = vld [vmem:[%s6401_s3 + $0xb0] sm:$0xff] }
 0x766   :  { %v1394_v47 = vpop.f32.mrf.mxu1  ;;  %1436 = vmatpush.bf16.msrb.mxu2 %v4621_v14 }
 0x767   :  { %v1395_v7 = vadd.f32 %v4687_v36, %v1394_v47 }
 0x76e   :  { %v1396_v48 = vpop.f32.mrf.mxu1 }
 0x76f   :  { %v1397_v4 = vadd.f32 %v4687_v36, %v1396_v48 }
 0x771   :  { %v1405_v9 = vpack.c.bf16 %v1397_v4, %v1395_v7 }
 0x773   :  { %v1469_v10 = vsel %vm453_vm7, %v1405_v9, 0 }
 0x776   :  { %v1399_v57 = vpop.f32.mrf.mxu1 }
 0x777   :  { %v1400_v0 = vadd.f32 %v4687_v36, %v1399_v57 }
 0x77e   :  { %v1401_v62 = vpop.f32.mrf.mxu1 }
 0x77f   :  { %v1402_v50 = vadd.f32 %v4687_v36, %v1401_v62 }
 0x781   :  { %v1406_v2 = vpack.c.bf16 %v1402_v50, %v1400_v0 }
 0x783   :  { %v1472_v3 = vsel %vm453_vm7, %v1406_v2, 0 }
 0x784   :  { %1479 = vmatpush.bf16.xpose.msra.mxu3 %v1472_v3 }
 0x78c   :  { %1480 = vmatpush.bf16.xpose.msra.mxu3 %v1469_v10 }
 0x794   :  { %1481 = vmatpush.bf16.xpose.msra.mxu3 %v1466_v15 }
 0x79d   :  { %v1162_v17 = vpop.xlane.xlu0 %1161 }
 0x79e   :  { %v1178_v20 = vsub.f32 %v1146_v13, %v1162_v17 }
 0x7a0   :  { %v1184_v21 = vmul.f32 1.442695, %v1178_v20 }
 0x7a2   :  { %4776 = vpow2.f32 %v1184_v21 }
 0x7a5   :  { %v1165_v23 = vpop.xlane.xlu1 %1164 }
 0x7a6   :  { %v1179_v24 = vsub.f32 %v1148_v46, %v1165_v23 }
 0x7a8   :  { %v4777_v26 = vpop.eup %4776  ;;  %v1186_v27 = vmul.f32 1.442695, %v1179_v24 }
 0x7a9   :  { %v1196_v51 = vsel %vm91_vm0, %v4777_v26, 0.0 }
 0x7aa   :  { %4778 = vpow2.f32 %v1186_v27  ;;  %1197 = vadd.xlane.f32.xlu0 %v1196_v51 }
 0x7ad   :  { %v1168_v31 = vpop.xlane.xlu2 %1167 }
 0x7ae   :  { %v1180_v32 = vsub.f32 %v1151_v30, %v1168_v31 }
 0x7b0   :  { %v4779_v34 = vpop.eup %4778  ;;  %v1188_v37 = vmul.f32 1.442695, %v1180_v32 }
 0x7b1   :  { %v1199_v39 = vsel %vm91_vm0, %v4779_v34, 0.0 }
 0x7b2   :  { %4780 = vpow2.f32 %v1188_v37  ;;  %1200 = vadd.xlane.f32.xlu1 %v1199_v39 }
 0x7b5   :  { %v1171_v42 = vpop.xlane.xlu0 %1170 }
 0x7b6   :  { %v1181_v13 = vsub.f32 %v1153_v28, %v1171_v42 }
 0x7b8   :  { %v4781_v43 = vpop.eup %4780  ;;  %v1190_v44 = vmul.f32 1.442695, %v1181_v13 }
 0x7b9   :  { %v1202_v46 = vsel %vm91_vm0, %v4781_v43, 0.0 }
 0x7ba   :  { %4782 = vpow2.f32 %v1190_v44  ;;  %1203 = vadd.xlane.f32.xlu2 %v1202_v46 }
 0x7bd   :  { %v1174_v56 = vpop.xlane.xlu1 %1173 }
 0x7be   :  { %v1182_v61 = vsub.f32 %v1156_v35, %v1174_v56  ;;  %v1340_v56 = vpop.f32.mrf.mxu0 }
 0x7c0   :  { %v4783_v47 = vpop.eup %4782  ;;  %v1192_v48 = vmul.f32 1.442695, %v1182_v61 }
 0x7c1   :  { %v1205_v30 = vsel %vm91_vm0, %v4783_v47, 0.0 }
 0x7c2   :  { %4784 = vpow2.f32 %v1192_v48  ;;  %1206 = vadd.xlane.f32.xlu0 %v1205_v30 }
 0x7c5   :  { %v1177_v57 = vpop.xlane.xlu2 %1176 }
 0x7c6   :  { %v1183_v36 = vsub.f32 %v5498_v40, %v1177_v57  ;;  %v1342_v48 = vpop.f32.mrf.mxu0 }
 0x7c8   :  { %v4785_v62 = vpop.eup %4784  ;;  %v1194_v0 = vmul.f32 1.442695, %v1183_v36 }
 0x7c9   :  { %v1208_v28 = vsel %vm91_vm0, %v4785_v62, 0.0 }
 0x7ca   :  { %4786 = vpow2.f32 %v1194_v0  ;;  %1209 = vadd.xlane.f32.xlu1 %v1208_v28 }
 0x7ce   :  { %v1345_v30 = vpop.f32.mrf.mxu0 }
 0x7d0   :  { %v4787_v50 = vpop.eup %4786 }
 0x7d1   :  { %v1211_v2 = vsel %vm91_vm0, %v4787_v50, 0.0 }
 0x7d2   :  { %1212 = vadd.xlane.f32.xlu2 %v1211_v2 }
 0x7d6   :  { %v1347_v28 = vpop.f32.mrf.mxu0 }
 0x81d   :  { %v1198_v35 = vpop.xlane.xlu0 %1197 }
 0x81e   :  { %4788 = vrcp.f32 %v1198_v35 }
 0x824   :  { %v4789_v3 = vpop.eup %4788 }
 0x825   :  { %v1201_v4 = vpop.xlane.xlu1 %1200  ;;  %v1220_v9 = vmul.f32 %v4789_v3, %v4777_v26 }
 0x826   :  { %4790 = vrcp.f32 %v1201_v4  ;;  %v1350_v4 = vpop.f32.mrf.mxu0 }
 0x82c   :  { %v4791_v7 = vpop.eup %4790 }
 0x82d   :  { %v1221_v5 = vmul.f32 %v4791_v7, %v4779_v34  ;;  %v1204_v40 = vpop.xlane.xlu2 %1203 }
 0x82e   :  { %4792 = vrcp.f32 %v1204_v40 }
 0x82f   :  { %v1226_v10 = vpack.c.bf16 %v1221_v5, %v1220_v9  ;;  %v1352_v5 = vpop.f32.mrf.mxu0 }
 0x831   :  { %4170 = vmatmul.msk.bf16.vlgmr.msra.gmra.mxu2 %vm91_vm0, %v1226_v10 }
 0x834   :  { %v4793_v17 = vpop.eup %4792 }
 0x835   :  { %v1207_v15 = vpop.xlane.xlu0 %1206  ;;  %v1222_v21 = vmul.f32 %v4793_v17, %v4781_v43 }
 0x836   :  { %4794 = vrcp.f32 %v1207_v15 }
 0x83c   :  { %v4795_v20 = vpop.eup %4794 }
 0x83d   :  { %v1223_v23 = vmul.f32 %v4795_v20, %v4783_v47  ;;  %v1210_v26 = vpop.xlane.xlu1 %1209 }
 0x83e   :  { %4796 = vrcp.f32 %v1210_v26 }
 0x83f   :  { %v1227_v24 = vpack.c.bf16 %v1223_v23, %v1222_v21 }
 0x841   :  { %4171 = vmatmul.msk.bf16.gmra.mxu2 %vm91_vm0, %v1227_v24 }
 0x844   :  { %v4797_v51 = vpop.eup %4796 }
 0x845   :  { %v1213_v27 = vpop.xlane.xlu2 %1212  ;;  %v1224_v32 = vmul.f32 %v4797_v51, %v4785_v62 }
 0x846   :  { %4798 = vrcp.f32 %v1213_v27 }
 0x84c   :  { %v4799_v31 = vpop.eup %4798 }
 0x84d   :  { %v1225_v34 = vmul.f32 %v4799_v31, %v4787_v50 }
 0x84f   :  { %v1228_v37 = vpack.c.bf16 %v1225_v34, %v1224_v32 }
 0x851   :  { %4172 = vmatmul.msk.bf16.gmra.mxu2 %vm91_vm0, %v1228_v37 }
 0x861   :  { %4222 = vmatmul.msk.bf16.vlgmr.msrb.gmra.mxu2 %vm138_vm1, %v5211_v63 }
 0x871   :  { %4223 = vmatmul.msk.bf16.gmra.mxu2 %vm138_vm1, %v5232_v29 }
 0x881   :  { %4224 = vmatmul.msk.bf16.gmra.mxu2 %vm138_vm1, %v5246_v45  ;;  %v4686_v45 = vld [vmem:[%s6402_s4 + $0x3] ss:$0 sm:$0xff] }
 0x882   :  { %v1343_v57 = vadd.f32 %v4686_v45, %v1342_v48  ;;  %v1341_v36 = vadd.f32 %v4686_v45, %v1340_v56  ;;  %v1348_v2 = vadd.f32 %v4686_v45, %v1347_v28  ;;  %v1346_v35 = vadd.f32 %v4686_v45, %v1345_v30 }
 0x883   :  { %v1353_v10 = vadd.f32 %v4686_v45, %v1352_v5  ;;  %v1351_v40 = vadd.f32 %v4686_v45, %v1350_v4 }
 0x884   :  { %v1355_v0 = vpack.c.bf16 %v1343_v57, %v1341_v36  ;;  %v1356_v7 = vpack.c.bf16 %v1348_v2, %v1346_v35 }
 0x885   :  { %v1357_v15 = vpack.c.bf16 %v1353_v10, %v1351_v40 }
 0x8b4   :  { %v1247_v39 = vpop.f32.mrf.mxu2 }
 0x8bc   :  { %v1249_v42 = vpop.f32.mrf.mxu2 }
 0x8bd   :  { %v1262_v13 = vpack.c.bf16 %v1249_v42, %v1247_v39  ;;  %v962_v39 = vadd.f32 %v5476_v60, %v5456_v49 }
 0x8bf   :  { %4174 = vmatmul.msk.bf16.vlgmr.msrb.gmra.mxu3 %vm453_vm7, %v1262_v13 }
 0x8c4   :  { %v1252_v43 = vpop.f32.mrf.mxu2 }
 0x8cc   :  { %v1254_v44 = vpop.f32.mrf.mxu2 }
 0x8cd   :  { %v1263_v46 = vpack.c.bf16 %v1254_v44, %v1252_v43  ;;  %v967_v44 = vadd.f32 %v5480_v54, %v5464_v53 }
 0x8cf   :  { %4175 = vmatmul.msk.bf16.gmra.mxu3 %vm453_vm7, %v1263_v46 }
 0x8d4   :  { %v1257_v61 = vpop.f32.mrf.mxu2 }
 0x8dc   :  { %v1259_v47 = vpop.f32.mrf.mxu2 }
 0x8dd   :  { %v1264_v63 = vpack.c.bf16 %v1259_v47, %v1257_v61 }
 0x8df   :  { %4176 = vmatmul.msk.bf16.gmra.mxu3 %vm453_vm7, %v1264_v63 }
 0x8e4   :  { %v1438_v29 = vpop.f32.mrf.mxu2 }
 0x8e5   :  { %v1439_v51 = vadd.f32 %v4688_v11, %v1438_v29 }
 0x8ec   :  { %v1440_v62 = vpop.f32.mrf.mxu2 }
 0x8ed   :  { %v1441_v26 = vadd.f32 %v4688_v11, %v1440_v62 }
 0x8ef   :  { %4225 = vmatmul.msk.bf16.vlgmr.msra.gmra.mxu3 %vm453_vm7, %v1355_v0  ;;  %v1453_v31 = vpack.c.bf16 %v1441_v26, %v1439_v51 }
 0x8f4   :  { %v1443_v50 = vpop.f32.mrf.mxu2 }
 0x8f5   :  { %v1444_v24 = vadd.f32 %v4688_v11, %v1443_v50 }
 0x8fc   :  { %v1445_v3 = vpop.f32.mrf.mxu2 }
 0x8fd   :  { %v1446_v21 = vadd.f32 %v4688_v11, %v1445_v3 }
 0x8ff   :  { %4226 = vmatmul.msk.bf16.gmra.mxu3 %vm453_vm7, %v1356_v7  ;;  %v1454_v27 = vpack.c.bf16 %v1446_v21, %v1444_v24 }
 0x904   :  { %v1448_v9 = vpop.f32.mrf.mxu2 }
 0x905   :  { %v1449_v17 = vadd.f32 %v4688_v11, %v1448_v9 }
 0x90c   :  { %v1450_v14 = vpop.f32.mrf.mxu2 }
 0x90d   :  { %v1451_v20 = vadd.f32 %v4688_v11, %v1450_v14 }
 0x90f   :  { %v1455_v23 = vpack.c.bf16 %v1451_v20, %v1449_v17  ;;  %4227 = vmatmul.msk.bf16.gmra.mxu3 %vm453_vm7, %v1357_v15 }
 0x911   :  { %1581 = vmatpush.bf16.msra.mxu0 %v1455_v23 }
 0x915   :  { %1582 = vmatpush.bf16.msra.mxu0 %v1454_v27 }
 0x919   :  { %1583 = vmatpush.bf16.msra.mxu0 %v1453_v31 }
 0x942   :  { %v1288_v32 = vpop.f32.mrf.mxu3 }
 0x943   :  { %v5547_v34 = vadd.f32 %v1288_v32, %v5470_v58 }
 0x94a   :  { %v5549_v37 = vpop.f32.mrf.mxu3 }
 0x952   :  { %v1293_v42 = vpop.f32.mrf.mxu3 }
 0x953   :  { %v5553_v13 = vadd.f32 %v1293_v42, %v962_v39 }
 0x95a   :  { %v5555_v43 = vpop.f32.mrf.mxu3 }
 0x962   :  { %v1298_v46 = vpop.f32.mrf.mxu3 }
 0x963   :  { %v5559_v56 = vadd.f32 %v1298_v46, %v967_v44 }
 0x96a   :  { %v5561_v61 = vpop.f32.mrf.mxu3 }
 0x972   :  { %v1483_v58 = vpop.f32.mrf.mxu3 }
 0x973   :  { %v1484_v47 = vadd.f32 %v1483_v58, %v5311_v6 }
 0x975   :  { %v1498_v63 = vsel %vm91_vm0, %v1484_v47, -inf }
 0x976   :  { %1499 = vmax.xlane.f32.xlu0 %v1498_v63 }
 0x97a   :  { %v1485_v49 = vpop.f32.mrf.mxu3 }
 0x97b   :  { %v1486_v60 = vadd.f32 %v1485_v49, %v5311_v6 }
 0x97d   :  { %v1501_v48 = vsel %vm91_vm0, %v1486_v60, -inf }
 0x97e   :  { %1502 = vmax.xlane.f32.xlu1 %v1501_v48 }
 0x982   :  { %v1488_v29 = vpop.f32.mrf.mxu3 }
 0x983   :  { %v1489_v53 = vadd.f32 %v1488_v29, %v5311_v6 }
 0x985   :  { %v1504_v54 = vsel %vm91_vm0, %v1489_v53, -inf }
 0x986   :  { %1505 = vmax.xlane.f32.xlu2 %v1504_v54 }
 0x98a   :  { %v1490_v45 = vpop.f32.mrf.mxu3 }
 0x98b   :  { %v1491_v30 = vadd.f32 %v1490_v45, %v5319_v18 }
 0x98d   :  { %v1507_v57 = vsel %vm91_vm0, %v1491_v30, -inf }
 0x98e   :  { %1508 = vmax.xlane.f32.xlu0 %v1507_v57 }
 0x992   :  { %v1493_v36 = vpop.f32.mrf.mxu3 }
 0x993   :  { %v1494_v62 = vadd.f32 %v1493_v36, %v5319_v18 }
 0x995   :  { %v1510_v0 = vsel %vm91_vm0, %v1494_v62, -inf }
 0x996   :  { %1511 = vmax.xlane.f32.xlu1 %v1510_v0 }
 0x99a   :  { %v1495_v28 = vpop.f32.mrf.mxu3 }
 0x99b   :  { %v1496_v50 = vadd.f32 %v1495_v28, %v5319_v18 }
 0x99d   :  { %v1513_v2 = vsel %vm91_vm0, %v1496_v50, -inf }
 0x99e   :  { %1514 = vmax.xlane.f32.xlu2 %v1513_v2 }
 0x9e9   :  { %v1500_v35 = vpop.xlane.xlu0 %1499 }
 0x9ea   :  { %v1516_v4 = vsub.f32 %v1484_v47, %v1500_v35 }
 0x9ec   :  { %v1522_v3 = vmul.f32 1.442695, %v1516_v4 }
 0x9ee   :  { %4800 = vpow2.f32 %v1522_v3 }
 0x9f1   :  { %v1503_v7 = vpop.xlane.xlu1 %1502 }
 0x9f2   :  { %v1517_v9 = vsub.f32 %v1486_v60, %v1503_v7 }
 0x9f4   :  { %v4801_v5 = vpop.eup %4800  ;;  %v1524_v10 = vmul.f32 1.442695, %v1517_v9 }
 0x9f5   :  { %v1534_v40 = vsel %vm91_vm0, %v4801_v5, 0.0 }
 0x9f6   :  { %4802 = vpow2.f32 %v1524_v10  ;;  %1535 = vadd.xlane.f32.xlu0 %v1534_v40 }
 0x9f9   :  { %v1506_v11 = vpop.xlane.xlu2 %1505 }
 0x9fa   :  { %v1518_v14 = vsub.f32 %v1489_v53, %v1506_v11 }
 0x9fc   :  { %v4803_v15 = vpop.eup %4802  ;;  %v1526_v17 = vmul.f32 1.442695, %v1518_v14 }
 0x9fd   :  { %v1537_v20 = vsel %vm91_vm0, %v4803_v15, 0.0 }
 0x9fe   :  { %4804 = vpow2.f32 %v1526_v17  ;;  %1538 = vadd.xlane.f32.xlu1 %v1537_v20 }
 0xa01   :  { %v1509_v21 = vpop.xlane.xlu0 %1508 }
 0xa02   :  { %v1519_v23 = vsub.f32 %v1491_v30, %v1509_v21 }
 0xa04   :  { %v4805_v24 = vpop.eup %4804  ;;  %v1528_v26 = vmul.f32 1.442695, %v1519_v23 }
 0xa05   :  { %v1540_v27 = vsel %vm91_vm0, %v4805_v24, 0.0 }
 0xa06   :  { %4806 = vpow2.f32 %v1528_v26  ;;  %1541 = vadd.xlane.f32.xlu2 %v1540_v27 }
 0xa09   :  { %v1512_v51 = vpop.xlane.xlu1 %1511 }
 0xa0a   :  { %v1520_v31 = vsub.f32 %v1494_v62, %v1512_v51  ;;  %v4231_v62 = vld [vmem:[%s6403_s5 + $0xc] sm:$0xf] }
 0xa0b   :  { %v1615_v0 = vsel %vm907_vm12, %v4231_v62, 0 }
 0xa0c   :  { %v4807_v32 = vpop.eup %4806  ;;  %v1530_v39 = vmul.f32 1.442695, %v1520_v31  ;;  %1624 = vmatpush.bf16.msra.mxu1 %v1615_v0 }
 0xa0d   :  { %v1543_v42 = vsel %vm91_vm0, %v4807_v32, 0.0 }
 0xa0e   :  { %4808 = vpow2.f32 %v1530_v39  ;;  %1544 = vadd.xlane.f32.xlu0 %v1543_v42  ;;  %v4689_v39 = vld [vmem:[%s6404_s6 + $0x4] ss:$0 sm:$0xff] }
 0xa11   :  { %v1515_v44 = vpop.xlane.xlu2 %1514 }
 0xa12   :  { %v1521_v46 = vsub.f32 %v1496_v50, %v1515_v44  ;;  %v959_v44 = vadd.f32 %v5472_v59, %v5453_v38 }
 0xa14   :  { %v4809_v58 = vpop.eup %4808  ;;  %v1532_v47 = vmul.f32 1.442695, %v1521_v46 }
 0xa15   :  { %v1546_v63 = vsel %vm91_vm0, %v4809_v58, 0.0 }
 0xa16   :  { %4810 = vpow2.f32 %v1532_v47  ;;  %1547 = vadd.xlane.f32.xlu1 %v1546_v63 }
 0xa1c   :  { %v4811_v49 = vpop.eup %4810 }
 0xa1d   :  { %v1549_v60 = vsel %vm91_vm0, %v4811_v49, 0.0 }
 0xa1e   :  { %1550 = vadd.xlane.f32.xlu2 %v1549_v60 }
 0xa69   :  { %v1536_v48 = vpop.xlane.xlu0 %1535 }
 0xa6a   :  { %4812 = vrcp.f32 %v1536_v48 }
 0xa70   :  { %v4813_v53 = vpop.eup %4812 }
 0xa71   :  { %v1539_v29 = vpop.xlane.xlu1 %1538  ;;  %v1558_v45 = vmul.f32 %v4813_v53, %v4801_v5 }
 0xa72   :  { %4814 = vrcp.f32 %v1539_v29 }
 0xa78   :  { %v4815_v54 = vpop.eup %4814 }
 0xa79   :  { %v1559_v30 = vmul.f32 %v4815_v54, %v4803_v15  ;;  %v1542_v36 = vpop.xlane.xlu2 %1541 }
 0xa7a   :  { %4816 = vrcp.f32 %v1542_v36 }
 0xa7b   :  { %v1564_v57 = vpack.c.bf16 %v1559_v30, %v1558_v45 }
 0xa7d   :  { %4228 = vmatmul.msk.bf16.vlgmr.msra.gmra.mxu0 %vm91_vm0, %v1564_v57 }
 0xa80   :  { %v4817_v50 = vpop.eup %4816 }
 0xa81   :  { %v1545_v28 = vpop.xlane.xlu0 %1544  ;;  %v1560_v35 = vmul.f32 %v4817_v50, %v4805_v24 }
 0xa82   :  { %4818 = vrcp.f32 %v1545_v28 }
 0xa88   :  { %v4819_v2 = vpop.eup %4818 }
 0xa89   :  { %v1561_v4 = vmul.f32 %v4819_v2, %v4807_v32  ;;  %v1548_v7 = vpop.xlane.xlu1 %1547 }
 0xa8a   :  { %4820 = vrcp.f32 %v1548_v7 }
 0xa8b   :  { %v1565_v3 = vpack.c.bf16 %v1561_v4, %v1560_v35 }
 0xa8d   :  { %4229 = vmatmul.msk.bf16.gmra.mxu0 %vm91_vm0, %v1565_v3 }
 0xa90   :  { %v4821_v5 = vpop.eup %4820 }
 0xa91   :  { %v1551_v9 = vpop.xlane.xlu2 %1550  ;;  %v1562_v40 = vmul.f32 %v4821_v5, %v4809_v58  ;;  %v1304_v58 = vadd.f32 %v5549_v37, %v959_v44  ;;  %v964_v37 = vadd.f32 %v5478_v41, %v5460_v52 }
 0xa92   :  { %4822 = vrcp.f32 %v1551_v9 }
 0xa93   :  { %v1306_v53 = vadd.f32 %v5555_v43, %v964_v37  ;;  %v969_v43 = vadd.f32 %v5482_v1, %v5466_v55 }
 0xa95   :  { %v1308_v62 = vadd.f32 %v5561_v61, %v969_v43 }
 0xa98   :  { %v4823_v10 = vpop.eup %4822 }
 0xa99   :  { %v1563_v11 = vmul.f32 %v4823_v10, %v4811_v49 }
 0xa9b   :  { %v1566_v14 = vpack.c.bf16 %v1563_v11, %v1562_v40 }
 0xa9d   :  { %4230 = vmatmul.msk.bf16.gmra.mxu0 %vm91_vm0, %v1566_v14 }
 0xafa   :  { %v1585_v15 = vpop.f32.mrf.mxu0 }
 0xb02   :  { %v1587_v17 = vpop.f32.mrf.mxu0 }
 0xb03   :  { %v1600_v20 = vpack.c.bf16 %v1587_v17, %v1585_v15 }
 0xb05   :  { %4232 = vmatmul.msk.bf16.vlgmr.msra.gmra.mxu1 %vm453_vm7, %v1600_v20 }
 0xb0a   :  { %v1590_v21 = vpop.f32.mrf.mxu0 }
 0xb12   :  { %v1592_v23 = vpop.f32.mrf.mxu0 }
 0xb13   :  { %v1601_v24 = vpack.c.bf16 %v1592_v23, %v1590_v21 }
 0xb15   :  { %4233 = vmatmul.msk.bf16.gmra.mxu1 %vm453_vm7, %v1601_v24 }
 0xb1a   :  { %v1595_v26 = vpop.f32.mrf.mxu0 }
 0xb22   :  { %v1597_v27 = vpop.f32.mrf.mxu0 }
 0xb23   :  { %v1602_v51 = vpack.c.bf16 %v1597_v27, %v1595_v26 }
 0xb25   :  { %4234 = vmatmul.msk.bf16.gmra.mxu1 %vm453_vm7, %v1602_v51 }
 0xb82   :  { %v1626_v31 = vpop.f32.mrf.mxu1 }
 0xb83   :  { %v1641_v32 = vadd.f32 %v1626_v31, %v5547_v34 }
 0xb85   :  { %v1647_v42 = vadd.f32 %v1641_v32, %v5098_v8 }
 0xb87   :  { %v5598_v46 = vadd.f32 %v4689_v39, %v1647_v42 }
 0xb89   :  { %v1668_v47 = vsel %vm138_vm1, %v5598_v46, 0.0 }
 0xb8a   :  { %1669 = vadd.xlane.f32.xlu0 %v1668_v47  ;;  %v1628_v63 = vpop.f32.mrf.mxu1  ;;  %v4624_v47 = vld [vmem:[%s6405_s7 + $0x8] sm:$0xff] }
 0xb8b   :  { %v1642_v49 = vadd.f32 %v1628_v63, %v1304_v58  ;;  %1856 = vmatpush.bf16.msra.mxu2 %v4624_v47 }
 0xb8d   :  { %v1648_v34 = vadd.f32 %v1642_v49, %v5105_v12 }
 0xb8f   :  { %v5604_v60 = vadd.f32 %v4689_v39, %v1648_v34 }
 0xb91   :  { %v1671_v8 = vsel %vm138_vm1, %v5604_v60, 0.0 }
 0xb92   :  { %1672 = vadd.xlane.f32.xlu1 %v1671_v8  ;;  %v1631_v48 = vpop.f32.mrf.mxu1  ;;  %v4623_v8 = vld [vmem:[%s6405_s7] sm:$0xff] }
 0xb93   :  { %v1643_v38 = vadd.f32 %v1631_v48, %v5553_v13  ;;  %1857 = vmatpush.bf16.msra.mxu2 %v4623_v8 }
 0xb95   :  { %v1649_v59 = vadd.f32 %v1643_v38, %v5112_v16 }
 0xb97   :  { %v5612_v29 = vadd.f32 %v4689_v39, %v1649_v59 }
 0xb99   :  { %v1674_v12 = vsel %vm138_vm1, %v5612_v29, 0.0 }
 0xb9a   :  { %1675 = vadd.xlane.f32.xlu2 %v1674_v12  ;;  %v1633_v54 = vpop.f32.mrf.mxu1 }
 0xb9b   :  { %v1644_v45 = vadd.f32 %v1633_v54, %v1306_v53 }
 0xb9d   :  { %v1650_v30 = vadd.f32 %v1644_v45, %v5116_v19 }
 0xb9f   :  { %v5618_v57 = vadd.f32 %v4689_v39, %v1650_v30 }
 0xba1   :  { %v1677_v16 = vsel %vm138_vm1, %v5618_v57, 0.0 }
 0xba2   :  { %1678 = vadd.xlane.f32.xlu0 %v1677_v16  ;;  %v1636_v13 = vpop.f32.mrf.mxu1 }
 0xba3   :  { %v1645_v52 = vadd.f32 %v1636_v13, %v5559_v56 }
 0xba5   :  { %v1651_v41 = vadd.f32 %v1645_v52, %v5120_v22 }
 0xba7   :  { %v5626_v36 = vadd.f32 %v4689_v39, %v1651_v41 }
 0xba9   :  { %v1680_v19 = vsel %vm138_vm1, %v5626_v36, 0.0 }
 0xbaa   :  { %v1638_v0 = vpop.f32.mrf.mxu1  ;;  %1681 = vadd.xlane.f32.xlu1 %v1680_v19 }
 0xbab   :  { %v1646_v28 = vadd.f32 %v1638_v0, %v1308_v62 }
 0xbad   :  { %v1652_v50 = vadd.f32 %v1646_v28, %v5124_v25 }
 0xbaf   :  { %v5632_v2 = vadd.f32 %v4689_v39, %v1652_v50 }
 0xbb1   :  { %v1683_v22 = vsel %vm138_vm1, %v5632_v2, 0.0 }
 0xbb2   :  { %1684 = vadd.xlane.f32.xlu2 %v1683_v22 }
 0xbfd   :  { %v1670_v56 = vpop.xlane.xlu0 %1669 }
 0xbfe   :  { %v1686_v55 = vmul.f32 %v1670_v56, %v5128_v33 }
 0xc00   :  { %v5638_v1 = vsub.f32 %v5598_v46, %v1686_v55  ;;  %v5691_v55 = vld [vmem:[%s6404_s6 + $0x2] ss:$0 sm:$0xff] }
 0xc02   :  { %v1698_v61 = vmul.f32 %v5638_v1, %v5638_v1 }
 0xc04   :  { %v1704_v35 = vsel %vm138_vm1, %v1698_v61, 0.0 }
 0xc05   :  { %v1673_v4 = vpop.xlane.xlu1 %1672  ;;  %1705 = vadd.xlane.f32.xlu0 %v1704_v35 }
 0xc06   :  { %v1687_v25 = vmul.f32 %v1673_v4, %v5128_v33 }
 0xc08   :  { %v5645_v3 = vsub.f32 %v5604_v60, %v1687_v25 }
 0xc0a   :  { %v1699_v7 = vmul.f32 %v5645_v3, %v5645_v3 }
 0xc0c   :  { %v1707_v9 = vsel %vm138_vm1, %v1699_v7, 0.0 }
 0xc0d   :  { %v1676_v5 = vpop.xlane.xlu2 %1675  ;;  %1708 = vadd.xlane.f32.xlu1 %v1707_v9 }
 0xc0e   :  { %v1688_v10 = vmul.f32 %v1676_v5, %v5128_v33  ;;  %v5697_v5 = vld [vmem:[%s6404_s6 + $0x3] ss:$0 sm:$0xff] }
 0xc10   :  { %v5652_v40 = vsub.f32 %v5612_v29, %v1688_v10 }
 0xc12   :  { %v1700_v11 = vmul.f32 %v5652_v40, %v5652_v40 }
 0xc14   :  { %v1710_v14 = vsel %vm138_vm1, %v1700_v11, 0.0 }
 0xc15   :  { %v1679_v15 = vpop.xlane.xlu0 %1678  ;;  %1711 = vadd.xlane.f32.xlu2 %v1710_v14 }
 0xc16   :  { %v1689_v17 = vmul.f32 %v1679_v15, %v5128_v33 }
 0xc18   :  { %v5659_v20 = vsub.f32 %v5618_v57, %v1689_v17 }
 0xc1a   :  { %v1701_v21 = vmul.f32 %v5659_v20, %v5659_v20 }
 0xc1c   :  { %v1713_v23 = vsel %vm138_vm1, %v1701_v21, 0.0 }
 0xc1d   :  { %1714 = vadd.xlane.f32.xlu0 %v1713_v23  ;;  %v1682_v24 = vpop.xlane.xlu1 %1681 }
 0xc1e   :  { %v1690_v26 = vmul.f32 %v1682_v24, %v5128_v33 }
 0xc20   :  { %v5666_v27 = vsub.f32 %v5626_v36, %v1690_v26 }
 0xc22   :  { %v1702_v51 = vmul.f32 %v5666_v27, %v5666_v27 }
 0xc24   :  { %v1716_v31 = vsel %vm138_vm1, %v1702_v51, 0.0 }
 0xc25   :  { %v1685_v32 = vpop.xlane.xlu2 %1684  ;;  %1717 = vadd.xlane.f32.xlu1 %v1716_v31 }
 0xc26   :  { %v1691_v39 = vmul.f32 %v1685_v32, %v5128_v33 }
 0xc28   :  { %v5673_v42 = vsub.f32 %v5632_v2, %v1691_v39 }
 0xc2a   :  { %v1703_v44 = vmul.f32 %v5673_v42, %v5673_v42 }
 0xc2c   :  { %v1719_v58 = vsel %vm138_vm1, %v1703_v44, 0.0 }
 0xc2d   :  { %1720 = vadd.xlane.f32.xlu2 %v1719_v58 }
 0xc78   :  { %v1706_v63 = vpop.xlane.xlu0 %1705 }
 0xc79   :  { %v1722_v49 = vmul.f32 %v1706_v63, %v5128_v33 }
 0xc7b   :  { %v1728_v34 = vadd.f32 1e-06, %v1722_v49 }
 0xc7d   :  { %4824 = vrsqrt.f32 %v1728_v34  ;;  %vm1740_vm14 = vweird.f32 %v1728_v34 }
 0xc80   :  { %v1709_v48 = vpop.xlane.xlu1 %1708 }
 0xc81   :  { %v1723_v38 = vmul.f32 %v1709_v48, %v5128_v33 }
 0xc83   :  { %v4825_v59 = vpop.eup %4824  ;;  %v1729_v37 = vadd.f32 1e-06, %v1723_v38 }
 0xc84   :  { %v1735_v53 = vmul.f32 %v4825_v59, %v1728_v34  ;;  %vm1741_vm13 = vweird.f32 %v4825_v59 }
 0xc85   :  { %4826 = vrsqrt.f32 %v1729_v37  ;;  %vm1742_vm15 = vmor %vm1740_vm14, %vm1741_vm13  ;;  %vm1750_vm3 = vweird.f32 %v1729_v37 }
 0xc86   :  { %v1736_v12 = vmul.f32 %v4825_v59, %v1735_v53 }
 0xc88   :  { %v1737_v54 = vmul.f32 0.5, %v1736_v12  ;;  %v1712_v45 = vpop.xlane.xlu2 %1711 }
 0xc89   :  { %v1724_v30 = vmul.f32 %v1712_v45, %v5128_v33 }
 0xc8a   :  { %v1738_v16 = vsub.f32 1.5, %v1737_v54 }
 0xc8b   :  { %v4827_v13 = vpop.eup %4826  ;;  %v1730_v52 = vadd.f32 1e-06, %v1724_v30 }
 0xc8c   :  { %v1739_v41 = vmul.f32 %v4825_v59, %v1738_v16  ;;  %v1745_v43 = vmul.f32 %v4827_v13, %v1729_v37  ;;  %vm1751_vm2 = vweird.f32 %v4827_v13 }
 0xc8d   :  { %4828 = vrsqrt.f32 %v1730_v52  ;;  %vm1752_vm4 = vmor %vm1750_vm3, %vm1751_vm2  ;;  %vm1760_vm6 = vweird.f32 %v1730_v52 }
 0xc8e   :  { %v1746_v62 = vmul.f32 %v4827_v13, %v1745_v43  ;;  %v1743_v19 = vsel %vm1742_vm15, %v4825_v59, %v1739_v41 }
 0xc8f   :  { %v1794_v61 = vmul.f32 %v1743_v19, %v5638_v1 }
 0xc90   :  { %v1747_v0 = vmul.f32 0.5, %v1746_v62  ;;  %v1715_v28 = vpop.xlane.xlu0 %1714 }
 0xc91   :  { %v1725_v50 = vmul.f32 %v1715_v28, %v5128_v33  ;;  %v1803_v10 = vmul.f32 %v5691_v55, %v1794_v61 }
 0xc92   :  { %v1748_v22 = vsub.f32 1.5, %v1747_v0 }
 0xc93   :  { %v4829_v56 = vpop.eup %4828  ;;  %v1731_v35 = vadd.f32 1e-06, %v1725_v50  ;;  %v1812_v24 = vadd.f32 %v5697_v5, %v1803_v10  ;;  %v4628_v10 = vld [vmem:[%s6407_s9 + $0x18] sm:$0xff] }
 0xc94   :  { %v1749_v4 = vmul.f32 %v4827_v13, %v1748_v22  ;;  %v1755_v25 = vmul.f32 %v4829_v56, %v1730_v52  ;;  %vm1761_vm5 = vweird.f32 %v4829_v56 }
 0xc95   :  { %4830 = vrsqrt.f32 %v1731_v35  ;;  %vm1762_vm8 = vmor %vm1760_vm6, %vm1761_vm5  ;;  %vm1770_vm10 = vweird.f32 %v1731_v35 }
 0xc96   :  { %v1753_v7 = vsel %vm1752_vm4, %v4827_v13, %v1749_v4  ;;  %v1756_v9 = vmul.f32 %v4829_v56, %v1755_v25 }
 0xc97   :  { %v1795_v11 = vmul.f32 %v1753_v7, %v5645_v3 }
 0xc98   :  { %v1757_v14 = vmul.f32 0.5, %v1756_v9  ;;  %v1718_v15 = vpop.xlane.xlu1 %1717 }
 0xc99   :  { %v1804_v1 = vmul.f32 %v5691_v55, %v1795_v11  ;;  %v1726_v17 = vmul.f32 %v1718_v15, %v5128_v33  ;;  %v4627_v11 = vld [vmem:[%s6407_s9 + $0x10] sm:$0xff]  ;;  %v4692_v15 = vld [vmem:[%s6406_s8] ss:$0 sm:$0xff] }
 0xc9a   :  { %v1758_v21 = vsub.f32 1.5, %v1757_v14  ;;  %v4626_v14 = vld [vmem:[%s6407_s9 + $0x8] sm:$0xff] }
 0xc9b   :  { %v4831_v23 = vpop.eup %4830  ;;  %v1813_v26 = vadd.f32 %v5697_v5, %v1804_v1  ;;  %v1732_v51 = vadd.f32 1e-06, %v1726_v17  ;;  %v4625_v17 = vld [vmem:[%s6407_s9] sm:$0xff] }
 0xc9c   :  { %v1759_v31 = vmul.f32 %v4829_v56, %v1758_v21  ;;  %v1765_v32 = vmul.f32 %v4831_v23, %v1731_v35  ;;  %vm1771_vm9 = vweird.f32 %v4831_v23 }
 0xc9d   :  { %v1818_v39 = vpack.c.bf16 %v1813_v26, %v1812_v24  ;;  %4832 = vrsqrt.f32 %v1732_v51  ;;  %vm1772_vm11 = vmor %vm1770_vm10, %vm1771_vm9  ;;  %vm1780_vm14 = vweird.f32 %v1732_v51 }
 0xc9e   :  { %v1766_v3 = vmul.f32 %v4831_v23, %v1765_v32  ;;  %v1763_v44 = vsel %vm1762_vm8, %v4829_v56, %v1759_v31 }
 0xc9f   :  { %4246 = vmatmul.msk.bf16.vlgmr.msra.gmra.mxu2 %vm138_vm1, %v1818_v39  ;;  %v1796_v8 = vmul.f32 %v1763_v44, %v5652_v40 }
 0xca0   :  { %v1767_v58 = vmul.f32 0.5, %v1766_v3  ;;  %v1721_v47 = vpop.xlane.xlu2 %1720 }
 0xca1   :  { %v1727_v63 = vmul.f32 %v1721_v47, %v5128_v33  ;;  %v1805_v54 = vmul.f32 %v5691_v55, %v1796_v8 }
 0xca2   :  { %v1768_v49 = vsub.f32 1.5, %v1767_v58 }
 0xca3   :  { %v4833_v34 = vpop.eup %4832  ;;  %v1733_v48 = vadd.f32 1e-06, %v1727_v63  ;;  %v1814_v52 = vadd.f32 %v5697_v5, %v1805_v54 }
 0xca4   :  { %v1769_v38 = vmul.f32 %v4831_v23, %v1768_v49  ;;  %v1775_v59 = vmul.f32 %v4833_v34, %v1732_v51  ;;  %vm1781_vm13 = vweird.f32 %v4833_v34 }
 0xca5   :  { %4834 = vrsqrt.f32 %v1733_v48  ;;  %vm1782_vm15 = vmor %vm1780_vm14, %vm1781_vm13  ;;  %vm1790_vm3 = vweird.f32 %v1733_v48 }
 0xca6   :  { %v1773_v37 = vsel %vm1772_vm11, %v4831_v23, %v1769_v38  ;;  %v1776_v53 = vmul.f32 %v4833_v34, %v1775_v59 }
 0xca7   :  { %v1797_v12 = vmul.f32 %v1773_v37, %v5659_v20 }
 0xca8   :  { %v1777_v45 = vmul.f32 0.5, %v1776_v53 }
 0xca9   :  { %v1806_v30 = vmul.f32 %v5691_v55, %v1797_v12 }
 0xcaa   :  { %v1778_v16 = vsub.f32 1.5, %v1777_v45 }
 0xcab   :  { %v4835_v13 = vpop.eup %4834  ;;  %v1815_v40 = vadd.f32 %v5697_v5, %v1806_v30 }
 0xcac   :  { %v1779_v41 = vmul.f32 %v4833_v34, %v1778_v16  ;;  %v1785_v43 = vmul.f32 %v4835_v13, %v1733_v48  ;;  %vm1791_vm2 = vweird.f32 %v4835_v13 }
 0xcad   :  { %v1819_v62 = vpack.c.bf16 %v1815_v40, %v1814_v52  ;;  %vm1792_vm4 = vmor %vm1790_vm3, %vm1791_vm2 }
 0xcae   :  { %v1786_v19 = vmul.f32 %v4835_v13, %v1785_v43  ;;  %v1783_v20 = vsel %vm1782_vm15, %v4833_v34, %v1779_v41 }
 0xcaf   :  { %4247 = vmatmul.msk.bf16.gmra.mxu2 %vm138_vm1, %v1819_v62  ;;  %v1798_v50 = vmul.f32 %v1783_v20, %v5666_v27  ;;  %v4632_v27 = vld [vmem:[%s6407_s9 + $0x38] sm:$0xff] }
 0xcb0   :  { %v1787_v0 = vmul.f32 0.5, %v1786_v19  ;;  %1995 = vmatpush.bf16.msrb.mxu3 %v4632_v27 }
 0xcb1   :  { %v1807_v35 = vmul.f32 %v5691_v55, %v1798_v50 }
 0xcb2   :  { %v1788_v28 = vsub.f32 1.5, %v1787_v0 }
 0xcb3   :  { %v1816_v25 = vadd.f32 %v5697_v5, %v1807_v35 }
 0xcb4   :  { %v1789_v22 = vmul.f32 %v4835_v13, %v1788_v28 }
 0xcb6   :  { %v1793_v56 = vsel %vm1792_vm4, %v4835_v13, %v1789_v22 }
 0xcb7   :  { %v1799_v61 = vmul.f32 %v1793_v56, %v5673_v42  ;;  %v4631_v42 = vld [vmem:[%s6407_s9 + $0x30] sm:$0xff] }
 0xcb8   :  { %1996 = vmatpush.bf16.msrb.mxu3 %v4631_v42 }
 0xcb9   :  { %v1808_v4 = vmul.f32 %v5691_v55, %v1799_v61  ;;  %v4630_v55 = vld [vmem:[%s6407_s9 + $0x28] sm:$0xff] }
 0xcbb   :  { %v1817_v7 = vadd.f32 %v5697_v5, %v1808_v4  ;;  %v4629_v5 = vld [vmem:[%s6407_s9 + $0x20] sm:$0xff] }
 0xcbc   :  { %1997 = vmatpush.bf16.msrb.mxu3 %v4630_v55 }
 0xcbd   :  { %v1820_v9 = vpack.c.bf16 %v1817_v7, %v1816_v25 }
 0xcbf   :  { %4248 = vmatmul.msk.bf16.gmra.mxu2 %vm138_vm1, %v1820_v9 }
 0xcc0   :  { %1998 = vmatpush.bf16.msrb.mxu3 %v4629_v5 }
 0xcc4   :  { %1999 = vmatpush.bf16.msrb.mxu3 %v4628_v10 }
 0xcc8   :  { %2000 = vmatpush.bf16.msrb.mxu3 %v4627_v11 }
 0xccc   :  { %2001 = vmatpush.bf16.msrb.mxu3 %v4626_v14 }
 0xcd0   :  { %2002 = vmatpush.bf16.msrb.mxu3 %v4625_v17 }
 0xd22   :  { %v1859_v1 = vpop.f32.mrf.mxu2 }
 0xd23   :  { %v1860_v21 = vadd.f32 %v4692_v15, %v1859_v1 }
 0xd25   :  { %v1874_v23 = vmul.f32 %v1860_v21, %v1860_v21 }
 0xd27   :  { %v1880_v24 = vmul.f32 %v1874_v23, %v1860_v21 }
 0xd29   :  { %v1886_v26 = vmul.f32 0.044715, %v1880_v24 }
 0xd2a   :  { %v1861_v51 = vpop.f32.mrf.mxu2 }
 0xd2b   :  { %v1892_v31 = vadd.f32 %v1886_v26, %v1860_v21  ;;  %v1862_v32 = vadd.f32 %v4692_v15, %v1861_v51 }
 0xd2d   :  { %v1898_v39 = vmul.f32 0.7978846, %v1892_v31  ;;  %v1875_v3 = vmul.f32 %v1862_v32, %v1862_v32 }
 0xd2f   :  { %v1881_v44 = vmul.f32 %v1875_v3, %v1862_v32  ;;  %4836 = vtanh.f32 %v1898_v39 }
 0xd31   :  { %v1887_v58 = vmul.f32 0.044715, %v1881_v44 }
 0xd32   :  { %v1864_v47 = vpop.f32.mrf.mxu2 }
 0xd33   :  { %v1893_v63 = vadd.f32 %v1887_v58, %v1862_v32  ;;  %v1865_v49 = vadd.f32 %v4692_v15, %v1864_v47 }
 0xd35   :  { %v1899_v34 = vmul.f32 0.7978846, %v1893_v63  ;;  %v1876_v8 = vmul.f32 %v1865_v49, %v1865_v49  ;;  %v4837_v48 = vpop.eup %4836 }
 0xd36   :  { %v1910_v37 = vadd.f32 1.0, %v4837_v48 }
 0xd37   :  { %4838 = vtanh.f32 %v1899_v34  ;;  %v1882_v38 = vmul.f32 %v1876_v8, %v1865_v49 }
 0xd38   :  { %v1916_v13 = vmul.f32 0.5, %v1910_v37 }
 0xd39   :  { %v1888_v59 = vmul.f32 0.044715, %v1882_v38 }
 0xd3a   :  { %v1866_v53 = vpop.f32.mrf.mxu2  ;;  %v1922_v62 = vmul.f32 %v1916_v13, %v1860_v21 }
 0xd3b   :  { %v1894_v12 = vadd.f32 %v1888_v59, %v1865_v49  ;;  %v1867_v54 = vadd.f32 %v4692_v15, %v1866_v53 }
 0xd3d   :  { %v4839_v45 = vpop.eup %4838  ;;  %v1900_v30 = vmul.f32 0.7978846, %v1894_v12  ;;  %v1877_v16 = vmul.f32 %v1867_v54, %v1867_v54 }
 0xd3e   :  { %v1911_v52 = vadd.f32 1.0, %v4839_v45 }
 0xd3f   :  { %v1883_v40 = vmul.f32 %v1877_v16, %v1867_v54  ;;  %4840 = vtanh.f32 %v1900_v30 }
 0xd40   :  { %v1917_v41 = vmul.f32 0.5, %v1911_v52 }
 0xd41   :  { %v1889_v43 = vmul.f32 0.044715, %v1883_v40 }
 0xd42   :  { %v1923_v19 = vmul.f32 %v1917_v41, %v1862_v32  ;;  %v1869_v20 = vpop.f32.mrf.mxu2 }
 0xd43   :  { %v1895_v0 = vadd.f32 %v1889_v43, %v1867_v54  ;;  %v1870_v28 = vadd.f32 %v4692_v15, %v1869_v20 }
 0xd44   :  { %v1928_v50 = vpack.c.bf16 %v1923_v19, %v1922_v62 }
 0xd45   :  { %v1901_v22 = vmul.f32 0.7978846, %v1895_v0  ;;  %v1878_v56 = vmul.f32 %v1870_v28, %v1870_v28  ;;  %v4841_v61 = vpop.eup %4840 }
 0xd46   :  { %2003 = vmatmul.bf16.vlgmr.msrb.gmra.mxu3 %v1928_v50  ;;  %v1912_v7 = vadd.f32 1.0, %v4841_v61 }
 0xd47   :  { %v1884_v35 = vmul.f32 %v1878_v56, %v1870_v28  ;;  %4842 = vtanh.f32 %v1901_v22 }
 0xd48   :  { %v1918_v11 = vmul.f32 0.5, %v1912_v7 }
 0xd49   :  { %v1890_v4 = vmul.f32 0.044715, %v1884_v35 }
 0xd4a   :  { %v1871_v25 = vpop.f32.mrf.mxu2  ;;  %v1924_v21 = vmul.f32 %v1918_v11, %v1865_v49  ;;  %v4693_v49 = vld [vmem:[%s6404_s6 + $0x5] ss:$0 sm:$0xff] }
 0xd4b   :  { %v1896_v9 = vadd.f32 %v1890_v4, %v1870_v28  ;;  %v1872_v27 = vadd.f32 %v4692_v15, %v1871_v25 }
 0xd4d   :  { %v4843_v42 = vpop.eup %4842  ;;  %v1902_v55 = vmul.f32 0.7978846, %v1896_v9  ;;  %v1879_v5 = vmul.f32 %v1872_v27, %v1872_v27 }
 0xd4e   :  { %v1913_v10 = vadd.f32 1.0, %v4843_v42 }
 0xd4f   :  { %v1885_v14 = vmul.f32 %v1879_v5, %v1872_v27  ;;  %4844 = vtanh.f32 %v1902_v55 }
 0xd50   :  { %v1919_v1 = vmul.f32 0.5, %v1913_v10 }
 0xd51   :  { %v1891_v17 = vmul.f32 0.044715, %v1885_v14 }
 0xd52   :  { %v1925_v23 = vmul.f32 %v1919_v1, %v1867_v54 }
 0xd53   :  { %v1897_v24 = vadd.f32 %v1891_v17, %v1872_v27 }
 0xd54   :  { %v1929_v26 = vpack.c.bf16 %v1925_v23, %v1924_v21 }
 0xd55   :  { %v1903_v51 = vmul.f32 0.7978846, %v1897_v24  ;;  %v4845_v31 = vpop.eup %4844 }
 0xd56   :  { %2008 = vmatmul.bf16.gmra.mxu3 %v1929_v26  ;;  %v1914_v32 = vadd.f32 1.0, %v4845_v31 }
 0xd57   :  { %4846 = vtanh.f32 %v1903_v51 }
 0xd58   :  { %v1920_v3 = vmul.f32 0.5, %v1914_v32 }
 0xd5a   :  { %v1926_v58 = vmul.f32 %v1920_v3, %v1870_v28  ;;  %v4634_v3 = vld [vmem:[%s6401_s3 + $0xc8] sm:$0xff] }
 0xd5b   :  { %2230 = vmatpush.bf16.msrb.mxu0 %v4634_v3 }
 0xd5d   :  { %v4847_v39 = vpop.eup %4846 }
 0xd5e   :  { %v1915_v15 = vadd.f32 1.0, %v4847_v39 }
 0xd60   :  { %v1921_v44 = vmul.f32 0.5, %v1915_v15  ;;  %v4636_v15 = vld [vmem:[%s6401_s3 + $0x108] sm:$0xff] }
 0xd61   :  { %2279 = vmatpush.bf16.msrb.mxu1 %v4636_v15 }
 0xd62   :  { %v1927_v47 = vmul.f32 %v1921_v44, %v1872_v27  ;;  %v4638_v44 = vld [vmem:[%s6401_s3 + $0x148] sm:$0xff] }
 0xd63   :  { %2328 = vmatpush.bf16.msrb.mxu2 %v4638_v44 }
 0xd64   :  { %v1930_v63 = vpack.c.bf16 %v1927_v47, %v1926_v58 }
 0xd66   :  { %2013 = vmatmul.bf16.gmra.mxu3 %v1930_v63 }
 0xdc9   :  { %v2004_v34 = vpop.f32.mrf.mxu3 }
 0xdca   :  { %v2019_v8 = vadd.f32 %v2004_v34, %v5598_v46  ;;  %v4635_v34 = vld [vmem:[%s6401_s3 + $0x100] sm:$0xff] }
 0xdcb   :  { %2280 = vmatpush.bf16.msrb.mxu1 %v4635_v34  ;;  %v4642_v34 = vld [vmem:[%s6401_s3 + $0x118] sm:$0xff] }
 0xdcc   :  { %v5752_v48 = vadd.f32 %v4693_v49, %v2019_v8  ;;  %v4637_v8 = vld [vmem:[%s6401_s3 + $0x140] sm:$0xff] }
 0xdcd   :  { %2329 = vmatpush.bf16.msrb.mxu2 %v4637_v8 }
 0xdce   :  { %v2040_v38 = vsel %vm138_vm1, %v5752_v48, 0.0 }
 0xdcf   :  { %2041 = vadd.xlane.f32.xlu0 %v2040_v38 }
 0xdd1   :  { %v2006_v59 = vpop.f32.mrf.mxu3  ;;  %2575 = vmatpush.bf16.msra.mxu2 %v4642_v34  ;;  %v4698_v34 = vld [vmem:[%s6402_s4 + $0x14] ss:$0 sm:$0xff] }
 0xdd2   :  { %v2020_v37 = vadd.f32 %v2006_v59, %v5604_v60 }
 0xdd4   :  { %v5757_v53 = vadd.f32 %v4693_v49, %v2020_v37 }
 0xdd6   :  { %v2043_v12 = vsel %vm138_vm1, %v5757_v53, 0.0 }
 0xdd7   :  { %2044 = vadd.xlane.f32.xlu1 %v2043_v12 }
 0xdd9   :  { %v2009_v54 = vpop.f32.mrf.mxu3 }
 0xdda   :  { %v2021_v45 = vadd.f32 %v2009_v54, %v5612_v29 }
 0xddc   :  { %v5762_v30 = vadd.f32 %v4693_v49, %v2021_v45 }
 0xdde   :  { %v2046_v46 = vsel %vm138_vm1, %v5762_v30, 0.0 }
 0xddf   :  { %2047 = vadd.xlane.f32.xlu2 %v2046_v46 }
 0xde1   :  { %v2011_v16 = vpop.f32.mrf.mxu3 }
 0xde2   :  { %v2022_v13 = vadd.f32 %v2011_v16, %v5618_v57 }
 0xde4   :  { %v5767_v52 = vadd.f32 %v4693_v49, %v2022_v13 }
 0xde6   :  { %v2049_v60 = vsel %vm138_vm1, %v5767_v52, 0.0 }
 0xde7   :  { %2050 = vadd.xlane.f32.xlu0 %v2049_v60 }
 0xde9   :  { %v2014_v40 = vpop.f32.mrf.mxu3 }
 0xdea   :  { %v2023_v41 = vadd.f32 %v2014_v40, %v5626_v36 }
 0xdec   :  { %v5772_v43 = vadd.f32 %v4693_v49, %v2023_v41 }
 0xdee   :  { %v2052_v29 = vsel %vm138_vm1, %v5772_v43, 0.0 }
 0xdef   :  { %2053 = vadd.xlane.f32.xlu1 %v2052_v29 }
 0xdf1   :  { %v2016_v62 = vpop.f32.mrf.mxu3 }
 0xdf2   :  { %v2024_v19 = vadd.f32 %v2016_v62, %v5632_v2 }
 0xdf4   :  { %v5777_v20 = vadd.f32 %v4693_v49, %v2024_v19  ;;  %v4633_v49 = vld [vmem:[%s6401_s3 + $0xc0] sm:$0xff] }
 0xdf5   :  { %2231 = vmatpush.bf16.msrb.mxu0 %v4633_v49  ;;  %v4640_v49 = vld [vmem:[%s6401_s3 + $0xd8] sm:$0xff] }
 0xdf6   :  { %v2055_v57 = vsel %vm138_vm1, %v5777_v20, 0.0  ;;  %2526 = vmatpush.bf16.msra.mxu1 %v4640_v49 }
 0xdf7   :  { %2056 = vadd.xlane.f32.xlu2 %v2055_v57 }
 0xe42   :  { %v2042_v0 = vpop.xlane.xlu0 %2041 }
 0xe43   :  { %v2058_v28 = vmul.f32 %v2042_v0, %v5128_v33 }
 0xe45   :  { %v5783_v36 = vsub.f32 %v5752_v48, %v2058_v28 }
 0xe47   :  { %v2070_v50 = vmul.f32 %v5783_v36, %v5783_v36 }
 0xe49   :  { %v2076_v22 = vsel %vm138_vm1, %v2070_v50, 0.0 }
 0xe4a   :  { %2077 = vadd.xlane.f32.xlu0 %v2076_v22  ;;  %v2045_v56 = vpop.xlane.xlu1 %2044 }
 0xe4b   :  { %v2059_v2 = vmul.f32 %v2045_v56, %v5128_v33 }
 0xe4d   :  { %v5790_v61 = vsub.f32 %v5757_v53, %v2059_v2  ;;  %v5848_v2 = vld [vmem:[%s6404_s6 + $0x6] ss:$0 sm:$0xff] }
 0xe4f   :  { %v2071_v35 = vmul.f32 %v5790_v61, %v5790_v61 }
 0xe51   :  { %v2079_v4 = vsel %vm138_vm1, %v2071_v35, 0.0 }
 0xe52   :  { %v2048_v25 = vpop.xlane.xlu2 %2047  ;;  %2080 = vadd.xlane.f32.xlu1 %v2079_v4 }
 0xe53   :  { %v2060_v7 = vmul.f32 %v2048_v25, %v5128_v33 }
 0xe55   :  { %v5797_v9 = vsub.f32 %v5762_v30, %v2060_v7 }
 0xe57   :  { %v2072_v27 = vmul.f32 %v5797_v9, %v5797_v9 }
 0xe59   :  { %v2082_v42 = vsel %vm138_vm1, %v2072_v27, 0.0 }
 0xe5a   :  { %v2051_v55 = vpop.xlane.xlu0 %2050  ;;  %2083 = vadd.xlane.f32.xlu2 %v2082_v42 }
 0xe5b   :  { %v2061_v5 = vmul.f32 %v2051_v55, %v5128_v33  ;;  %v5854_v55 = vld [vmem:[%s6404_s6 + $0x7] ss:$0 sm:$0xff] }
 0xe5d   :  { %v5804_v10 = vsub.f32 %v5767_v52, %v2061_v5 }
 0xe5f   :  { %v2073_v11 = vmul.f32 %v5804_v10, %v5804_v10 }
 0xe61   :  { %v2085_v14 = vsel %vm138_vm1, %v2073_v11, 0.0 }
 0xe62   :  { %2086 = vadd.xlane.f32.xlu0 %v2085_v14  ;;  %v2054_v1 = vpop.xlane.xlu1 %2053 }
 0xe63   :  { %v2062_v17 = vmul.f32 %v2054_v1, %v5128_v33 }
 0xe65   :  { %v5811_v21 = vsub.f32 %v5772_v43, %v2062_v17 }
 0xe67   :  { %v2074_v23 = vmul.f32 %v5811_v21, %v5811_v21 }
 0xe69   :  { %v2088_v24 = vsel %vm138_vm1, %v2074_v23, 0.0 }
 0xe6a   :  { %v2057_v26 = vpop.xlane.xlu2 %2056  ;;  %2089 = vadd.xlane.f32.xlu1 %v2088_v24 }
 0xe6b   :  { %v2063_v51 = vmul.f32 %v2057_v26, %v5128_v33 }
 0xe6d   :  { %v5818_v31 = vsub.f32 %v5777_v20, %v2063_v51 }
 0xe6f   :  { %v2075_v32 = vmul.f32 %v5818_v31, %v5818_v31 }
 0xe71   :  { %v2091_v39 = vsel %vm138_vm1, %v2075_v32, 0.0 }
 0xe72   :  { %2092 = vadd.xlane.f32.xlu2 %v2091_v39 }
 0xebd   :  { %v2078_v58 = vpop.xlane.xlu0 %2077 }
 0xebe   :  { %v2094_v47 = vmul.f32 %v2078_v58, %v5128_v33 }
 0xec0   :  { %v2100_v63 = vadd.f32 1e-06, %v2094_v47 }
 0xec2   :  { %4848 = vrsqrt.f32 %v2100_v63  ;;  %vm2112_vm6 = vweird.f32 %v2100_v63 }
 0xec5   :  { %v2081_v38 = vpop.xlane.xlu1 %2080 }
 0xec6   :  { %v2095_v59 = vmul.f32 %v2081_v38, %v5128_v33 }
 0xec8   :  { %v4849_v37 = vpop.eup %4848  ;;  %v2101_v12 = vadd.f32 1e-06, %v2095_v59  ;;  %v4639_v59 = vld [vmem:[%s6401_s3 + $0xd0] sm:$0xff] }
 0xec9   :  { %v2107_v54 = vmul.f32 %v4849_v37, %v2100_v63  ;;  %vm2113_vm5 = vweird.f32 %v4849_v37  ;;  %2527 = vmatpush.bf16.msra.mxu1 %v4639_v59 }
 0xeca   :  { %4850 = vrsqrt.f32 %v2101_v12  ;;  %vm2114_vm8 = vmor %vm2112_vm6, %vm2113_vm5  ;;  %vm2122_vm10 = vweird.f32 %v2101_v12 }
 0xecb   :  { %v2108_v45 = vmul.f32 %v4849_v37, %v2107_v54 }
 0xecd   :  { %v2109_v46 = vmul.f32 0.5, %v2108_v45  ;;  %v2084_v16 = vpop.xlane.xlu2 %2083 }
 0xece   :  { %v2096_v13 = vmul.f32 %v2084_v16, %v5128_v33 }
 0xecf   :  { %v2110_v60 = vsub.f32 1.5, %v2109_v46 }
 0xed0   :  { %v4851_v40 = vpop.eup %4850  ;;  %v2102_v41 = vadd.f32 1e-06, %v2096_v13 }
 0xed1   :  { %v2111_v29 = vmul.f32 %v4849_v37, %v2110_v60  ;;  %v2117_v62 = vmul.f32 %v4851_v40, %v2101_v12  ;;  %vm2123_vm9 = vweird.f32 %v4851_v40 }
 0xed2   :  { %4852 = vrsqrt.f32 %v2102_v41  ;;  %vm2124_vm11 = vmor %vm2122_vm10, %vm2123_vm9  ;;  %vm2132_vm14 = vweird.f32 %v2102_v41 }
 0xed3   :  { %v2118_v19 = vmul.f32 %v4851_v40, %v2117_v62  ;;  %v2115_v57 = vsel %vm2114_vm8, %v4849_v37, %v2111_v29  ;;  %v4641_v37 = vld [vmem:[%s6401_s3 + $0x110] sm:$0xff] }
 0xed4   :  { %v2166_v35 = vmul.f32 %v2115_v57, %v5783_v36  ;;  %2576 = vmatpush.bf16.msra.mxu2 %v4641_v37 }
 0xed5   :  { %v2119_v0 = vmul.f32 0.5, %v2118_v19  ;;  %v2087_v28 = vpop.xlane.xlu0 %2086 }
 0xed6   :  { %v2097_v50 = vmul.f32 %v2087_v28, %v5128_v33  ;;  %v2175_v5 = vmul.f32 %v5848_v2, %v2166_v35 }
 0xed7   :  { %v2120_v22 = vsub.f32 1.5, %v2119_v0 }
 0xed8   :  { %v4853_v56 = vpop.eup %4852  ;;  %v2103_v4 = vadd.f32 1e-06, %v2097_v50  ;;  %v2184_v26 = vadd.f32 %v5854_v55, %v2175_v5 }
 0xed9   :  { %v2121_v25 = vmul.f32 %v4851_v40, %v2120_v22  ;;  %v2127_v7 = vmul.f32 %v4853_v56, %v2102_v41  ;;  %vm2133_vm13 = vweird.f32 %v4853_v56 }
 0xeda   :  { %4854 = vrsqrt.f32 %v2103_v4  ;;  %vm5864_vm15 = vmor %vm2132_vm14, %vm2133_vm13  ;;  %vm2142_vm3 = vweird.f32 %v2103_v4 }
 0xedb   :  { %v2125_v27 = vsel %vm2124_vm11, %v4851_v40, %v2121_v25  ;;  %v2128_v42 = vmul.f32 %v4853_v56, %v2127_v7 }
 0xedc   :  { %v2167_v11 = vmul.f32 %v2125_v27, %v5790_v61 }
 0xedd   :  { %v2129_v14 = vmul.f32 0.5, %v2128_v42  ;;  %v2090_v1 = vpop.xlane.xlu1 %2089 }
 0xede   :  { %v2176_v36 = vmul.f32 %v5848_v2, %v2167_v11  ;;  %v2098_v17 = vmul.f32 %v2090_v1, %v5128_v33 }
 0xedf   :  { %v2130_v23 = vsub.f32 1.5, %v2129_v14 }
 0xee0   :  { %v4855_v24 = vpop.eup %4854  ;;  %v2185_v51 = vadd.f32 %v5854_v55, %v2176_v36  ;;  %v2104_v32 = vadd.f32 1e-06, %v2098_v17 }
 0xee1   :  { %v2131_v39 = vmul.f32 %v4853_v56, %v2130_v23  ;;  %v2137_v15 = vmul.f32 %v4855_v24, %v2103_v4  ;;  %vm2143_vm2 = vweird.f32 %v4855_v24 }
 0xee2   :  { %v5862_v3 = vpack.c.bf16 %v2185_v51, %v2184_v26  ;;  %4856 = vrsqrt.f32 %v2104_v32  ;;  %vm2144_vm4 = vmor %vm2142_vm3, %vm2143_vm2  ;;  %vm2152_vm6 = vweird.f32 %v2104_v32 }
 0xee3   :  { %v2138_v61 = vmul.f32 %v4855_v24, %v2137_v15  ;;  %v2135_v58 = vsel %vm5864_vm15, %v4853_v56, %v2131_v39 }
 0xee4   :  { %4297 = vmatmul.msk.bf16.vlgmr.msrb.gmra.mxu0 %vm138_vm1, %v5862_v3  ;;  %4313 = vmatmul.msk.bf16.vlgmr.msrb.gmra.mxu1 %vm138_vm1, %v5862_v3  ;;  %v2168_v54 = vmul.f32 %v2135_v58, %v5797_v9 }
 0xee5   :  { %v2139_v47 = vmul.f32 0.5, %v2138_v61  ;;  %4329 = vmatmul.msk.bf16.vlgmr.msrb.gmra.mxu2 %vm138_vm1, %v5862_v3  ;;  %v2093_v63 = vpop.xlane.xlu2 %2092 }
 0xee6   :  { %v2099_v8 = vmul.f32 %v2093_v63, %v5128_v33  ;;  %v2177_v40 = vmul.f32 %v5848_v2, %v2168_v54 }
 0xee7   :  { %v2140_v38 = vsub.f32 1.5, %v2139_v47 }
 0xee8   :  { %v4857_v12 = vpop.eup %4856  ;;  %v2105_v45 = vadd.f32 1e-06, %v2099_v8  ;;  %v2186_v9 = vadd.f32 %v5854_v55, %v2177_v40 }
 0xee9   :  { %v2141_v46 = vmul.f32 %v4855_v24, %v2140_v38  ;;  %v2147_v16 = vmul.f32 %v4857_v12, %v2104_v32  ;;  %vm2153_vm5 = vweird.f32 %v4857_v12  ;;  %v4697_v32 = vld [vmem:[%s6402_s4 + $0x10] ss:$0 sm:$0xff] }
 0xeea   :  { %4858 = vrsqrt.f32 %v2105_v45  ;;  %vm2154_vm8 = vmor %vm2152_vm6, %vm2153_vm5  ;;  %vm2162_vm10 = vweird.f32 %v2105_v45 }
 0xeeb   :  { %v2145_v13 = vsel %vm2144_vm4, %v4855_v24, %v2141_v46  ;;  %v2148_v60 = vmul.f32 %v4857_v12, %v2147_v16 }
 0xeec   :  { %v2169_v41 = vmul.f32 %v2145_v13, %v5804_v10 }
 0xeed   :  { %v2149_v29 = vmul.f32 0.5, %v2148_v60 }
 0xeee   :  { %v2178_v62 = vmul.f32 %v5848_v2, %v2169_v41 }
 0xeef   :  { %v2150_v19 = vsub.f32 1.5, %v2149_v29 }
 0xef0   :  { %v4859_v57 = vpop.eup %4858  ;;  %v2187_v0 = vadd.f32 %v5854_v55, %v2178_v62 }
 0xef1   :  { %v2151_v28 = vmul.f32 %v4857_v12, %v2150_v19  ;;  %v2157_v50 = vmul.f32 %v4859_v57, %v2105_v45  ;;  %vm2163_vm9 = vweird.f32 %v4859_v57 }
 0xef2   :  { %v5895_v22 = vpack.c.bf16 %v2187_v0, %v2186_v9  ;;  %vm2164_vm11 = vmor %vm2162_vm10, %vm2163_vm9  ;;  %v4696_v0 = vld [vmem:[%s6402_s4 + $0xc] ss:$0 sm:$0xff] }
 0xef3   :  { %v2158_v56 = vmul.f32 %v4859_v57, %v2157_v50  ;;  %v2155_v10 = vsel %vm2154_vm8, %v4857_v12, %v2151_v28 }
 0xef4   :  { %4298 = vmatmul.msk.bf16.gmra.mxu0 %vm138_vm1, %v5895_v22  ;;  %4314 = vmatmul.msk.bf16.gmra.mxu1 %vm138_vm1, %v5895_v22  ;;  %v2170_v25 = vmul.f32 %v2155_v10, %v5811_v21 }
 0xef5   :  { %v2159_v35 = vmul.f32 0.5, %v2158_v56  ;;  %4330 = vmatmul.msk.bf16.gmra.mxu2 %vm138_vm1, %v5895_v22 }
 0xef6   :  { %v2179_v42 = vmul.f32 %v5848_v2, %v2170_v25 }
 0xef7   :  { %v2160_v4 = vsub.f32 1.5, %v2159_v35 }
 0xef8   :  { %v2188_v14 = vadd.f32 %v5854_v55, %v2179_v42 }
 0xef9   :  { %v2161_v7 = vmul.f32 %v4859_v57, %v2160_v4 }
 0xefb   :  { %v2165_v27 = vsel %vm2164_vm11, %v4859_v57, %v2161_v7 }
 0xefc   :  { %v2171_v5 = vmul.f32 %v2165_v27, %v5818_v31  ;;  %v4644_v27 = vld [vmem:[%s6401_s3 + $0x158] sm:$0xff] }
 0xefe   :  { %v2180_v11 = vmul.f32 %v5848_v2, %v2171_v5 }
 0xf00   :  { %v2189_v1 = vadd.f32 %v5854_v55, %v2180_v11  ;;  %v4643_v11 = vld [vmem:[%s6401_s3 + $0x150] sm:$0xff] }
 0xf02   :  { %v5909_v36 = vpack.c.bf16 %v2189_v1, %v2188_v14 }
 0xf04   :  { %4299 = vmatmul.msk.bf16.gmra.mxu0 %vm138_vm1, %v5909_v36  ;;  %4315 = vmatmul.msk.bf16.gmra.mxu1 %vm138_vm1, %v5909_v36 }
 0xf05   :  { %4331 = vmatmul.msk.bf16.gmra.mxu2 %vm138_vm1, %v5909_v36 }
 0xf14   :  { %4352 = vmatmul.msk.bf16.vlgmr.msra.gmra.mxu1 %vm138_vm1, %v5862_v3 }
 0xf15   :  { %4368 = vmatmul.msk.bf16.vlgmr.msra.gmra.mxu2 %vm138_vm1, %v5862_v3 }
 0xf24   :  { %4353 = vmatmul.msk.bf16.gmra.mxu1 %vm138_vm1, %v5895_v22 }
 0xf25   :  { %4369 = vmatmul.msk.bf16.gmra.mxu2 %vm138_vm1, %v5895_v22 }
 0xf34   :  { %4354 = vmatmul.msk.bf16.gmra.mxu1 %vm138_vm1, %v5909_v36 }
 0xf35   :  { %4370 = vmatmul.msk.bf16.gmra.mxu2 %vm138_vm1, %v5909_v36 }
 0xf61   :  { %v2282_v21 = vpop.f32.mrf.mxu1  ;;  %v2233_v58 = vpop.f32.mrf.mxu0 }
 0xf62   :  { %v2283_v29 = vadd.f32 %v4697_v32, %v2282_v21  ;;  %v2234_v35 = vadd.f32 %v4696_v0, %v2233_v58 }
 0xf68   :  { %v2331_v31 = vpop.f32.mrf.mxu2 }
 0xf69   :  { %v2284_v2 = vpop.f32.mrf.mxu1  ;;  %v2235_v46 = vpop.f32.mrf.mxu0  ;;  %v2332_v19 = vadd.f32 %v4698_v34, %v2331_v31 }
 0xf6a   :  { %v2285_v13 = vadd.f32 %v4697_v32, %v2284_v2  ;;  %v2236_v56 = vadd.f32 %v4696_v0, %v2235_v46 }
 0xf6c   :  { %v2297_v57 = vpack.c.bf16 %v2285_v13, %v2283_v29  ;;  %v2248_v4 = vpack.c.bf16 %v2236_v56, %v2234_v35 }
 0xf6e   :  { %v2359_v28 = vsel %vm453_vm7, %v2297_v57, 0 }
 0xf70   :  { %v2333_v55 = vpop.f32.mrf.mxu2 }
 0xf71   :  { %v2287_v17 = vpop.f32.mrf.mxu1  ;;  %v2334_v40 = vadd.f32 %v4698_v34, %v2333_v55  ;;  %v2238_v50 = vpop.f32.mrf.mxu0  ;;  %v4700_v55 = vld [vmem:[%s6402_s4 + $0x11] ss:$0 sm:$0xff] }
 0xf72   :  { %v2288_v8 = vadd.f32 %v4697_v32, %v2287_v17  ;;  %v2239_v14 = vadd.f32 %v4696_v0, %v2238_v50 }
 0xf73   :  { %v2346_v9 = vpack.c.bf16 %v2334_v40, %v2332_v19 }
 0xf78   :  { %v2336_v23 = vpop.f32.mrf.mxu2 }
 0xf79   :  { %v2289_v24 = vpop.f32.mrf.mxu1  ;;  %v2337_v16 = vadd.f32 %v4698_v34, %v2336_v23  ;;  %v2240_v7 = vpop.f32.mrf.mxu0 }
 0xf7a   :  { %v2290_v63 = vadd.f32 %v4697_v32, %v2289_v24  ;;  %v2241_v42 = vadd.f32 %v4696_v0, %v2240_v7 }
 0xf7c   :  { %v2298_v12 = vpack.c.bf16 %v2290_v63, %v2288_v8  ;;  %v2249_v21 = vpack.c.bf16 %v2241_v42, %v2239_v14 }
 0xf7e   :  { %v2362_v60 = vsel %vm453_vm7, %v2298_v12, 0 }
 0xf80   :  { %v2338_v26 = vpop.f32.mrf.mxu2 }
 0xf81   :  { %v2292_v51 = vpop.f32.mrf.mxu1  ;;  %v2339_v54 = vadd.f32 %v4698_v34, %v2338_v26  ;;  %v2243_v1 = vpop.f32.mrf.mxu0 }
 0xf82   :  { %v2293_v61 = vadd.f32 %v4697_v32, %v2292_v51  ;;  %v2244_v51 = vadd.f32 %v4696_v0, %v2243_v1 }
 0xf83   :  { %v2347_v41 = vpack.c.bf16 %v2339_v54, %v2337_v16 }
 0xf88   :  { %v2341_v39 = vpop.f32.mrf.mxu2 }
 0xf89   :  { %v2294_v15 = vpop.f32.mrf.mxu1  ;;  %v2342_v59 = vadd.f32 %v4698_v34, %v2341_v39  ;;  %v2245_v2 = vpop.f32.mrf.mxu0 }
 0xf8a   :  { %v2295_v44 = vadd.f32 %v4697_v32, %v2294_v15  ;;  %v2246_v17 = vadd.f32 %v4696_v0, %v2245_v2 }
 0xf8c   :  { %v2299_v47 = vpack.c.bf16 %v2295_v44, %v2293_v61  ;;  %v2250_v39 = vpack.c.bf16 %v2246_v17, %v2244_v51 }
 0xf8e   :  { %v2365_v49 = vsel %vm453_vm7, %v2299_v47, 0 }
 0xf8f   :  { %2372 = vmatpush.bf16.xpose.msra.mxu3 %v2365_v49 }
 0xf90   :  { %v2343_v38 = vpop.f32.mrf.mxu2 }
 0xf91   :  { %v2344_v37 = vadd.f32 %v4698_v34, %v2343_v38 }
 0xf93   :  { %v2348_v45 = vpack.c.bf16 %v2344_v37, %v2342_v59 }
 0xf95   :  { %2474 = vmatpush.bf16.msra.mxu0 %v2348_v45 }
 0xf97   :  { %2373 = vmatpush.bf16.xpose.msra.mxu3 %v2362_v60 }
 0xf98   :  { %v2578_v62 = vpop.f32.mrf.mxu2 }
 0xf99   :  { %2475 = vmatpush.bf16.msra.mxu0 %v2347_v41  ;;  %v2579_v49 = vadd.f32 %v4700_v55, %v2578_v62 }
 0xf9d   :  { %2476 = vmatpush.bf16.msra.mxu0 %v2346_v9 }
 0xf9f   :  { %2374 = vmatpush.bf16.xpose.msra.mxu3 %v2359_v28 }
 0xfa0   :  { %v2580_v10 = vpop.f32.mrf.mxu2 }
 0xfa1   :  { %v2581_v47 = vadd.f32 %v4700_v55, %v2580_v10 }
 0xfa3   :  { %v2593_v34 = vpack.c.bf16 %v2581_v47, %v2579_v49 }
 0xfa5   :  { %v2655_v8 = vsel %vm453_vm7, %v2593_v34, 0 }
 0xfa6   :  { %4332 = vmatmul.msk.bf16.vlgmr.msra.gmra.mxu3 %vm453_vm7, %v2248_v4  ;;  %v4701_v4 = vld [vmem:[%s6402_s4 + $0x15] ss:$0 sm:$0xff] }
 0xfa7   :  { %2624 = vmatpush.bf16.msrb.mxu3 %v4644_v27 }
 0xfa8   :  { %v2583_v25 = vpop.f32.mrf.mxu2 }
 0xfa9   :  { %v2584_v44 = vadd.f32 %v4700_v55, %v2583_v25 }
 0xfab   :  { %2625 = vmatpush.bf16.msrb.mxu3 %v4643_v11 }
 0xfb0   :  { %v2585_v5 = vpop.f32.mrf.mxu2 }
 0xfb1   :  { %v2586_v15 = vadd.f32 %v4700_v55, %v2585_v5 }
 0xfb3   :  { %v2594_v58 = vpack.c.bf16 %v2586_v15, %v2584_v44 }
 0xfb5   :  { %v2658_v63 = vsel %vm453_vm7, %v2594_v58, 0 }
 0xfb6   :  { %4333 = vmatmul.msk.bf16.gmra.mxu3 %vm453_vm7, %v2249_v21 }
 0xfb8   :  { %v2588_v31 = vpop.f32.mrf.mxu2 }
 0xfb9   :  { %v2589_v24 = vadd.f32 %v4700_v55, %v2588_v31 }
 0xfc0   :  { %v2590_v23 = vpop.f32.mrf.mxu2 }
 0xfc1   :  { %v2591_v26 = vadd.f32 %v4700_v55, %v2590_v23 }
 0xfc3   :  { %v2595_v32 = vpack.c.bf16 %v2591_v26, %v2589_v24 }
 0xfc5   :  { %v2661_v61 = vsel %vm453_vm7, %v2595_v32, 0 }
 0xfc6   :  { %2668 = vmatpush.bf16.xpose.msrb.mxu0 %v2661_v61  ;;  %4334 = vmatmul.msk.bf16.gmra.mxu3 %vm453_vm7, %v2250_v39 }
 0xfce   :  { %2669 = vmatpush.bf16.xpose.msrb.mxu0 %v2658_v63 }
 0xfd6   :  { %2670 = vmatpush.bf16.xpose.msrb.mxu0 %v2655_v8  ;;  %4384 = vmatmul.msk.bf16.vlgmr.msrb.gmra.mxu3 %vm138_vm1, %v5862_v3 }
 0xfe6   :  { %4385 = vmatmul.msk.bf16.gmra.mxu3 %vm138_vm1, %v5895_v22 }
 0xff6   :  { %4386 = vmatmul.msk.bf16.gmra.mxu3 %vm138_vm1, %v5909_v36 }
0x1029   :  { %v2376_v38 = vpop.f32.mrf.mxu3 }
0x102a   :  { %v2377_v59 = vadd.f32 %v2376_v38, %v5311_v6 }
0x102c   :  { %v2391_v37 = vsel %vm91_vm0, %v2377_v59, -inf }
0x102d   :  { %2392 = vmax.xlane.f32.xlu0 %v2391_v37 }
0x1031   :  { %v2378_v12 = vpop.f32.mrf.mxu3 }
0x1032   :  { %v2379_v54 = vadd.f32 %v2378_v12, %v5311_v6 }
0x1034   :  { %v2394_v45 = vsel %vm91_vm0, %v2379_v54, -inf }
0x1035   :  { %2395 = vmax.xlane.f32.xlu1 %v2394_v45 }
0x1039   :  { %v2381_v46 = vpop.f32.mrf.mxu3 }
0x103a   :  { %v2382_v16 = vadd.f32 %v2381_v46, %v5311_v6 }
0x103c   :  { %v2397_v13 = vsel %vm91_vm0, %v2382_v16, -inf }
0x103d   :  { %2398 = vmax.xlane.f32.xlu2 %v2397_v13 }
0x1041   :  { %v2383_v60 = vpop.f32.mrf.mxu3 }
0x1042   :  { %v2384_v40 = vadd.f32 %v2383_v60, %v5319_v18 }
0x1044   :  { %v2400_v41 = vsel %vm91_vm0, %v2384_v40, -inf }
0x1045   :  { %2401 = vmax.xlane.f32.xlu0 %v2400_v41 }
0x1049   :  { %v2386_v29 = vpop.f32.mrf.mxu3 }
0x104a   :  { %v2387_v62 = vadd.f32 %v2386_v29, %v5319_v18 }
0x104c   :  { %v2403_v19 = vsel %vm91_vm0, %v2387_v62, -inf }
0x104d   :  { %2404 = vmax.xlane.f32.xlu1 %v2403_v19 }
0x1051   :  { %v2388_v57 = vpop.f32.mrf.mxu3 }
0x1052   :  { %v2389_v9 = vadd.f32 %v2388_v57, %v5319_v18 }
0x1054   :  { %v2406_v0 = vsel %vm91_vm0, %v2389_v9, -inf }
0x1055   :  { %2407 = vmax.xlane.f32.xlu2 %v2406_v0 }
0x1059   :  { %v2627_v28 = vpop.f32.mrf.mxu3 }
0x105a   :  { %v2628_v21 = vadd.f32 %v4701_v4, %v2627_v28 }
0x1061   :  { %v2629_v50 = vpop.f32.mrf.mxu3 }
0x1062   :  { %v2630_v14 = vadd.f32 %v4701_v4, %v2629_v50 }
0x1064   :  { %v2642_v31 = vpack.c.bf16 %v2630_v14, %v2628_v21 }
0x1069   :  { %v2632_v56 = vpop.f32.mrf.mxu3 }
0x106a   :  { %v2633_v11 = vadd.f32 %v4701_v4, %v2632_v56 }
0x1071   :  { %v2634_v10 = vpop.f32.mrf.mxu3 }
0x1072   :  { %v2635_v42 = vadd.f32 %v4701_v4, %v2634_v10 }
0x1074   :  { %v2643_v1 = vpack.c.bf16 %v2635_v42, %v2633_v11 }
0x1079   :  { %v2637_v35 = vpop.f32.mrf.mxu3 }
0x107a   :  { %v2638_v7 = vadd.f32 %v4701_v4, %v2637_v35 }
0x1081   :  { %v2639_v25 = vpop.f32.mrf.mxu3 }
0x1082   :  { %v2640_v27 = vadd.f32 %v4701_v4, %v2639_v25 }
0x1084   :  { %v2644_v5 = vpack.c.bf16 %v2640_v27, %v2638_v7 }
0x1086   :  { %2770 = vmatpush.bf16.msrb.mxu1 %v2644_v5  ;;  %v2529_v5 = vpop.f32.mrf.mxu1 }
0x108a   :  { %2771 = vmatpush.bf16.msrb.mxu1 %v2643_v1 }
0x108e   :  { %2772 = vmatpush.bf16.msrb.mxu1 %v2642_v31 }
0x10a0   :  { %v2393_v2 = vpop.xlane.xlu0 %2392 }
0x10a1   :  { %v2409_v55 = vsub.f32 %v2377_v59, %v2393_v2  ;;  %v2531_v2 = vpop.f32.mrf.mxu1 }
0x10a3   :  { %v2415_v17 = vmul.f32 1.442695, %v2409_v55  ;;  %v4699_v55 = vld [vmem:[%s6402_s4 + $0xd] ss:$0 sm:$0xff] }
0x10a5   :  { %4860 = vpow2.f32 %v2415_v17 }
0x10a8   :  { %v2396_v23 = vpop.xlane.xlu1 %2395 }
0x10a9   :  { %v2410_v24 = vsub.f32 %v2379_v54, %v2396_v23  ;;  %v2534_v17 = vpop.f32.mrf.mxu1  ;;  %v2532_v23 = vadd.f32 %v4699_v55, %v2531_v2 }
0x10ab   :  { %v4861_v26 = vpop.eup %4860  ;;  %v2417_v51 = vmul.f32 1.442695, %v2410_v24  ;;  %v2530_v24 = vadd.f32 %v4699_v55, %v2529_v5 }
0x10ac   :  { %v2427_v32 = vsel %vm91_vm0, %v4861_v26, 0.0 }
0x10ad   :  { %4862 = vpow2.f32 %v2417_v51  ;;  %2428 = vadd.xlane.f32.xlu0 %v2427_v32  ;;  %v4646_v51 = vld [vmem:[%s6401_s3 + $0xe8] sm:$0xff]  ;;  %v4645_v32 = vld [vmem:[%s6401_s3 + $0xe0] sm:$0xff] }
0x10b0   :  { %v2399_v39 = vpop.xlane.xlu2 %2398 }
0x10b1   :  { %v2411_v15 = vsub.f32 %v2382_v16, %v2399_v39  ;;  %v2536_v39 = vpop.f32.mrf.mxu1 }
0x10b3   :  { %v4863_v61 = vpop.eup %4862  ;;  %v2419_v44 = vmul.f32 1.442695, %v2411_v15  ;;  %v2537_v15 = vadd.f32 %v4699_v55, %v2536_v39 }
0x10b4   :  { %v2430_v58 = vsel %vm91_vm0, %v4863_v61, 0.0 }
0x10b5   :  { %4864 = vpow2.f32 %v2419_v44  ;;  %2431 = vadd.xlane.f32.xlu1 %v2430_v58 }
0x10b8   :  { %v2402_v47 = vpop.xlane.xlu0 %2401 }
0x10b9   :  { %v2412_v63 = vsub.f32 %v2384_v40, %v2402_v47  ;;  %v2539_v44 = vpop.f32.mrf.mxu1 }
0x10bb   :  { %v4865_v49 = vpop.eup %4864  ;;  %v2421_v34 = vmul.f32 1.442695, %v2412_v63 }
0x10bc   :  { %v2433_v8 = vsel %vm91_vm0, %v4865_v49, 0.0 }
0x10bd   :  { %4866 = vpow2.f32 %v2421_v34  ;;  %2434 = vadd.xlane.f32.xlu2 %v2433_v8  ;;  %v4338_v8 = vld [vmem:[%s6403_s5 + $0x10] sm:$0xf] }
0x10c0   :  { %v2405_v38 = vpop.xlane.xlu1 %2404 }
0x10c1   :  { %v2413_v59 = vsub.f32 %v2387_v62, %v2405_v38  ;;  %v2541_v47 = vpop.f32.mrf.mxu1  ;;  %v2840_v38 = vsel %vm907_vm12, %v4338_v8, 0 }
0x10c2   :  { %v2542_v63 = vadd.f32 %v4699_v55, %v2541_v47  ;;  %2849 = vmatpush.bf16.msra.mxu3 %v2840_v38 }
0x10c3   :  { %v4867_v37 = vpop.eup %4866  ;;  %v2423_v12 = vmul.f32 1.442695, %v2413_v59 }
0x10c4   :  { %v2436_v54 = vsel %vm91_vm0, %v4867_v37, 0.0 }
0x10c5   :  { %4868 = vpow2.f32 %v2423_v12  ;;  %2437 = vadd.xlane.f32.xlu0 %v2436_v54 }
0x10c8   :  { %v2408_v45 = vpop.xlane.xlu2 %2407 }
0x10c9   :  { %v2414_v46 = vsub.f32 %v2389_v9, %v2408_v45 }
0x10cb   :  { %v4869_v16 = vpop.eup %4868  ;;  %v2425_v13 = vmul.f32 1.442695, %v2414_v46 }
0x10cc   :  { %v2439_v60 = vsel %vm91_vm0, %v4869_v16, 0.0 }
0x10cd   :  { %4870 = vpow2.f32 %v2425_v13  ;;  %2440 = vadd.xlane.f32.xlu1 %v2439_v60 }
0x10d3   :  { %v4871_v40 = vpop.eup %4870 }
0x10d4   :  { %v2442_v41 = vsel %vm91_vm0, %v4871_v40, 0.0 }
0x10d5   :  { %2443 = vadd.xlane.f32.xlu2 %v2442_v41 }
0x1120   :  { %v2429_v29 = vpop.xlane.xlu0 %2428 }
0x1121   :  { %4872 = vrcp.f32 %v2429_v29 }
0x1127   :  { %v4873_v19 = vpop.eup %4872 }
0x1128   :  { %v2432_v62 = vpop.xlane.xlu1 %2431  ;;  %v2451_v0 = vmul.f32 %v4873_v19, %v4861_v26  ;;  %v2544_v26 = vpack.c.bf16 %v2532_v23, %v2530_v24 }
0x1129   :  { %4874 = vrcp.f32 %v2432_v62 }
0x112f   :  { %v4875_v57 = vpop.eup %4874 }
0x1130   :  { %v2452_v28 = vmul.f32 %v4875_v57, %v4863_v61  ;;  %v2435_v9 = vpop.xlane.xlu2 %2434  ;;  %v2535_v61 = vadd.f32 %v4699_v55, %v2534_v17 }
0x1131   :  { %4876 = vrcp.f32 %v2435_v9 }
0x1132   :  { %v2457_v50 = vpack.c.bf16 %v2452_v28, %v2451_v0  ;;  %v2545_v58 = vpack.c.bf16 %v2537_v15, %v2535_v61 }
0x1134   :  { %4335 = vmatmul.msk.bf16.vlgmr.msra.gmra.mxu0 %vm91_vm0, %v2457_v50 }
0x1135   :  { %2894 = vmatpush.bf16.msra.mxu0 %v4646_v51 }
0x1137   :  { %v4877_v10 = vpop.eup %4876 }
0x1138   :  { %v2438_v56 = vpop.xlane.xlu0 %2437  ;;  %v2453_v4 = vmul.f32 %v4877_v10, %v4865_v49  ;;  %v2540_v49 = vadd.f32 %v4699_v55, %v2539_v44 }
0x1139   :  { %4878 = vrcp.f32 %v2438_v56  ;;  %2895 = vmatpush.bf16.msra.mxu0 %v4645_v32 }
0x113a   :  { %v2546_v34 = vpack.c.bf16 %v2542_v63, %v2540_v49 }
0x113f   :  { %v4879_v35 = vpop.eup %4878 }
0x1140   :  { %v2454_v25 = vmul.f32 %v4879_v35, %v4867_v37  ;;  %v2441_v27 = vpop.xlane.xlu1 %2440 }
0x1141   :  { %4880 = vrcp.f32 %v2441_v27 }
0x1142   :  { %v2458_v7 = vpack.c.bf16 %v2454_v25, %v2453_v4 }
0x1144   :  { %4336 = vmatmul.msk.bf16.gmra.mxu0 %vm91_vm0, %v2458_v7 }
0x1147   :  { %v4881_v11 = vpop.eup %4880 }
0x1148   :  { %v2444_v42 = vpop.xlane.xlu2 %2443  ;;  %v2455_v1 = vmul.f32 %v4881_v11, %v4869_v16 }
0x1149   :  { %4882 = vrcp.f32 %v2444_v42 }
0x114f   :  { %v4883_v14 = vpop.eup %4882 }
0x1150   :  { %v2456_v21 = vmul.f32 %v4883_v14, %v4871_v40 }
0x1152   :  { %v2459_v31 = vpack.c.bf16 %v2456_v21, %v2455_v1 }
0x1154   :  { %4337 = vmatmul.msk.bf16.gmra.mxu0 %vm91_vm0, %v2459_v31 }
0x1164   :  { %4387 = vmatmul.msk.bf16.vlgmr.msrb.gmra.mxu0 %vm453_vm7, %v2544_v26 }
0x1174   :  { %4388 = vmatmul.msk.bf16.gmra.mxu0 %vm453_vm7, %v2545_v58 }
0x1184   :  { %4389 = vmatmul.msk.bf16.gmra.mxu0 %vm453_vm7, %v2546_v34 }
0x1194   :  { %4413 = vmatmul.msk.bf16.vlgmr.msra.gmra.mxu0 %vm138_vm1, %v5862_v3 }
0x11a4   :  { %4414 = vmatmul.msk.bf16.gmra.mxu0 %vm138_vm1, %v5895_v22 }
0x11b1   :  { %v2478_v59 = vpop.f32.mrf.mxu0 }
0x11b4   :  { %4415 = vmatmul.msk.bf16.gmra.mxu0 %vm138_vm1, %v5909_v36 }
0x11b9   :  { %v2480_v37 = vpop.f32.mrf.mxu0 }
0x11ba   :  { %v2493_v12 = vpack.c.bf16 %v2480_v37, %v2478_v59 }
0x11bc   :  { %4397 = vmatmul.msk.bf16.vlgmr.msra.gmra.mxu3 %vm453_vm7, %v2493_v12 }
0x11c1   :  { %v2483_v54 = vpop.f32.mrf.mxu0 }
0x11c9   :  { %v2485_v45 = vpop.f32.mrf.mxu0 }
0x11ca   :  { %v2494_v46 = vpack.c.bf16 %v2485_v45, %v2483_v54 }
0x11cc   :  { %4398 = vmatmul.msk.bf16.gmra.mxu3 %vm453_vm7, %v2494_v46 }
0x11d1   :  { %v2488_v16 = vpop.f32.mrf.mxu0 }
0x11d9   :  { %v2490_v13 = vpop.f32.mrf.mxu0 }
0x11da   :  { %v2495_v60 = vpack.c.bf16 %v2490_v13, %v2488_v16 }
0x11dc   :  { %4399 = vmatmul.msk.bf16.gmra.mxu3 %vm453_vm7, %v2495_v60 }
0x11e1   :  { %v2672_v40 = vpop.f32.mrf.mxu0 }
0x11e2   :  { %v2673_v41 = vadd.f32 %v2672_v40, %v5311_v6 }
0x11e4   :  { %v2687_v29 = vsel %vm91_vm0, %v2673_v41, -inf }
0x11e5   :  { %2688 = vmax.xlane.f32.xlu0 %v2687_v29  ;;  %v4648_v29 = vld [vmem:[%s6401_s3 + $0x128] sm:$0xff] }
0x11e6   :  { %2943 = vmatpush.bf16.msra.mxu1 %v4648_v29  ;;  %v4702_v29 = vld [vmem:[%s6402_s4 + $0xe] ss:$0 sm:$0xff] }
0x11e9   :  { %v2674_v62 = vpop.f32.mrf.mxu0 }
0x11ea   :  { %v2675_v19 = vadd.f32 %v2674_v62, %v5311_v6 }
0x11ec   :  { %v2690_v57 = vsel %vm91_vm0, %v2675_v19, -inf }
0x11ed   :  { %2691 = vmax.xlane.f32.xlu1 %v2690_v57  ;;  %v4647_v57 = vld [vmem:[%s6401_s3 + $0x120] sm:$0xff] }
0x11ee   :  { %2944 = vmatpush.bf16.msra.mxu1 %v4647_v57 }
0x11f1   :  { %v2677_v0 = vpop.f32.mrf.mxu0 }
0x11f2   :  { %v2678_v28 = vadd.f32 %v2677_v0, %v5311_v6 }
0x11f4   :  { %v2693_v50 = vsel %vm91_vm0, %v2678_v28, -inf }
0x11f5   :  { %2694 = vmax.xlane.f32.xlu2 %v2693_v50 }
0x11f9   :  { %v2679_v9 = vpop.f32.mrf.mxu0 }
0x11fa   :  { %v2680_v56 = vadd.f32 %v2679_v9, %v5319_v18 }
0x11fc   :  { %v2696_v10 = vsel %vm91_vm0, %v2680_v56, -inf }
0x11fd   :  { %2697 = vmax.xlane.f32.xlu0 %v2696_v10 }
0x1201   :  { %v2682_v35 = vpop.f32.mrf.mxu0 }
0x1202   :  { %v2683_v4 = vadd.f32 %v2682_v35, %v5319_v18 }
0x1204   :  { %v2699_v25 = vsel %vm91_vm0, %v2683_v4, -inf }
0x1205   :  { %2700 = vmax.xlane.f32.xlu1 %v2699_v25 }
0x1209   :  { %v2684_v7 = vpop.f32.mrf.mxu0 }
0x120a   :  { %v2685_v27 = vadd.f32 %v2684_v7, %v5319_v18 }
0x120c   :  { %v2702_v42 = vsel %vm91_vm0, %v2685_v27, -inf }
0x120d   :  { %2703 = vmax.xlane.f32.xlu2 %v2702_v42 }
0x1258   :  { %v2689_v5 = vpop.xlane.xlu0 %2688 }
0x1259   :  { %v2705_v11 = vsub.f32 %v2673_v41, %v2689_v5 }
0x125b   :  { %v2711_v14 = vmul.f32 1.442695, %v2705_v11  ;;  %v4393_v11 = vld [vmem:[%s6403_s5 + $0x14] sm:$0xf] }
0x125d   :  { %4884 = vpow2.f32 %v2711_v14  ;;  %v2804_v14 = vsel %vm907_vm12, %v4393_v11, 0 }
0x125e   :  { %2813 = vmatpush.bf16.msrb.mxu2 %v2804_v14 }
0x1260   :  { %v2692_v1 = vpop.xlane.xlu1 %2691 }
0x1261   :  { %v2706_v21 = vsub.f32 %v2675_v19, %v2692_v1 }
0x1263   :  { %v4885_v31 = vpop.eup %4884  ;;  %v2713_v2 = vmul.f32 1.442695, %v2706_v21 }
0x1264   :  { %v2723_v55 = vsel %vm91_vm0, %v4885_v31, 0.0 }
0x1265   :  { %4886 = vpow2.f32 %v2713_v2  ;;  %2724 = vadd.xlane.f32.xlu0 %v2723_v55  ;;  %v4650_v55 = vld [vmem:[%s6401_s3 + $0x168] sm:$0xff] }
0x1266   :  { %2992 = vmatpush.bf16.msra.mxu2 %v4650_v55  ;;  %v6109_v55 = vpop.f32.mrf.mxu3 }
0x1268   :  { %v2695_v17 = vpop.xlane.xlu2 %2694 }
0x1269   :  { %v2707_v23 = vsub.f32 %v2678_v28, %v2695_v17  ;;  %v4649_v17 = vld [vmem:[%s6401_s3 + $0x160] sm:$0xff] }
0x126a   :  { %2993 = vmatpush.bf16.msra.mxu2 %v4649_v17 }
0x126b   :  { %v4887_v24 = vpop.eup %4886  ;;  %v2715_v26 = vmul.f32 1.442695, %v2707_v23 }
0x126c   :  { %v2726_v51 = vsel %vm91_vm0, %v4887_v24, 0.0 }
0x126d   :  { %4888 = vpow2.f32 %v2715_v26  ;;  %2727 = vadd.xlane.f32.xlu1 %v2726_v51 }
0x1270   :  { %v2698_v32 = vpop.xlane.xlu0 %2697 }
0x1271   :  { %v2708_v39 = vsub.f32 %v2680_v56, %v2698_v32 }
0x1273   :  { %v4889_v15 = vpop.eup %4888  ;;  %v2717_v61 = vmul.f32 1.442695, %v2708_v39 }
0x1274   :  { %v2729_v44 = vsel %vm91_vm0, %v4889_v15, 0.0 }
0x1275   :  { %4890 = vpow2.f32 %v2717_v61  ;;  %2730 = vadd.xlane.f32.xlu2 %v2729_v44  ;;  %v4652_v61 = vld [vmem:[%s6401_s3 + $0xf8] sm:$0xff] }
0x1278   :  { %v2701_v58 = vpop.xlane.xlu1 %2700 }
0x1279   :  { %v2709_v47 = vsub.f32 %v2683_v4, %v2701_v58  ;;  %v4651_v58 = vld [vmem:[%s6401_s3 + $0xf0] sm:$0xff] }
0x127b   :  { %v4891_v63 = vpop.eup %4890  ;;  %v2719_v49 = vmul.f32 1.442695, %v2709_v47 }
0x127c   :  { %v2732_v34 = vsel %vm91_vm0, %v4891_v63, 0.0 }
0x127d   :  { %4892 = vpow2.f32 %v2719_v49  ;;  %2733 = vadd.xlane.f32.xlu0 %v2732_v34  ;;  %v4703_v49 = vld [vmem:[%s6402_s4 + $0x12] ss:$0 sm:$0xff] }
0x1280   :  { %v2704_v8 = vpop.xlane.xlu2 %2703 }
0x1281   :  { %v2710_v38 = vsub.f32 %v2685_v27, %v2704_v8 }
0x1283   :  { %v4893_v59 = vpop.eup %4892  ;;  %v2721_v37 = vmul.f32 1.442695, %v2710_v38 }
0x1284   :  { %v2735_v12 = vsel %vm91_vm0, %v4893_v59, 0.0 }
0x1285   :  { %4894 = vpow2.f32 %v2721_v37  ;;  %2736 = vadd.xlane.f32.xlu1 %v2735_v12 }
0x128b   :  { %v4895_v54 = vpop.eup %4894 }
0x128c   :  { %v2738_v45 = vsel %vm91_vm0, %v4895_v54, 0.0 }
0x128d   :  { %2739 = vadd.xlane.f32.xlu2 %v2738_v45 }
0x12d8   :  { %v2725_v46 = vpop.xlane.xlu0 %2724 }
0x12d9   :  { %4896 = vrcp.f32 %v2725_v46 }
0x12df   :  { %v4897_v13 = vpop.eup %4896 }
0x12e0   :  { %v2728_v16 = vpop.xlane.xlu1 %2727  ;;  %v2747_v40 = vmul.f32 %v4897_v13, %v4885_v31 }
0x12e1   :  { %4898 = vrcp.f32 %v2728_v16 }
0x12e7   :  { %v4899_v60 = vpop.eup %4898 }
0x12e8   :  { %v2748_v41 = vmul.f32 %v4899_v60, %v4887_v24  ;;  %v2731_v19 = vpop.xlane.xlu2 %2730 }
0x12e9   :  { %4900 = vrcp.f32 %v2731_v19 }
0x12ea   :  { %v2753_v62 = vpack.c.bf16 %v2748_v41, %v2747_v40 }
0x12ec   :  { %4390 = vmatmul.msk.bf16.vlgmr.msrb.gmra.mxu1 %vm91_vm0, %v2753_v62 }
0x12ef   :  { %v4901_v28 = vpop.eup %4900 }
0x12f0   :  { %v2734_v0 = vpop.xlane.xlu0 %2733  ;;  %v2749_v9 = vmul.f32 %v4901_v28, %v4889_v15 }
0x12f1   :  { %4902 = vrcp.f32 %v2734_v0 }
0x12f7   :  { %v4903_v50 = vpop.eup %4902 }
0x12f8   :  { %v2750_v56 = vmul.f32 %v4903_v50, %v4891_v63  ;;  %v2737_v35 = vpop.xlane.xlu1 %2736 }
0x12f9   :  { %4904 = vrcp.f32 %v2737_v35 }
0x12fa   :  { %v2754_v10 = vpack.c.bf16 %v2750_v56, %v2749_v9  ;;  %v4654_v9 = vld [vmem:[%s6401_s3 + $0x138] sm:$0xff] }
0x12fc   :  { %4391 = vmatmul.msk.bf16.gmra.mxu1 %vm91_vm0, %v2754_v10  ;;  %v4653_v10 = vld [vmem:[%s6401_s3 + $0x130] sm:$0xff] }
0x12ff   :  { %v4905_v25 = vpop.eup %4904 }
0x1300   :  { %v2740_v4 = vpop.xlane.xlu2 %2739  ;;  %v2751_v27 = vmul.f32 %v4905_v25, %v4893_v59  ;;  %v2897_v59 = vpop.f32.mrf.mxu0 }
0x1301   :  { %4906 = vrcp.f32 %v2740_v4  ;;  %v2898_v0 = vadd.f32 %v4702_v29, %v2897_v59 }
0x1307   :  { %v4907_v7 = vpop.eup %4906 }
0x1308   :  { %v2752_v42 = vmul.f32 %v4907_v7, %v4895_v54  ;;  %v2899_v16 = vpop.f32.mrf.mxu0 }
0x1309   :  { %v2900_v57 = vadd.f32 %v4702_v29, %v2899_v16 }
0x130a   :  { %v2755_v5 = vpack.c.bf16 %v2752_v42, %v2751_v27 }
0x130b   :  { %v2912_v28 = vpack.c.bf16 %v2900_v57, %v2898_v0 }
0x130c   :  { %4392 = vmatmul.msk.bf16.gmra.mxu1 %vm91_vm0, %v2755_v5 }
0x1310   :  { %v2902_v19 = vpop.f32.mrf.mxu0 }
0x1311   :  { %v2903_v35 = vadd.f32 %v4702_v29, %v2902_v19 }
0x1318   :  { %v2904_v50 = vpop.f32.mrf.mxu0 }
0x1319   :  { %v2905_v56 = vadd.f32 %v4702_v29, %v2904_v50 }
0x131b   :  { %v2913_v25 = vpack.c.bf16 %v2905_v56, %v2903_v35 }
0x131c   :  { %4429 = vmatmul.msk.bf16.vlgmr.msra.gmra.mxu1 %vm138_vm1, %v5862_v3 }
0x1320   :  { %v2907_v4 = vpop.f32.mrf.mxu0 }
0x1321   :  { %v2908_v5 = vadd.f32 %v4702_v29, %v2907_v4 }
0x1328   :  { %v2909_v7 = vpop.f32.mrf.mxu0 }
0x1329   :  { %v2910_v42 = vadd.f32 %v4702_v29, %v2909_v7  ;;  %v4454_v7 = vld [vmem:[%s6403_s5 + $0x18] sm:$0xf] }
0x132b   :  { %v2914_v11 = vpack.c.bf16 %v2910_v42, %v2908_v5  ;;  %v3172_v42 = vsel %vm907_vm12, %v4454_v7, 0 }
0x132c   :  { %4430 = vmatmul.msk.bf16.gmra.mxu1 %vm138_vm1, %v5895_v22 }
0x132d   :  { %3181 = vmatpush.bf16.msrb.mxu1 %v3172_v42 }
0x133c   :  { %4431 = vmatmul.msk.bf16.gmra.mxu1 %vm138_vm1, %v5909_v36 }
0x1369   :  { %v2774_v1 = vpop.f32.mrf.mxu1 }
0x1371   :  { %v2776_v21 = vpop.f32.mrf.mxu1 }
0x1372   :  { %v2789_v31 = vpack.c.bf16 %v2776_v21, %v2774_v1 }
0x1374   :  { %4394 = vmatmul.msk.bf16.vlgmr.msrb.gmra.mxu2 %vm453_vm7, %v2789_v31 }
0x1375   :  { %3232 = vmatpush.bf16.msrb.mxu2 %v4652_v61  ;;  %v4704_v61 = vld [vmem:[%s6402_s4 + $0x16] ss:$0 sm:$0xff] }
0x1379   :  { %v2779_v2 = vpop.f32.mrf.mxu1  ;;  %3233 = vmatpush.bf16.msrb.mxu2 %v4651_v58 }
0x1381   :  { %v2781_v23 = vpop.f32.mrf.mxu1 }
0x1382   :  { %v2790_v24 = vpack.c.bf16 %v2781_v23, %v2779_v2 }
0x1384   :  { %4395 = vmatmul.msk.bf16.gmra.mxu2 %vm453_vm7, %v2790_v24  ;;  %v6113_v24 = vpop.f32.mrf.mxu3 }
0x1389   :  { %v2784_v26 = vpop.f32.mrf.mxu1 }
0x1391   :  { %v2786_v51 = vpop.f32.mrf.mxu1 }
0x1392   :  { %v2791_v32 = vpack.c.bf16 %v2786_v51, %v2784_v26  ;;  %v6115_v51 = vpop.f32.mrf.mxu3 }
0x1394   :  { %4396 = vmatmul.msk.bf16.gmra.mxu2 %vm453_vm7, %v2791_v32 }
0x1399   :  { %v2946_v39 = vpop.f32.mrf.mxu1 }
0x139a   :  { %v2947_v40 = vadd.f32 %v4703_v49, %v2946_v39  ;;  %v6117_v39 = vpop.f32.mrf.mxu3 }
0x13a1   :  { %v2948_v15 = vpop.f32.mrf.mxu1 }
0x13a2   :  { %v2949_v13 = vadd.f32 %v4703_v49, %v2948_v15 }
0x13a4   :  { %4445 = vmatmul.msk.bf16.vlgmr.msra.gmra.mxu2 %vm138_vm1, %v5862_v3  ;;  %v2961_v41 = vpack.c.bf16 %v2949_v13, %v2947_v40 }
0x13a6   :  { %v3023_v62 = vsel %vm453_vm7, %v2961_v41, 0 }
0x13a9   :  { %v2951_v44 = vpop.f32.mrf.mxu1 }
0x13aa   :  { %v2952_v45 = vadd.f32 %v4703_v49, %v2951_v44  ;;  %v6122_v44 = vpop.f32.mrf.mxu3 }
0x13b1   :  { %v2953_v47 = vpop.f32.mrf.mxu1 }
0x13b2   :  { %v2954_v12 = vadd.f32 %v4703_v49, %v2953_v47 }
0x13b4   :  { %4446 = vmatmul.msk.bf16.gmra.mxu2 %vm138_vm1, %v5895_v22  ;;  %v2962_v46 = vpack.c.bf16 %v2954_v12, %v2952_v45  ;;  %v6124_v12 = vpop.f32.mrf.mxu3 }
0x13b6   :  { %v3026_v60 = vsel %vm453_vm7, %v2962_v46, 0 }
0x13b9   :  { %v2956_v63 = vpop.f32.mrf.mxu1 }
0x13ba   :  { %v2957_v8 = vadd.f32 %v4703_v49, %v2956_v63 }
0x13c1   :  { %v2958_v34 = vpop.f32.mrf.mxu1 }
0x13c2   :  { %v2959_v38 = vadd.f32 %v4703_v49, %v2958_v34 }
0x13c4   :  { %v2963_v37 = vpack.c.bf16 %v2959_v38, %v2957_v8  ;;  %4447 = vmatmul.msk.bf16.gmra.mxu2 %vm138_vm1, %v5909_v36 }
0x13c6   :  { %v3029_v54 = vsel %vm453_vm7, %v2963_v37, 0 }
0x13c7   :  { %3036 = vmatpush.bf16.xpose.msrb.mxu3 %v3029_v54 }
0x13cf   :  { %3037 = vmatpush.bf16.xpose.msrb.mxu3 %v3026_v60 }
0x13d4   :  { %4471 = vmatmul.msk.bf16.vlgmr.msrb.gmra.mxu2 %vm138_vm1, %v5862_v3 }
0x13d7   :  { %3038 = vmatpush.bf16.xpose.msrb.mxu3 %v3023_v62 }
0x13de   :  { %4448 = vmatmul.msk.bf16.vlgmr.msrb.gmra.mxu3 %vm453_vm7, %v2912_v28 }
0x13df   :  { %3281 = vmatpush.bf16.msra.mxu3 %v4654_v9 }
0x13e3   :  { %3282 = vmatpush.bf16.msra.mxu3 %v4653_v10 }
0x13e4   :  { %4472 = vmatmul.msk.bf16.gmra.mxu2 %vm138_vm1, %v5895_v22 }
0x13ee   :  { %4449 = vmatmul.msk.bf16.gmra.mxu3 %vm453_vm7, %v2913_v25 }
0x13f4   :  { %4473 = vmatmul.msk.bf16.gmra.mxu2 %vm138_vm1, %v5909_v36 }
0x13f7   :  { %v6092_v27 = vpop.f32.mrf.mxu2 }
0x13fe   :  { %4450 = vmatmul.msk.bf16.gmra.mxu3 %vm453_vm7, %v2914_v11 }
0x13ff   :  { %v6095_v14 = vpop.f32.mrf.mxu2 }
0x1407   :  { %v6097_v1 = vpop.f32.mrf.mxu2 }
0x140e   :  { %4487 = vmatmul.msk.bf16.vlgmr.msra.gmra.mxu3 %vm138_vm1, %v5862_v3 }
0x140f   :  { %v6101_v21 = vpop.f32.mrf.mxu2 }
0x1417   :  { %v6103_v31 = vpop.f32.mrf.mxu2 }
0x141e   :  { %4488 = vmatmul.msk.bf16.gmra.mxu3 %vm138_vm1, %v5895_v22 }
0x141f   :  { %v6107_v2 = vpop.f32.mrf.mxu2 }
0x1427   :  { %v2995_v17 = vpop.f32.mrf.mxu2 }
0x1428   :  { %v2996_v37 = vadd.f32 %v4704_v61, %v2995_v17 }
0x142e   :  { %4489 = vmatmul.msk.bf16.gmra.mxu3 %vm138_vm1, %v5909_v36 }
0x142f   :  { %v2997_v23 = vpop.f32.mrf.mxu2 }
0x1430   :  { %v2998_v38 = vadd.f32 %v4704_v61, %v2997_v23  ;;  %v4706_v23 = vld [vmem:[%s6402_s4 + $0x13] ss:$0 sm:$0xff] }
0x1432   :  { %v3010_v54 = vpack.c.bf16 %v2998_v38, %v2996_v37 }
0x1437   :  { %v3000_v26 = vpop.f32.mrf.mxu2 }
0x1438   :  { %v3001_v8 = vadd.f32 %v4704_v61, %v3000_v26 }
0x143f   :  { %v3002_v32 = vpop.f32.mrf.mxu2 }
0x1440   :  { %v3003_v49 = vadd.f32 %v4704_v61, %v3002_v32 }
0x1442   :  { %v3011_v59 = vpack.c.bf16 %v3003_v49, %v3001_v8 }
0x1447   :  { %v3005_v15 = vpop.f32.mrf.mxu2 }
0x1448   :  { %v3006_v47 = vadd.f32 %v4704_v61, %v3005_v15 }
0x144f   :  { %v3007_v58 = vpop.f32.mrf.mxu2 }
0x1450   :  { %v3008_v63 = vadd.f32 %v4704_v61, %v3007_v58 }
0x1452   :  { %v3012_v34 = vpack.c.bf16 %v3008_v63, %v3006_v47 }
0x1454   :  { %3138 = vmatpush.bf16.msrb.mxu0 %v3012_v34 }
0x1458   :  { %3139 = vmatpush.bf16.msrb.mxu0 %v3011_v59 }
0x145c   :  { %3140 = vmatpush.bf16.msrb.mxu0 %v3010_v54 }
0x1461   :  { %v3040_v45 = vpop.f32.mrf.mxu3 }
0x1462   :  { %v3041_v46 = vadd.f32 %v3040_v45, %v5311_v6 }
0x1464   :  { %v3055_v16 = vsel %vm91_vm0, %v3041_v46, -inf }
0x1465   :  { %3056 = vmax.xlane.f32.xlu0 %v3055_v16 }
0x1469   :  { %v3042_v13 = vpop.f32.mrf.mxu3 }
0x146a   :  { %v3043_v60 = vadd.f32 %v3042_v13, %v5311_v6 }
0x146c   :  { %v3058_v40 = vsel %vm91_vm0, %v3043_v60, -inf }
0x146d   :  { %3059 = vmax.xlane.f32.xlu1 %v3058_v40 }
0x1471   :  { %v3045_v41 = vpop.f32.mrf.mxu3 }
0x1472   :  { %v3046_v29 = vadd.f32 %v3045_v41, %v5311_v6 }
0x1474   :  { %v3061_v62 = vsel %vm91_vm0, %v3046_v29, -inf }
0x1475   :  { %3062 = vmax.xlane.f32.xlu2 %v3061_v62 }
0x1479   :  { %v3047_v19 = vpop.f32.mrf.mxu3 }
0x147a   :  { %v3048_v57 = vadd.f32 %v3047_v19, %v5319_v18 }
0x147c   :  { %v3064_v0 = vsel %vm91_vm0, %v3048_v57, -inf }
0x147d   :  { %3065 = vmax.xlane.f32.xlu0 %v3064_v0 }
0x1481   :  { %v3050_v28 = vpop.f32.mrf.mxu3 }
0x1482   :  { %v3051_v50 = vadd.f32 %v3050_v28, %v5319_v18 }
0x1484   :  { %v3067_v9 = vsel %vm91_vm0, %v3051_v50, -inf }
0x1485   :  { %3068 = vmax.xlane.f32.xlu1 %v3067_v9 }
0x1489   :  { %v3052_v56 = vpop.f32.mrf.mxu3 }
0x148a   :  { %v6137_v10 = vadd.f32 %v3052_v56, %v5319_v18 }
0x148c   :  { %v3070_v35 = vsel %vm91_vm0, %v6137_v10, -inf }
0x148d   :  { %3071 = vmax.xlane.f32.xlu2 %v3070_v35 }
0x1491   :  { %v3284_v4 = vpop.f32.mrf.mxu3 }
0x1492   :  { %v3285_v38 = vadd.f32 %v4706_v23, %v3284_v4 }
0x1499   :  { %v3286_v25 = vpop.f32.mrf.mxu3 }
0x149a   :  { %v3287_v34 = vadd.f32 %v4706_v23, %v3286_v25 }
0x149c   :  { %v3299_v59 = vpack.c.bf16 %v3287_v34, %v3285_v38 }
0x149e   :  { %v3361_v37 = vsel %vm453_vm7, %v3299_v59, 0  ;;  %v4656_v59 = vld [vmem:[%s6401_s3 + $0x178] sm:$0xff] }
0x149f   :  { %3330 = vmatpush.bf16.msra.mxu0 %v4656_v59 }
0x14a1   :  { %v3289_v5 = vpop.f32.mrf.mxu3 }
0x14a2   :  { %v3290_v63 = vadd.f32 %v4706_v23, %v3289_v5 }
0x14a9   :  { %v3291_v11 = vpop.f32.mrf.mxu3 }
0x14aa   :  { %v3292_v58 = vadd.f32 %v4706_v23, %v3291_v11 }
0x14ac   :  { %v3300_v49 = vpack.c.bf16 %v3292_v58, %v3290_v63 }
0x14ae   :  { %v3364_v8 = vsel %vm453_vm7, %v3300_v49, 0 }
0x14b1   :  { %v3294_v17 = vpop.f32.mrf.mxu3 }
0x14b2   :  { %v3295_v32 = vadd.f32 %v4706_v23, %v3294_v17 }
0x14b9   :  { %v3296_v26 = vpop.f32.mrf.mxu3 }
0x14ba   :  { %v3297_v15 = vadd.f32 %v4706_v23, %v3296_v26 }
0x14bc   :  { %v3301_v61 = vpack.c.bf16 %v3297_v15, %v3295_v32 }
0x14be   :  { %v3367_v47 = vsel %vm453_vm7, %v3301_v61, 0 }
0x14bf   :  { %3374 = vmatpush.bf16.xpose.msra.mxu1 %v3367_v47 }
0x14c7   :  { %3375 = vmatpush.bf16.xpose.msra.mxu1 %v3364_v8 }
0x14cf   :  { %3376 = vmatpush.bf16.xpose.msra.mxu1 %v3361_v37  ;;  %v4655_v37 = vld [vmem:[%s6401_s3 + $0x170] sm:$0xff] }
0x14d0   :  { %3331 = vmatpush.bf16.msra.mxu0 %v4655_v37  ;;  %v4707_v37 = vld [vmem:[%s6402_s4 + $0x17] ss:$0 sm:$0xff] }
0x14d8   :  { %v3057_v54 = vpop.xlane.xlu0 %3056 }
0x14d9   :  { %v3073_v45 = vsub.f32 %v3041_v46, %v3057_v54 }
0x14db   :  { %v3079_v16 = vmul.f32 1.442695, %v3073_v45 }
0x14dd   :  { %4908 = vpow2.f32 %v3079_v16 }
0x14e0   :  { %v3060_v13 = vpop.xlane.xlu1 %3059 }
0x14e1   :  { %v3074_v40 = vsub.f32 %v3043_v60, %v3060_v13 }
0x14e3   :  { %v4909_v41 = vpop.eup %4908  ;;  %v3081_v62 = vmul.f32 1.442695, %v3074_v40 }
0x14e4   :  { %v3091_v19 = vsel %vm91_vm0, %v4909_v41, 0.0 }
0x14e5   :  { %4910 = vpow2.f32 %v3081_v62  ;;  %3092 = vadd.xlane.f32.xlu0 %v3091_v19 }
0x14e8   :  { %v3063_v0 = vpop.xlane.xlu2 %3062 }
0x14e9   :  { %v3075_v28 = vsub.f32 %v3046_v29, %v3063_v0 }
0x14eb   :  { %v4911_v9 = vpop.eup %4910  ;;  %v3083_v56 = vmul.f32 1.442695, %v3075_v28 }
0x14ec   :  { %v3094_v35 = vsel %vm91_vm0, %v4911_v9, 0.0 }
0x14ed   :  { %4912 = vpow2.f32 %v3083_v56  ;;  %3095 = vadd.xlane.f32.xlu1 %v3094_v35 }
0x14f0   :  { %v3066_v4 = vpop.xlane.xlu0 %3065 }
0x14f1   :  { %v3076_v46 = vsub.f32 %v3048_v57, %v3066_v4 }
0x14f3   :  { %v4913_v25 = vpop.eup %4912  ;;  %v3085_v7 = vmul.f32 1.442695, %v3076_v46 }
0x14f4   :  { %v3097_v60 = vsel %vm91_vm0, %v4913_v25, 0.0 }
0x14f5   :  { %4914 = vpow2.f32 %v3085_v7  ;;  %3098 = vadd.xlane.f32.xlu2 %v3097_v60 }
0x14f8   :  { %v3069_v42 = vpop.xlane.xlu1 %3068 }
0x14f9   :  { %v3077_v5 = vsub.f32 %v3051_v50, %v3069_v42 }
0x14fb   :  { %v4915_v11 = vpop.eup %4914  ;;  %v3087_v17 = vmul.f32 1.442695, %v3077_v5  ;;  %v3235_v5 = vpop.f32.mrf.mxu2 }
0x14fc   :  { %v3100_v29 = vsel %vm91_vm0, %v4915_v11, 0.0 }
0x14fd   :  { %4916 = vpow2.f32 %v3087_v17  ;;  %3101 = vadd.xlane.f32.xlu0 %v3100_v29 }
0x1500   :  { %v3072_v23 = vpop.xlane.xlu2 %3071 }
0x1501   :  { %v3078_v26 = vsub.f32 %v6137_v10, %v3072_v23 }
0x1503   :  { %v4917_v32 = vpop.eup %4916  ;;  %v3089_v15 = vmul.f32 1.442695, %v3078_v26  ;;  %v3237_v29 = vpop.f32.mrf.mxu2 }
0x1504   :  { %v3103_v57 = vsel %vm91_vm0, %v4917_v32, 0.0 }
0x1505   :  { %4918 = vpow2.f32 %v3089_v15  ;;  %3104 = vadd.xlane.f32.xlu1 %v3103_v57 }
0x150b   :  { %v4919_v61 = vpop.eup %4918  ;;  %v3240_v23 = vpop.f32.mrf.mxu2 }
0x150c   :  { %v3106_v58 = vsel %vm91_vm0, %v4919_v61, 0.0 }
0x150d   :  { %3107 = vadd.xlane.f32.xlu2 %v3106_v58 }
0x1558   :  { %v3093_v50 = vpop.xlane.xlu0 %3092 }
0x1559   :  { %4920 = vrcp.f32 %v3093_v50 }
0x155f   :  { %v4921_v63 = vpop.eup %4920 }
0x1560   :  { %v3096_v47 = vpop.xlane.xlu1 %3095  ;;  %v3115_v34 = vmul.f32 %v4921_v63, %v4909_v41 }
0x1561   :  { %4922 = vrcp.f32 %v3096_v47 }
0x1567   :  { %v4923_v49 = vpop.eup %4922 }
0x1568   :  { %v3116_v8 = vmul.f32 %v4923_v49, %v4911_v9  ;;  %v3099_v10 = vpop.xlane.xlu2 %3098 }
0x1569   :  { %4924 = vrcp.f32 %v3099_v10 }
0x156a   :  { %v3121_v38 = vpack.c.bf16 %v3116_v8, %v3115_v34 }
0x156c   :  { %4451 = vmatmul.msk.bf16.vlgmr.msrb.gmra.mxu0 %vm91_vm0, %v3121_v38 }
0x156f   :  { %v4925_v45 = vpop.eup %4924 }
0x1570   :  { %v3102_v54 = vpop.xlane.xlu0 %3101  ;;  %v3117_v13 = vmul.f32 %v4925_v45, %v4913_v25 }
0x1571   :  { %4926 = vrcp.f32 %v3102_v54 }
0x1577   :  { %v4927_v16 = vpop.eup %4926 }
0x1578   :  { %v3118_v40 = vmul.f32 %v4927_v16, %v4915_v11  ;;  %v3105_v62 = vpop.xlane.xlu1 %3104 }
0x1579   :  { %4928 = vrcp.f32 %v3105_v62 }
0x157a   :  { %v3122_v41 = vpack.c.bf16 %v3118_v40, %v3117_v13 }
0x157c   :  { %4452 = vmatmul.msk.bf16.gmra.mxu0 %vm91_vm0, %v3122_v41 }
0x157f   :  { %v4929_v0 = vpop.eup %4928 }
0x1580   :  { %v3108_v19 = vpop.xlane.xlu2 %3107  ;;  %v3119_v9 = vmul.f32 %v4929_v0, %v4917_v32 }
0x1581   :  { %4930 = vrcp.f32 %v3108_v19 }
0x1587   :  { %v4931_v28 = vpop.eup %4930 }
0x1588   :  { %v3120_v56 = vmul.f32 %v4931_v28, %v4919_v61  ;;  %v3242_v61 = vpop.f32.mrf.mxu2 }
0x158a   :  { %v3123_v35 = vpack.c.bf16 %v3120_v56, %v3119_v9  ;;  %v2852_v56 = vadd.f32 %v6109_v55, %v6092_v27  ;;  %v2862_v27 = vadd.f32 %v6122_v44, %v6103_v31 }
0x158c   :  { %4453 = vmatmul.msk.bf16.gmra.mxu0 %vm91_vm0, %v3123_v35 }
0x1590   :  { %v3245_v63 = vpop.f32.mrf.mxu2 }
0x1598   :  { %v3247_v38 = vpop.f32.mrf.mxu2 }
0x159c   :  { %4503 = vmatmul.msk.bf16.vlgmr.msra.gmra.mxu0 %vm138_vm1, %v5862_v3 }
0x15ac   :  { %4504 = vmatmul.msk.bf16.gmra.mxu0 %vm138_vm1, %v5895_v22 }
0x15bc   :  { %4505 = vmatmul.msk.bf16.gmra.mxu0 %vm138_vm1, %v5909_v36  ;;  %v4705_v36 = vld [vmem:[%s6402_s4 + $0xf] ss:$0 sm:$0xff] }
0x15bd   :  { %v3238_v26 = vadd.f32 %v4705_v36, %v3237_v29  ;;  %v3236_v32 = vadd.f32 %v4705_v36, %v3235_v5  ;;  %v3243_v50 = vadd.f32 %v4705_v36, %v3242_v61  ;;  %v3241_v47 = vadd.f32 %v4705_v36, %v3240_v23 }
0x15be   :  { %v3248_v10 = vadd.f32 %v4705_v36, %v3247_v38  ;;  %v3246_v59 = vadd.f32 %v4705_v36, %v3245_v63 }
0x15bf   :  { %v3250_v57 = vpack.c.bf16 %v3238_v26, %v3236_v32  ;;  %v3251_v34 = vpack.c.bf16 %v3243_v50, %v3241_v47 }
0x15c0   :  { %v3252_v45 = vpack.c.bf16 %v3248_v10, %v3246_v59 }
0x15e9   :  { %v3142_v4 = vpop.f32.mrf.mxu0 }
0x15f1   :  { %v3144_v46 = vpop.f32.mrf.mxu0 }
0x15f2   :  { %v3157_v25 = vpack.c.bf16 %v3144_v46, %v3142_v4 }
0x15f4   :  { %4455 = vmatmul.msk.bf16.vlgmr.msrb.gmra.mxu1 %vm453_vm7, %v3157_v25  ;;  %v2857_v25 = vadd.f32 %v6115_v51, %v6097_v1 }
0x15f9   :  { %v3147_v7 = vpop.f32.mrf.mxu0 }
0x1601   :  { %v3149_v60 = vpop.f32.mrf.mxu0 }
0x1602   :  { %v3158_v42 = vpack.c.bf16 %v3149_v60, %v3147_v7 }
0x1604   :  { %4456 = vmatmul.msk.bf16.gmra.mxu1 %vm453_vm7, %v3158_v42  ;;  %v2859_v42 = vadd.f32 %v6117_v39, %v6101_v21 }
0x1609   :  { %v3152_v11 = vpop.f32.mrf.mxu0 }
0x1611   :  { %v3154_v17 = vpop.f32.mrf.mxu0 }
0x1612   :  { %v3159_v3 = vpack.c.bf16 %v3154_v17, %v3152_v11 }
0x1614   :  { %4457 = vmatmul.msk.bf16.gmra.mxu1 %vm453_vm7, %v3159_v3  ;;  %v2864_v3 = vadd.f32 %v6124_v12, %v6107_v2 }
0x1619   :  { %v3333_v22 = vpop.f32.mrf.mxu0 }
0x161a   :  { %v3334_v28 = vadd.f32 %v4707_v37, %v3333_v22 }
0x1621   :  { %v3335_v15 = vpop.f32.mrf.mxu0 }
0x1622   :  { %v3336_v19 = vadd.f32 %v4707_v37, %v3335_v15 }
0x1624   :  { %4506 = vmatmul.msk.bf16.vlgmr.msra.gmra.mxu1 %vm453_vm7, %v3250_v57  ;;  %v3348_v9 = vpack.c.bf16 %v3336_v19, %v3334_v28 }
0x1629   :  { %v3338_v58 = vpop.f32.mrf.mxu0 }
0x162a   :  { %v3339_v62 = vadd.f32 %v4707_v37, %v3338_v58 }
0x1631   :  { %v3340_v49 = vpop.f32.mrf.mxu0 }
0x1632   :  { %v3341_v40 = vadd.f32 %v4707_v37, %v3340_v49 }
0x1634   :  { %4507 = vmatmul.msk.bf16.gmra.mxu1 %vm453_vm7, %v3251_v34  ;;  %v3349_v0 = vpack.c.bf16 %v3341_v40, %v3339_v62 }
0x1639   :  { %v3343_v8 = vpop.f32.mrf.mxu0 }
0x163a   :  { %v3344_v16 = vadd.f32 %v4707_v37, %v3343_v8 }
0x1641   :  { %v3345_v54 = vpop.f32.mrf.mxu0 }
0x1642   :  { %v3346_v13 = vadd.f32 %v4707_v37, %v3345_v54 }
0x1644   :  { %v3350_v41 = vpack.c.bf16 %v3346_v13, %v3344_v16  ;;  %4508 = vmatmul.msk.bf16.gmra.mxu1 %vm453_vm7, %v3252_v45 }
0x1646   :  { %3476 = vmatpush.bf16.msra.mxu2 %v3350_v41 }
0x164a   :  { %3477 = vmatpush.bf16.msra.mxu2 %v3349_v0 }
0x164e   :  { %3478 = vmatpush.bf16.msra.mxu2 %v3348_v9 }
0x1671   :  { %v3183_v35 = vpop.f32.mrf.mxu1 }
0x1672   :  { %v6187_v4 = vadd.f32 %v3183_v35, %v2852_v56  ;;  %v4512_v35 = vld [vmem:[%s6403_s5 + $0x1c] sm:$0xf] }
0x1679   :  { %v6189_v46 = vpop.f32.mrf.mxu1 }
0x1681   :  { %v3188_v7 = vpop.f32.mrf.mxu1 }
0x1682   :  { %v6193_v60 = vadd.f32 %v3188_v7, %v2857_v25  ;;  %v3510_v25 = vsel %vm907_vm12, %v4512_v35, 0 }
0x1683   :  { %3519 = vmatpush.bf16.msrb.mxu3 %v3510_v25 }
0x1689   :  { %v3190_v5 = vpop.f32.mrf.mxu1 }
0x168a   :  { %v6197_v11 = vadd.f32 %v3190_v5, %v2859_v42 }
0x1691   :  { %v3193_v55 = vpop.f32.mrf.mxu1 }
0x1692   :  { %v6201_v17 = vadd.f32 %v3193_v55, %v2862_v27 }
0x1699   :  { %v3195_v29 = vpop.f32.mrf.mxu1 }
0x169a   :  { %v6205_v1 = vadd.f32 %v3195_v29, %v2864_v3 }
0x16a1   :  { %v3378_v51 = vpop.f32.mrf.mxu1 }
0x16a2   :  { %v3379_v22 = vadd.f32 %v3378_v51, %v5311_v6 }
0x16a4   :  { %v3393_v21 = vsel %vm91_vm0, %v3379_v22, -inf }
0x16a5   :  { %3394 = vmax.xlane.f32.xlu0 %v3393_v21 }
0x16a9   :  { %v3380_v39 = vpop.f32.mrf.mxu1 }
0x16aa   :  { %v3381_v36 = vadd.f32 %v3380_v39, %v5311_v6 }
0x16ac   :  { %v3396_v31 = vsel %vm91_vm0, %v3381_v36, -inf }
0x16ad   :  { %3397 = vmax.xlane.f32.xlu1 %v3396_v31 }
0x16b1   :  { %v3383_v44 = vpop.f32.mrf.mxu1 }
0x16b2   :  { %v3384_v23 = vadd.f32 %v3383_v44, %v5311_v6 }
0x16b4   :  { %v3399_v2 = vsel %vm91_vm0, %v3384_v23, -inf }
0x16b5   :  { %3400 = vmax.xlane.f32.xlu2 %v3399_v2 }
0x16b9   :  { %v3385_v12 = vpop.f32.mrf.mxu1 }
0x16ba   :  { %v3386_v26 = vadd.f32 %v3385_v12, %v5319_v18 }
0x16bc   :  { %v3402_v32 = vsel %vm91_vm0, %v3386_v26, -inf }
0x16bd   :  { %3403 = vmax.xlane.f32.xlu0 %v3402_v32 }
0x16c1   :  { %v3388_v38 = vpop.f32.mrf.mxu1 }
0x16c2   :  { %v3389_v37 = vadd.f32 %v3388_v38, %v5319_v18 }
0x16c4   :  { %v3405_v40 = vsel %vm91_vm0, %v3389_v37, -inf }
0x16c9   :  { %v3390_v62 = vpop.f32.mrf.mxu1 }
0x16ca   :  { %v3391_v19 = vadd.f32 %v3390_v62, %v5319_v18  ;;  %v2854_v62 = vadd.f32 %v6113_v24, %v6095_v14 }
0x16cc   :  { %v3408_v28 = vsel %vm91_vm0, %v3391_v19, -inf }
0x1718   :  { %v3395_v15 = vpop.xlane.xlu0 %3394 }
0x1719   :  { %v3411_v57 = vsub.f32 %v3379_v22, %v3395_v15 }
0x171b   :  { %v3417_v61 = vmul.f32 1.442695, %v3411_v57 }
0x171d   :  { %4932 = vpow2.f32 %v3417_v61 }
0x1720   :  { %v3398_v58 = vpop.xlane.xlu1 %3397 }
0x1721   :  { %v3412_v50 = vsub.f32 %v3381_v36, %v3398_v58 }
0x1723   :  { %v4933_v47 = vpop.eup %4932  ;;  %v3419_v63 = vmul.f32 1.442695, %v3412_v50 }
0x1724   :  { %v3429_v49 = vsel %vm91_vm0, %v4933_v47, 0.0 }
0x1725   :  { %4934 = vpow2.f32 %v3419_v63  ;;  %3430 = vadd.xlane.f32.xlu1 %v3429_v49 }
0x1728   :  { %v3401_v6 = vpop.xlane.xlu2 %3400 }
0x1729   :  { %v3413_v34 = vsub.f32 %v3384_v23, %v3401_v6 }
0x172b   :  { %v4935_v8 = vpop.eup %4934  ;;  %v3421_v10 = vmul.f32 1.442695, %v3413_v34 }
0x172c   :  { %v3432_v59 = vsel %vm91_vm0, %v4935_v8, 0.0 }
0x172d   :  { %4936 = vpow2.f32 %v3421_v10  ;;  %3433 = vadd.xlane.f32.xlu2 %v3432_v59 }
0x1730   :  { %v3404_v54 = vpop.xlane.xlu0 %3403 }
0x1731   :  { %v3414_v45 = vsub.f32 %v3386_v26, %v3404_v54 }
0x1733   :  { %v4937_v16 = vpop.eup %4936  ;;  %v3423_v13 = vmul.f32 1.442695, %v3414_v45 }
0x1734   :  { %v3435_v41 = vsel %vm91_vm0, %v4937_v16, 0.0 }
0x1735   :  { %4938 = vpow2.f32 %v3423_v13  ;;  %3406 = vmax.xlane.f32.xlu2 %v3405_v40  ;;  %3436 = vadd.xlane.f32.xlu0 %v3435_v41  ;;  %v4708_v13 = vld [vmem:[%s6404_s6 + $0xa] ss:$0 sm:$0xff] }
0x173b   :  { %v4939_v0 = vpop.eup %4938 }
0x173c   :  { %v3438_v9 = vsel %vm91_vm0, %v4939_v0, 0.0 }
0x173d   :  { %3409 = vmax.xlane.f32.xlu0 %v3408_v28  ;;  %3439 = vadd.xlane.f32.xlu1 %v3438_v9 }
0x1798   :  { %v3431_v56 = vpop.xlane.xlu1 %3430 }
0x1799   :  { %4940 = vrcp.f32 %v3431_v56 }
0x179f   :  { %v4941_v42 = vpop.eup %4940 }
0x17a0   :  { %v3434_v7 = vpop.xlane.xlu2 %3433  ;;  %v3453_v5 = vmul.f32 %v4941_v42, %v4933_v47 }
0x17a1   :  { %4942 = vrcp.f32 %v3434_v7 }
0x17a7   :  { %v4943_v18 = vpop.eup %4942 }
0x17a8   :  { %v3454_v27 = vmul.f32 %v4943_v18, %v4935_v8  ;;  %v3407_v55 = vpop.xlane.xlu2 %3406  ;;  %v3437_v3 = vpop.xlane.xlu0 %3436 }
0x17a9   :  { %v3415_v29 = vsub.f32 %v3389_v37, %v3407_v55 }
0x17aa   :  { %v3459_v51 = vpack.c.bf16 %v3454_v27, %v3453_v5 }
0x17ab   :  { %v3425_v22 = vmul.f32 1.442695, %v3415_v29 }
0x17ac   :  { %4509 = vmatmul.msk.bf16.vlgmr.msra.gmra.mxu2 %vm91_vm0, %v3459_v51 }
0x17ad   :  { %4944 = vpow2.f32 %v3425_v22 }
0x17ae   :  { %4946 = vrcp.f32 %v3437_v3 }
0x17b0   :  { %v3440_v21 = vpop.xlane.xlu1 %3439  ;;  %v3410_v39 = vpop.xlane.xlu0 %3409 }
0x17b1   :  { %4948 = vrcp.f32 %v3440_v21  ;;  %v3416_v36 = vsub.f32 %v3391_v19, %v3410_v39 }
0x17b3   :  { %v4945_v31 = vpop.eup %4944  ;;  %v3427_v44 = vmul.f32 1.442695, %v3416_v36 }
0x17b4   :  { %v3441_v23 = vsel %vm91_vm0, %v4945_v31, 0.0  ;;  %v4947_v2 = vpop.eup %4946 }
0x17b5   :  { %4950 = vpow2.f32 %v3427_v44  ;;  %3442 = vadd.xlane.f32.xlu1 %v3441_v23  ;;  %v3455_v26 = vmul.f32 %v4947_v2, %v4937_v16 }
0x17b7   :  { %v4949_v12 = vpop.eup %4948 }
0x17b8   :  { %v3456_v32 = vmul.f32 %v4949_v12, %v4939_v0  ;;  %v3199_v0 = vadd.f32 %v6189_v46, %v2854_v62 }
0x17ba   :  { %v3460_v15 = vpack.c.bf16 %v3456_v32, %v3455_v26 }
0x17bb   :  { %v4951_v57 = vpop.eup %4950 }
0x17bc   :  { %4510 = vmatmul.msk.bf16.gmra.mxu2 %vm91_vm0, %v3460_v15  ;;  %v3444_v61 = vsel %vm91_vm0, %v4951_v57, 0.0 }
0x17bd   :  { %3445 = vadd.xlane.f32.xlu2 %v3444_v61 }
0x1828   :  { %v3443_v58 = vpop.xlane.xlu1 %3442 }
0x1829   :  { %4952 = vrcp.f32 %v3443_v58 }
0x182f   :  { %v3480_v50 = vpop.f32.mrf.mxu2  ;;  %v4953_v63 = vpop.eup %4952 }
0x1830   :  { %v3446_v47 = vpop.xlane.xlu2 %3445  ;;  %v3457_v34 = vmul.f32 %v4953_v63, %v4945_v31 }
0x1831   :  { %4954 = vrcp.f32 %v3446_v47 }
0x1837   :  { %v4955_v49 = vpop.eup %4954  ;;  %v3482_v6 = vpop.f32.mrf.mxu2 }
0x1838   :  { %v3458_v8 = vmul.f32 %v4955_v49, %v4951_v57  ;;  %v3495_v38 = vpack.c.bf16 %v3482_v6, %v3480_v50 }
0x183a   :  { %4513 = vmatmul.msk.bf16.vlgmr.msrb.gmra.mxu3 %vm453_vm7, %v3495_v38  ;;  %v3461_v10 = vpack.c.bf16 %v3458_v8, %v3457_v34  ;;  %v4658_v38 = vld [vmem:[%s6405_s7 + $0x18] sm:$0xff] }
0x183b   :  { %3753 = vmatpush.bf16.msrb.mxu0 %v4658_v38 }
0x183c   :  { %4511 = vmatmul.msk.bf16.gmra.mxu2 %vm91_vm0, %v3461_v10 }
0x183f   :  { %v3485_v59 = vpop.f32.mrf.mxu2 }
0x1847   :  { %v3487_v37 = vpop.f32.mrf.mxu2 }
0x1848   :  { %v3496_v54 = vpack.c.bf16 %v3487_v37, %v3485_v59 }
0x184a   :  { %4514 = vmatmul.msk.bf16.gmra.mxu3 %vm453_vm7, %v3496_v54 }
0x18bd   :  { %v3521_v45 = vpop.f32.mrf.mxu3 }
0x18be   :  { %v3536_v16 = vadd.f32 %v3521_v45, %v6187_v4 }
0x18bf   :  { %v3490_v40 = vpop.f32.mrf.mxu2 }
0x18c0   :  { %v3542_v41 = vadd.f32 %v3536_v16, %v5752_v48 }
0x18c2   :  { %v6241_v19 = vadd.f32 %v4708_v13, %v3542_v41 }
0x18c4   :  { %v3563_v28 = vsel %vm138_vm1, %v6241_v19, 0.0 }
0x18c5   :  { %3564 = vadd.xlane.f32.xlu0 %v3563_v28  ;;  %v3523_v9 = vpop.f32.mrf.mxu3 }
0x18c6   :  { %v3537_v4 = vadd.f32 %v3523_v9, %v3199_v0 }
0x18c7   :  { %v3492_v56 = vpop.f32.mrf.mxu2 }
0x18c8   :  { %v3543_v35 = vadd.f32 %v3537_v4, %v5757_v53  ;;  %v3497_v25 = vpack.c.bf16 %v3492_v56, %v3490_v40 }
0x18ca   :  { %4515 = vmatmul.msk.bf16.gmra.mxu3 %vm453_vm7, %v3497_v25  ;;  %v3554_v48 = vadd.f32 %v4708_v13, %v3543_v35 }
0x18cc   :  { %v3566_v7 = vsel %vm138_vm1, %v3554_v48, 0.0 }
0x18cd   :  { %3567 = vadd.xlane.f32.xlu1 %v3566_v7  ;;  %v3526_v14 = vpop.f32.mrf.mxu3 }
0x18ce   :  { %v3538_v24 = vadd.f32 %v3526_v14, %v6193_v60 }
0x18d0   :  { %v3544_v46 = vadd.f32 %v3538_v24, %v5762_v30 }
0x18d2   :  { %v3555_v42 = vadd.f32 %v4708_v13, %v3544_v46 }
0x18d4   :  { %v3569_v18 = vsel %vm138_vm1, %v3555_v42, 0.0 }
0x18d5   :  { %v3528_v5 = vpop.f32.mrf.mxu3  ;;  %3570 = vadd.xlane.f32.xlu2 %v3569_v18 }
0x18d6   :  { %v3539_v27 = vadd.f32 %v3528_v5, %v6197_v11 }
0x18d8   :  { %v3545_v53 = vadd.f32 %v3539_v27, %v5767_v52 }
0x18da   :  { %v6254_v55 = vadd.f32 %v4708_v13, %v3545_v53 }
0x18dc   :  { %v3572_v3 = vsel %vm138_vm1, %v6254_v55, 0.0 }
0x18dd   :  { %3573 = vadd.xlane.f32.xlu0 %v3572_v3  ;;  %v6308_v3 = vld [vmem:[%s6404_s6 + $0x8] ss:$0 sm:$0xff] }
0x1938   :  { %v3565_v29 = vpop.xlane.xlu0 %3564 }
0x1939   :  { %v3581_v60 = vmul.f32 %v3565_v29, %v5128_v33 }
0x193b   :  { %v6260_v30 = vsub.f32 %v6241_v19, %v3581_v60 }
0x193d   :  { %v3593_v51 = vmul.f32 %v6260_v30, %v6260_v30 }
0x193f   :  { %v3599_v22 = vsel %vm138_vm1, %v3593_v51, 0.0 }
0x1940   :  { %v3568_v11 = vpop.xlane.xlu1 %3567  ;;  %3600 = vadd.xlane.f32.xlu1 %v3599_v22 }
0x1941   :  { %v3582_v52 = vmul.f32 %v3568_v11, %v5128_v33 }
0x1943   :  { %v6266_v21 = vsub.f32 %v3554_v48, %v3582_v52 }
0x1945   :  { %v3594_v39 = vmul.f32 %v6266_v21, %v6266_v21 }
0x1947   :  { %v3602_v36 = vsel %vm138_vm1, %v3594_v39, 0.0 }
0x1948   :  { %3603 = vadd.xlane.f32.xlu2 %v3602_v36  ;;  %v3571_v31 = vpop.xlane.xlu2 %3570 }
0x1949   :  { %v3583_v44 = vmul.f32 %v3571_v31, %v5128_v33 }
0x194b   :  { %v6272_v23 = vsub.f32 %v3555_v42, %v3583_v44  ;;  %v6316_v44 = vld [vmem:[%s6404_s6 + $0x9] ss:$0 sm:$0xff] }
0x194d   :  { %v3531_v2 = vpop.f32.mrf.mxu3  ;;  %v3595_v12 = vmul.f32 %v6272_v23, %v6272_v23 }
0x194e   :  { %v3540_v26 = vadd.f32 %v3531_v2, %v6201_v17 }
0x194f   :  { %v3605_v32 = vsel %vm138_vm1, %v3595_v12, 0.0 }
0x1950   :  { %v3546_v15 = vadd.f32 %v3540_v26, %v5772_v43  ;;  %3606 = vadd.xlane.f32.xlu0 %v3605_v32  ;;  %v3574_v57 = vpop.xlane.xlu0 %3573 }
0x1951   :  { %v3584_v61 = vmul.f32 %v3574_v57, %v5128_v33 }
0x1952   :  { %v3557_v58 = vadd.f32 %v4708_v13, %v3546_v15 }
0x1953   :  { %v6281_v50 = vsub.f32 %v6254_v55, %v3584_v61 }
0x1954   :  { %v3575_v47 = vsel %vm138_vm1, %v3557_v58, 0.0 }
0x1955   :  { %v3533_v63 = vpop.f32.mrf.mxu3  ;;  %3576 = vadd.xlane.f32.xlu2 %v3575_v47  ;;  %v3596_v49 = vmul.f32 %v6281_v50, %v6281_v50 }
0x1956   :  { %v3541_v17 = vadd.f32 %v3533_v63, %v6205_v1  ;;  %v4657_v1 = vld [vmem:[%s6405_s7 + $0x10] sm:$0xff] }
0x1957   :  { %v3608_v6 = vsel %vm138_vm1, %v3596_v49, 0.0  ;;  %3754 = vmatpush.bf16.msrb.mxu0 %v4657_v1 }
0x1958   :  { %v3547_v43 = vadd.f32 %v3541_v17, %v5777_v20  ;;  %3609 = vadd.xlane.f32.xlu1 %v3608_v6 }
0x195a   :  { %v3558_v34 = vadd.f32 %v4708_v13, %v3547_v43 }
0x195c   :  { %v3578_v8 = vsel %vm138_vm1, %v3558_v34, 0.0 }
0x195d   :  { %3579 = vadd.xlane.f32.xlu0 %v3578_v8 }
0x19b3   :  { %v3601_v10 = vpop.xlane.xlu1 %3600 }
0x19b4   :  { %v3617_v59 = vmul.f32 %v3601_v10, %v5128_v33 }
0x19b6   :  { %v3623_v37 = vadd.f32 1e-06, %v3617_v59 }
0x19b8   :  { %4956 = vrsqrt.f32 %v3623_v37  ;;  %vm3635_vm7 = vweird.f32 %v3623_v37 }
0x19bb   :  { %v3604_v20 = vpop.xlane.xlu2 %3603 }
0x19bc   :  { %v3618_v54 = vmul.f32 %v3604_v20, %v5128_v33 }
0x19be   :  { %v4957_v45 = vpop.eup %4956  ;;  %v3624_v16 = vadd.f32 1e-06, %v3618_v54 }
0x19bf   :  { %v3630_v13 = vmul.f32 %v4957_v45, %v3623_v37  ;;  %vm3636_vm0 = vweird.f32 %v4957_v45 }
0x19c0   :  { %4958 = vrsqrt.f32 %v3624_v16  ;;  %vm3637_vm12 = vmor %vm3635_vm7, %vm3636_vm0  ;;  %vm3645_vm14 = vweird.f32 %v3624_v16 }
0x19c1   :  { %v3631_v40 = vmul.f32 %v4957_v45, %v3630_v13 }
0x19c3   :  { %v3632_v41 = vmul.f32 0.5, %v3631_v40  ;;  %v3607_v62 = vpop.xlane.xlu0 %3606  ;;  %v4664_v40 = vld [vmem:[%s6407_s9 + $0x68] sm:$0xff] }
0x19c4   :  { %v3619_v0 = vmul.f32 %v3607_v62, %v5128_v33 }
0x19c5   :  { %v3633_v28 = vsub.f32 1.5, %v3632_v41 }
0x19c6   :  { %v4959_v9 = vpop.eup %4958  ;;  %v3625_v4 = vadd.f32 1e-06, %v3619_v0  ;;  %v4663_v0 = vld [vmem:[%s6407_s9 + $0x60] sm:$0xff] }
0x19c7   :  { %v3634_v56 = vmul.f32 %v4957_v45, %v3633_v28  ;;  %v3640_v35 = vmul.f32 %v4959_v9, %v3624_v16  ;;  %vm3646_vm13 = vweird.f32 %v4959_v9 }
0x19c8   :  { %4960 = vrsqrt.f32 %v3625_v4  ;;  %v3577_v25 = vpop.xlane.xlu2 %3576  ;;  %vm3647_vm15 = vmor %vm3645_vm14, %vm3646_vm13  ;;  %vm3655_vm3 = vweird.f32 %v3625_v4  ;;  %vm3925_vm13 = vcmask 1040384  }
0x19c9   :  { %v3641_v48 = vmul.f32 %v4959_v9, %v3640_v35  ;;  %v3585_v7 = vmul.f32 %v3577_v25, %v5128_v33  ;;  %v3638_v14 = vsel %vm3637_vm12, %v4957_v45, %v3634_v56 }
0x19ca   :  { %v3689_v29 = vmul.f32 %v3638_v14, %v6260_v30 }
0x19cb   :  { %v3642_v24 = vmul.f32 0.5, %v3641_v48  ;;  %v6300_v46 = vsub.f32 %v3557_v58, %v3585_v7  ;;  %v3610_v42 = vpop.xlane.xlu1 %3609  ;;  %v4661_v48 = vld [vmem:[%s6407_s9 + $0x50] sm:$0xff] }
0x19cc   :  { %v3620_v18 = vmul.f32 %v3610_v42, %v5128_v33  ;;  %v3698_v30 = vmul.f32 %v6308_v3, %v3689_v29  ;;  %v4659_v29 = vld [vmem:[%s6407_s9 + $0x40] sm:$0xff] }
0x19cd   :  { %v3643_v5 = vsub.f32 1.5, %v3642_v24  ;;  %v3597_v27 = vmul.f32 %v6300_v46, %v6300_v46  ;;  %v4660_v24 = vld [vmem:[%s6407_s9 + $0x48] sm:$0xff] }
0x19ce   :  { %v4961_v53 = vpop.eup %4960  ;;  %v3626_v60 = vadd.f32 1e-06, %v3620_v18  ;;  %v3707_v58 = vadd.f32 %v6316_v44, %v3698_v30 }
0x19cf   :  { %v3644_v51 = vmul.f32 %v4959_v9, %v3643_v5  ;;  %v3650_v22 = vmul.f32 %v4961_v53, %v3625_v4  ;;  %v3611_v11 = vsel %vm138_vm1, %v3597_v27, 0.0  ;;  %vm3656_vm2 = vweird.f32 %v4961_v53 }
0x19d0   :  { %4962 = vrsqrt.f32 %v3626_v60  ;;  %v3580_v52 = vpop.xlane.xlu0 %3579  ;;  %3612 = vadd.xlane.f32.xlu1 %v3611_v11  ;;  %vm3657_vm4 = vmor %vm3655_vm3, %vm3656_vm2  ;;  %vm3665_vm6 = vweird.f32 %v3626_v60 }
0x19d1   :  { %v3648_v39 = vsel %vm3647_vm15, %v4959_v9, %v3644_v51  ;;  %v3651_v36 = vmul.f32 %v4961_v53, %v3650_v22  ;;  %v3586_v31 = vmul.f32 %v3580_v52, %v5128_v33  ;;  %v4662_v9 = vld [vmem:[%s6407_s9 + $0x58] sm:$0xff] }
0x19d2   :  { %v3690_v2 = vmul.f32 %v3648_v39, %v6266_v21 }
0x19d3   :  { %v3652_v12 = vmul.f32 0.5, %v3651_v36  ;;  %v6320_v26 = vsub.f32 %v3558_v34, %v3586_v31 }
0x19d4   :  { %v3699_v32 = vmul.f32 %v6308_v3, %v3690_v2 }
0x19d5   :  { %v3653_v15 = vsub.f32 1.5, %v3652_v12  ;;  %v3598_v57 = vmul.f32 %v6320_v26, %v6320_v26 }
0x19d6   :  { %v4963_v61 = vpop.eup %4962  ;;  %v3708_v47 = vadd.f32 %v6316_v44, %v3699_v32 }
0x19d7   :  { %v3654_v63 = vmul.f32 %v4961_v53, %v3653_v15  ;;  %v3660_v49 = vmul.f32 %v4963_v61, %v3626_v60  ;;  %v3614_v17 = vsel %vm138_vm1, %v3598_v57, 0.0  ;;  %vm3666_vm5 = vweird.f32 %v4963_v61 }
0x19d8   :  { %v3713_v21 = vpack.c.bf16 %v3708_v47, %v3707_v58  ;;  %3615 = vadd.xlane.f32.xlu2 %v3614_v17  ;;  %vm3667_vm8 = vmor %vm3665_vm6, %vm3666_vm5 }
0x19d9   :  { %v3661_v6 = vmul.f32 %v4963_v61, %v3660_v49  ;;  %v3658_v43 = vsel %vm3657_vm4, %v4961_v53, %v3654_v63 }
0x19da   :  { %4532 = vmatmul.msk.bf16.vlgmr.msrb.gmra.mxu0 %vm138_vm1, %v3713_v21  ;;  %v3691_v38 = vmul.f32 %v3658_v43, %v6272_v23  ;;  %v4666_v23 = vld [vmem:[%s6407_s9 + $0x78] sm:$0xff] }
0x19db   :  { %v3662_v34 = vmul.f32 0.5, %v3661_v6  ;;  %3893 = vmatpush.bf16.msrb.mxu1 %v4666_v23 }
0x19dc   :  { %v3700_v1 = vmul.f32 %v6308_v3, %v3691_v38 }
0x19dd   :  { %v3663_v8 = vsub.f32 1.5, %v3662_v34 }
0x19de   :  { %v3709_v54 = vadd.f32 %v6316_v44, %v3700_v1 }
0x19df   :  { %v3664_v10 = vmul.f32 %v4963_v61, %v3663_v8 }
0x19e1   :  { %v3668_v59 = vsel %vm3667_vm8, %v4963_v61, %v3664_v10 }
0x19e2   :  { %v3692_v37 = vmul.f32 %v3668_v59, %v6281_v50  ;;  %v4665_v50 = vld [vmem:[%s6407_s9 + $0x70] sm:$0xff] }
0x19e3   :  { %3894 = vmatpush.bf16.msrb.mxu1 %v4665_v50 }
0x19e4   :  { %v3701_v20 = vmul.f32 %v6308_v3, %v3692_v37 }
0x19e6   :  { %v3710_v45 = vadd.f32 %v6316_v44, %v3701_v20 }
0x19e7   :  { %3895 = vmatpush.bf16.msrb.mxu1 %v4664_v40 }
0x19e8   :  { %v3714_v16 = vpack.c.bf16 %v3710_v45, %v3709_v54 }
0x19ea   :  { %4533 = vmatmul.msk.bf16.gmra.mxu0 %vm138_vm1, %v3714_v16 }
0x19eb   :  { %3896 = vmatpush.bf16.msrb.mxu1 %v4663_v0 }
0x19ef   :  { %3897 = vmatpush.bf16.msrb.mxu1 %v4662_v9 }
0x19f3   :  { %3898 = vmatpush.bf16.msrb.mxu1 %v4661_v48 }
0x19f7   :  { %3899 = vmatpush.bf16.msrb.mxu1 %v4660_v24 }
0x19fb   :  { %3900 = vmatpush.bf16.msrb.mxu1 %v4659_v29 }
0x1a43   :  { %v3613_v13 = vpop.xlane.xlu1 %3612 }
0x1a44   :  { %v3621_v41 = vmul.f32 %v3613_v13, %v5128_v33 }
0x1a46   :  { %v3627_v62 = vadd.f32 1e-06, %v3621_v41 }
0x1a48   :  { %4964 = vrsqrt.f32 %v3627_v62  ;;  %vm3675_vm10 = vweird.f32 %v3627_v62 }
0x1a4b   :  { %v3616_v28 = vpop.xlane.xlu2 %3615 }
0x1a4c   :  { %v3622_v4 = vmul.f32 %v3616_v28, %v5128_v33  ;;  %v6362_v33 = vld [vmem:[%s6406_s8 + $0x1] ss:$0 sm:$0xff] }
0x1a4e   :  { %v4965_v56 = vpop.eup %4964  ;;  %v3628_v35 = vadd.f32 1e-06, %v3622_v4 }
0x1a4f   :  { %v3670_v25 = vmul.f32 %v4965_v56, %v3627_v62  ;;  %vm3676_vm9 = vweird.f32 %v4965_v56 }
0x1a50   :  { %4966 = vrsqrt.f32 %v3628_v35  ;;  %vm3677_vm11 = vmor %vm3675_vm10, %vm3676_vm9  ;;  %vm3685_vm7 = vweird.f32 %v3628_v35 }
0x1a51   :  { %v3671_v7 = vmul.f32 %v4965_v56, %v3670_v25 }
0x1a53   :  { %v3672_v14 = vmul.f32 0.5, %v3671_v7 }
0x1a55   :  { %v3673_v42 = vsub.f32 1.5, %v3672_v14 }
0x1a56   :  { %v4967_v18 = vpop.eup %4966 }
0x1a57   :  { %v3674_v5 = vmul.f32 %v4965_v56, %v3673_v42  ;;  %v3680_v27 = vmul.f32 %v4967_v18, %v3628_v35  ;;  %v3756_v53 = vpop.f32.mrf.mxu0  ;;  %vm3686_vm0 = vweird.f32 %v4967_v18 }
0x1a58   :  { %v3757_v60 = vadd.f32 %v6362_v33, %v3756_v53  ;;  %vm3687_vm12 = vmor %vm3685_vm7, %vm3686_vm0 }
0x1a59   :  { %v3681_v51 = vmul.f32 %v4967_v18, %v3680_v27  ;;  %v3678_v11 = vsel %vm3677_vm11, %v4965_v56, %v3674_v5  ;;  %v4668_v27 = vld [vmem:[%s6408_s10 + $0x8] sm:$0xff] }
0x1a5a   :  { %v3771_v22 = vmul.f32 %v3757_v60, %v3757_v60  ;;  %v3693_v31 = vmul.f32 %v3678_v11, %v6300_v46  ;;  %3957 = vmatpush.bf16.msrb.mxu2 %v4668_v27 }
0x1a5b   :  { %v3682_v52 = vmul.f32 0.5, %v3681_v51 }
0x1a5c   :  { %v3777_v39 = vmul.f32 %v3771_v22, %v3757_v60  ;;  %v3702_v63 = vmul.f32 %v6308_v3, %v3693_v31 }
0x1a5d   :  { %v3683_v36 = vsub.f32 1.5, %v3682_v52 }
0x1a5e   :  { %v3783_v30 = vmul.f32 0.044715, %v3777_v39  ;;  %v3711_v21 = vadd.f32 %v6316_v44, %v3702_v63 }
0x1a5f   :  { %v3684_v2 = vmul.f32 %v4967_v18, %v3683_v36  ;;  %v3758_v12 = vpop.f32.mrf.mxu0 }
0x1a60   :  { %v3789_v32 = vadd.f32 %v3783_v30, %v3757_v60  ;;  %v3759_v15 = vadd.f32 %v6362_v33, %v3758_v12  ;;  %v4667_v12 = vld [vmem:[%s6408_s10] sm:$0xff] }
0x1a61   :  { %v3688_v57 = vsel %vm3687_vm12, %v4967_v18, %v3684_v2  ;;  %3958 = vmatpush.bf16.msrb.mxu2 %v4667_v12 }
0x1a62   :  { %v3694_v61 = vmul.f32 %v3688_v57, %v6320_v26  ;;  %v3795_v58 = vmul.f32 0.7978846, %v3789_v32  ;;  %v3772_v47 = vmul.f32 %v3759_v15, %v3759_v15 }
0x1a64   :  { %v3778_v49 = vmul.f32 %v3772_v47, %v3759_v15  ;;  %v3703_v17 = vmul.f32 %v6308_v3, %v3694_v61  ;;  %4968 = vtanh.f32 %v3795_v58 }
0x1a66   :  { %v3784_v46 = vmul.f32 0.044715, %v3778_v49  ;;  %v3712_v6 = vadd.f32 %v6316_v44, %v3703_v17 }
0x1a67   :  { %v3761_v43 = vpop.f32.mrf.mxu0 }
0x1a68   :  { %v3790_v34 = vadd.f32 %v3784_v46, %v3759_v15  ;;  %v3762_v8 = vadd.f32 %v6362_v33, %v3761_v43  ;;  %v3715_v38 = vpack.c.bf16 %v3712_v6, %v3711_v21 }
0x1a6a   :  { %v3796_v10 = vmul.f32 0.7978846, %v3790_v34  ;;  %v3773_v26 = vmul.f32 %v3762_v8, %v3762_v8  ;;  %4534 = vmatmul.msk.bf16.gmra.mxu0 %vm138_vm1, %v3715_v38  ;;  %v4969_v59 = vpop.eup %4968  ;;  %v4712_v38 = vld [vmem:[%s6404_s6 + $0xb] ss:$0 sm:$0xff] }
0x1a6b   :  { %v3807_v3 = vadd.f32 1.0, %v4969_v59 }
0x1a6c   :  { %4970 = vtanh.f32 %v3796_v10  ;;  %v3779_v37 = vmul.f32 %v3773_v26, %v3762_v8 }
0x1a6d   :  { %v3813_v50 = vmul.f32 0.5, %v3807_v3 }
0x1a6e   :  { %v3785_v1 = vmul.f32 0.044715, %v3779_v37 }
0x1a6f   :  { %v3763_v20 = vpop.f32.mrf.mxu0  ;;  %v3819_v0 = vmul.f32 %v3813_v50, %v3757_v60 }
0x1a70   :  { %v3791_v54 = vadd.f32 %v3785_v1, %v3762_v8  ;;  %v3764_v45 = vadd.f32 %v6362_v33, %v3763_v20 }
0x1a72   :  { %v4971_v16 = vpop.eup %4970  ;;  %v3797_v44 = vmul.f32 0.7978846, %v3791_v54  ;;  %v3774_v23 = vmul.f32 %v3764_v45, %v3764_v45 }
0x1a73   :  { %v3808_v13 = vadd.f32 1.0, %v4971_v16 }
0x1a74   :  { %v3780_v40 = vmul.f32 %v3774_v23, %v3764_v45  ;;  %4972 = vtanh.f32 %v3797_v44 }
0x1a75   :  { %v3814_v41 = vmul.f32 0.5, %v3808_v13 }
0x1a76   :  { %v3786_v62 = vmul.f32 0.044715, %v3780_v40 }
0x1a77   :  { %v3820_v28 = vmul.f32 %v3814_v41, %v3759_v15 }
0x1a78   :  { %v3792_v9 = vadd.f32 %v3786_v62, %v3764_v45 }
0x1a79   :  { %v3825_v4 = vpack.c.bf16 %v3820_v28, %v3819_v0 }
0x1a7a   :  { %v3798_v56 = vmul.f32 0.7978846, %v3792_v9  ;;  %v4973_v35 = vpop.eup %4972 }
0x1a7b   :  { %3901 = vmatmul.bf16.vlgmr.msrb.gmra.mxu1 %v3825_v4  ;;  %v3809_v25 = vadd.f32 1.0, %v4973_v35 }
0x1a7c   :  { %4974 = vtanh.f32 %v3798_v56 }
0x1a7d   :  { %v3815_v14 = vmul.f32 0.5, %v3809_v25 }
0x1a7f   :  { %v3821_v42 = vmul.f32 %v3815_v14, %v3762_v8 }
0x1a82   :  { %v4975_v48 = vpop.eup %4974 }
0x1a83   :  { %v3810_v7 = vadd.f32 1.0, %v4975_v48 }
0x1a85   :  { %v3816_v24 = vmul.f32 0.5, %v3810_v7 }
0x1a87   :  { %v3822_v18 = vmul.f32 %v3816_v24, %v3764_v45 }
0x1a89   :  { %v3826_v5 = vpack.c.bf16 %v3822_v18, %v3821_v42 }
0x1a8b   :  { %3905 = vmatmul.bf16.gmra.mxu1 %v3826_v5 }
0x1ae7   :  { %v3766_v53 = vpop.f32.mrf.mxu0 }
0x1ae8   :  { %v3767_v29 = vadd.f32 %v6362_v33, %v3766_v53 }
0x1aea   :  { %v3775_v60 = vmul.f32 %v3767_v29, %v3767_v29 }
0x1aec   :  { %v3781_v51 = vmul.f32 %v3775_v60, %v3767_v29 }
0x1aee   :  { %v3787_v22 = vmul.f32 0.044715, %v3781_v51 }
0x1aef   :  { %v3768_v11 = vpop.f32.mrf.mxu0 }
0x1af0   :  { %v3793_v52 = vadd.f32 %v3787_v22, %v3767_v29  ;;  %v3769_v39 = vadd.f32 %v6362_v33, %v3768_v11 }
0x1af2   :  { %v3799_v36 = vmul.f32 0.7978846, %v3793_v52  ;;  %v3776_v31 = vmul.f32 %v3769_v39, %v3769_v39 }
0x1af4   :  { %v3782_v30 = vmul.f32 %v3776_v31, %v3769_v39  ;;  %4976 = vtanh.f32 %v3799_v36 }
0x1af6   :  { %v3788_v2 = vmul.f32 0.044715, %v3782_v30 }
0x1af8   :  { %v3794_v32 = vadd.f32 %v3788_v2, %v3769_v39  ;;  %v3902_v15 = vpop.f32.mrf.mxu1 }
0x1af9   :  { %v3913_v8 = vadd.f32 %v3902_v15, %v6241_v19  ;;  %v4713_v19 = vld [vmem:[%s6409_s11] ss:$0 sm:$0xff] }
0x1afa   :  { %v3800_v57 = vmul.f32 0.7978846, %v3794_v32  ;;  %v4977_v61 = vpop.eup %4976 }
0x1afb   :  { %v3811_v58 = vadd.f32 1.0, %v4977_v61  ;;  %v3920_v59 = vadd.f32 %v4712_v38, %v3913_v8 }
0x1afc   :  { %4978 = vtanh.f32 %v3800_v57 }
0x1afd   :  { %v3817_v33 = vmul.f32 0.5, %v3811_v58 }
0x1aff   :  { %v3823_v46 = vmul.f32 %v3817_v33, %v3767_v29 }
0x1b00   :  { %v3904_v47 = vpop.f32.mrf.mxu1 }
0x1b02   :  { %v4979_v63 = vpop.eup %4978 }
0x1b03   :  { %v3812_v49 = vadd.f32 1.0, %v4979_v63 }
0x1b05   :  { %v3818_v17 = vmul.f32 0.5, %v3812_v49 }
0x1b07   :  { %v3824_v21 = vmul.f32 %v3818_v17, %v3769_v39 }
0x1b08   :  { %v3906_v6 = vpop.f32.mrf.mxu1 }
0x1b09   :  { %v3827_v43 = vpack.c.bf16 %v3824_v21, %v3823_v46 }
0x1b0b   :  { %3909 = vmatmul.bf16.gmra.mxu1 %v3827_v43 }
0x1b10   :  { %v3907_v34 = vpop.f32.mrf.mxu1 }
0x1b11   :  { %v3914_v10 = vadd.f32 %v3907_v34, %v6254_v55 }
0x1b13   :  { %v3921_v26 = vadd.f32 %v4712_v38, %v3914_v10 }
0x1b15   :  { %v3923_v37 = vrot.slane %v3921_v26, 7 }
0x1b17   :  { %v3926_v1 = vsel %vm3925_vm13, %v3920_v59, %v3923_v37 }
0x1b18   :  { %v3927_v3 = vpack.c.bf16 %v3926_v1, %v3926_v1 }
0x1b1a   :  { %4592 = vmatmul.msk.bf16.vlgmr.msrb.gmra.mxu2 %vm138_vm1, %v3927_v3 }
0x1b88   :  { %v3910_v20 = vpop.f32.mrf.mxu1 }
0x1b90   :  { %v3911_v54 = vpop.f32.mrf.mxu1 }
0x1b9d   :  { %v3960_v55 = vpop.f32.mrf.mxu2 }
0x1b9e   :  { %v3961_v45 = vadd.f32 %v4713_v19, %v3960_v55 }
0x1ba0   :  { %3964 = vst [vmem:[#allocation2] sm:$0x3] %v3961_v45 }
0x1ba1   :  { %3975 = dma.vmem_to_hbm [thread:$0]  %s3971_s14, 32, %s3973_s15, [#allocation3]  }
0x1ba5   :  { %v3962_v16 = vpop.f32.mrf.mxu2 }
0x1ba6   :  { %5004 = dma.done.wait [#allocation3], 32  }
0x1ba7   :  { %5005 = vsyncadd [#allocation3], 4294967264 }
0x1ba8   :  { %3980 = vsyncpa [#allocation3], 1 }

</bundles_post_ra>
